<compile_context>
chip_gen: v5e
topology: v5e:2x2
jax: 0.10.0
libtpu: 0.0.40
codegen_flags: <defaults>
</compile_context>

<pallas_src>
import jax
import jax.numpy as jnp
from jax import lax
from jax.experimental import pallas as pl
from jax.experimental.pallas import tpu as pltpu


def _space_encode_kernel(x_ref, wbig_ref, wexp_ref, out_ref):
    # x_ref   : (BM, IN+1)        sample features + trailing ones column (bias)
    # wbig_ref: (IN+1, 6*HW)      fused linear weights (+bias row) emitting the
    #                             three conv-shifted copies of the zero-padded
    #                             row/col vectors, spatially replicated per lane
    # wexp_ref: (BM*Cout, 10*BM)  block-diagonal, BN-folded 3x3 conv weights with
    #                             the conv bias in the trailing ones-tap columns
    # out_ref : (BM*Cout, HW)     output rows ordered sample-major / channel-minor
    BM = x_ref.shape[0]
    HW = out_ref.shape[1]

    # Fused Linear1/Linear2 (+bias):  rc[m, dy*HW + p]     = row_pad[m, i(p)+dy]
    #                                 rc[m, (3+dx)*HW + p] = col_pad[m, j(p)+dx]
    # where p = i*32 + j and row_pad/col_pad carry the conv's zero padding.
    rc = jnp.dot(x_ref[...], wbig_ref[...],
                 preferred_element_type=jnp.float32)            # (BM, 6*HW)

    # im2col of the outer product row ⊗ col: nine dense (BM, HW) tap products
    # (lane slices at multiples of HW = 1024 are tile-aligned), plus a ones block
    # that carries the folded conv bias.  Kept in registers — no scratch.
    blocks = []
    for dy in range(3):
        r_sh = rc[:, dy * HW:(dy + 1) * HW]                      # (BM, HW)
        for dx in range(3):
            blocks.append(r_sh * rc[:, (3 + dx) * HW:(4 + dx) * HW])
    blocks.append(jnp.ones((BM, HW), jnp.float32))
    patches = jnp.concatenate(blocks, axis=0)                    # (10*BM, HW)

    # Single block-diagonal conv matmul (BatchNorm + conv bias folded in wexp):
    # conv[m*Cout + c, p] = sum_t wconv_folded[c, t] * patches[t*BM + m, p] + bc[c]
    conv = jnp.dot(wexp_ref[...], patches,
                   preferred_element_type=jnp.float32)           # (BM*Cout, HW)

    # Numerically stable softplus; lane-dense unmasked store.
    out_ref[...] = jnp.maximum(conv, 0.0) + jnp.log(1.0 + jnp.exp(-jnp.abs(conv)))


def space_encode_pallas(x, w1, b1, w2, b2, w_conv, b_conv,
                        gamma, beta, run_mean, run_var, eps=1e-5, block_b=8):
    """x: (B, 12); w1/w2: (32, 12); b1/b2: (32,); w_conv: (16, 1, 3, 3);
    b_conv/gamma/beta/run_mean/run_var: (16,).  Returns (B, 16, 32, 32)."""
    B, IN = x.shape
    H = W = w1.shape[0]            # 32x32 spatial image from the outer product
    HW = H * W
    Cout = w_conv.shape[0]
    f32 = jnp.float32
    BM = block_b                   # samples per grid step (multiple of 8)

    # ---- wrapper-side weight plumbing (done once, pure layout work) ----
    # Zero-pad the linear outputs at both ends => conv's padding=1 comes for free.
    zc = jnp.zeros((IN, 1), f32)
    z1 = jnp.zeros((1,), f32)
    w1t_pad = jnp.concatenate([zc, w1.T.astype(f32), zc], axis=1)      # (IN, 34)
    w2t_pad = jnp.concatenate([zc, w2.T.astype(f32), zc], axis=1)      # (IN, 34)
    b1_pad = jnp.concatenate([z1, b1.astype(f32), z1])                 # (34,)
    b2_pad = jnp.concatenate([z1, b2.astype(f32), z1])                 # (34,)

    # Fuse tap shifts + spatial replication into the linear weights so the kernel's
    # first matmul directly emits row_pad[i+dy] / col_pad[j+dx] per lane.
    row_w = [jnp.repeat(w1t_pad[:, d:d + H], W, axis=1) for d in range(3)]  # (IN, HW)
    col_w = [jnp.tile(w2t_pad[:, d:d + W], (1, H)) for d in range(3)]       # (IN, HW)
    wbig = jnp.concatenate(row_w + col_w, axis=1)                           # (IN, 6*HW)
    row_b = [jnp.repeat(b1_pad[d:d + H], W) for d in range(3)]
    col_b = [jnp.tile(b2_pad[d:d + W], H) for d in range(3)]
    bbig = jnp.concatenate(row_b + col_b)[None, :]                          # (1, 6*HW)
    wbig_aug = jnp.concatenate([wbig, bbig], axis=0)                        # (IN+1, 6*HW)

    # Fold inference-mode BatchNorm + conv bias, then expand block-diagonally over
    # the BM samples of a block (ones-tap columns carry the bias).
    scale = gamma.astype(f32) / jnp.sqrt(run_var.astype(f32) + eps)         # (Cout,)
    wc9 = w_conv.reshape(Cout, 9).astype(f32) * scale[:, None]              # (Cout, 9)
    bc = (scale * (b_conv.astype(f32) - run_mean.astype(f32))
          + beta.astype(f32))                                               # (Cout,)
    wc10 = jnp.concatenate([wc9, bc[:, None]], axis=1)                      # (Cout, 10)
    # wexp[m*Cout + c, t*BM + n] = wc10[c, t] iff n == m
    wexp = jnp.einsum('ct,mn->mctn', wc10,
                      jnp.eye(BM, dtype=f32)).reshape(BM * Cout, 10 * BM)

    # ---- batch padding (zeros keep the discarded pad rows finite) ----
    x_aug = jnp.concatenate([x.astype(f32), jnp.ones((B, 1), f32)], axis=1)  # (B, IN+1)
    B_pad = ((B + BM - 1) // BM) * BM
    if B_pad != B:
        x_aug = jnp.concatenate(
            [x_aug, jnp.zeros((B_pad - B, IN + 1), f32)], axis=0)

    out2d = pl.pallas_call(
        _space_encode_kernel,
        out_shape=jax.ShapeDtypeStruct((B_pad * Cout, HW), f32),
        grid_spec=pltpu.PrefetchScalarGridSpec(
            num_scalar_prefetch=0,
            grid=(B_pad // BM,),
            in_specs=[
                pl.BlockSpec((BM, IN + 1), lambda b: (b, 0)),
                pl.BlockSpec((IN + 1, 6 * HW), lambda b: (0, 0)),
                pl.BlockSpec((BM * Cout, 10 * BM), lambda b: (0, 0)),
            ],
            out_specs=pl.BlockSpec((BM * Cout, HW), lambda b: (b, 0)),
        ),
        compiler_params=pltpu.CompilerParams(
            dimension_semantics=("parallel",)),
    )(x_aug, wbig_aug, wexp)

    # Rows are sample-major / channel-minor => free reshape to NCHW, drop padding.
    return out2d.reshape(B_pad, Cout, H, W)[:B]


def _reference_forward(x, w1, b1, w2, b2, w_conv, b_conv,
                       gamma, beta, run_mean, run_var, eps=1e-5):
    hi = lax.Precision.HIGHEST
    row = jnp.dot(x, w1.T, precision=hi) + b1[None, :]
    col = jnp.dot(x, w2.T, precision=hi) + b2[None, :]
    o = (row[:, :, None] * col[:, None, :])[:, None, :, :]          # (B,1,32,32)
    dn = lax.conv_dimension_numbers(o.shape, w_conv.shape, ("NCHW", "OIHW", "NCHW"))
    y = lax.conv_general_dilated(o, w_conv, (1, 1), "SAME",
                                 dimension_numbers=dn, precision=hi)
    y = y + b_conv[None, :, None, None]
    y = (gamma[None, :, None, None] * (y - run_mean[None, :, None, None])
         / jnp.sqrt(run_var[None, :, None, None] + eps)
         + beta[None, :, None, None])
    return jnp.logaddexp(y, 0.0)                                     # softplus


if __name__ == "__main__":
    B, IN, HID, C_OUT, H = 2, 12, 32, 16, 32

    key = jax.random.PRNGKey(0)
    ks = jax.random.split(key, 11)
    x = jax.random.normal(ks[0], (B, IN), jnp.float32)
    w1 = jax.random.normal(ks[1], (HID, IN), jnp.float32) / jnp.sqrt(IN)
    b1 = jax.random.normal(ks[2], (HID,), jnp.float32) * 0.1
    w2 = jax.random.normal(ks[3], (HID, IN), jnp.float32) / jnp.sqrt(IN)
    b2 = jax.random.normal(ks[4], (HID,), jnp.float32) * 0.1
    w_conv = jax.random.normal(ks[5], (C_OUT, 1, 3, 3), jnp.float32) / 3.0
    b_conv = jax.random.normal(ks[6], (C_OUT,), jnp.float32) * 0.1
    gamma = jax.random.uniform(ks[7], (C_OUT,), jnp.float32, 0.5, 1.5)
    beta = jax.random.normal(ks[8], (C_OUT,), jnp.float32) * 0.1
    run_mean = jax.random.normal(ks[9], (C_OUT,), jnp.float32) * 0.1
    run_var = jnp.abs(jax.random.normal(ks[10], (C_OUT,), jnp.float32)) + 0.5

    out = space_encode_pallas(x, w1, b1, w2, b2, w_conv, b_conv,
                              gamma, beta, run_mean, run_var)
    out = jax.block_until_ready(out)

    ref = _reference_forward(x, w1, b1, w2, b2, w_conv, b_conv,
                             gamma, beta, run_mean, run_var)
    assert out.shape == (B, C_OUT, H, H)
    max_diff = jnp.max(jnp.abs(out - ref))
    assert jnp.allclose(out, ref, atol=1e-3, rtol=1e-3), \
        f"max abs diff {max_diff}"

    print("KERNEL_OK")
</pallas_src>

<mosaic_0001>
module attributes {stable_mosaic.version = 11 : i64} {
  func.func @_space_encode_kernel(%arg0: i32, %arg1: memref<8x13xf32, #tpu.memory_space<vmem>>, %arg2: memref<13x6144xf32, #tpu.memory_space<vmem>>, %arg3: memref<128x80xf32, #tpu.memory_space<vmem>>, %arg4: memref<128x1024xf32, #tpu.memory_space<vmem>>) attributes {dimension_semantics = [#tpu.dimension_semantics<parallel>], iteration_bounds = array<i64: 1>, scalar_prefetch = 0 : i64, scratch_operands = 0 : i64, tpu.core_type = #tpu.core_type<tc>, window_params = [{transform_indices = @transform_0, window_bounds = array<i64: 8, 13>}, {pipeline_mode = #tpu.pipeline_mode<synchronous>, transform_indices = @transform_1, window_bounds = array<i64: 13, 6144>}, {pipeline_mode = #tpu.pipeline_mode<synchronous>, transform_indices = @transform_2, window_bounds = array<i64: 128, 80>}, {transform_indices = @transform_3, window_bounds = array<i64: 128, 1024>}]} {
    %c0 = arith.constant 0 : index
    %c0_0 = arith.constant 0 : index
    %0 = vector.load %arg1[%c0, %c0_0] : memref<8x13xf32, #tpu.memory_space<vmem>>, vector<8x13xf32>
    %c0_1 = arith.constant 0 : index
    %c0_2 = arith.constant 0 : index
    %1 = vector.load %arg2[%c0_1, %c0_2] : memref<13x6144xf32, #tpu.memory_space<vmem>>, vector<13x6144xf32>
    %cst = arith.constant dense<0.000000e+00> : vector<8x6144xf32>
    %2 = tpu.matmul %0, %1, %cst {dimension_numbers = #tpu.dot_dimension_numbers<[1], [0], [0], [1], [0, 0, 1, 1], [], []>} : vector<8x13xf32>, vector<13x6144xf32>, vector<8x6144xf32> -> vector<8x6144xf32>
    %3 = vector.extract_strided_slice %2 {offsets = [0, 0], sizes = [8, 1024], strides = [1, 1]} : vector<8x6144xf32> to vector<8x1024xf32>
    %4 = vector.extract_strided_slice %2 {offsets = [0, 3072], sizes = [8, 1024], strides = [1, 1]} : vector<8x6144xf32> to vector<8x1024xf32>
    %5 = arith.mulf %3, %4 : vector<8x1024xf32>
    %6 = vector.extract_strided_slice %2 {offsets = [0, 4096], sizes = [8, 1024], strides = [1, 1]} : vector<8x6144xf32> to vector<8x1024xf32>
    %7 = arith.mulf %3, %6 : vector<8x1024xf32>
    %8 = vector.extract_strided_slice %2 {offsets = [0, 5120], sizes = [8, 1024], strides = [1, 1]} : vector<8x6144xf32> to vector<8x1024xf32>
    %9 = arith.mulf %3, %8 : vector<8x1024xf32>
    %10 = vector.extract_strided_slice %2 {offsets = [0, 1024], sizes = [8, 1024], strides = [1, 1]} : vector<8x6144xf32> to vector<8x1024xf32>
    %11 = vector.extract_strided_slice %2 {offsets = [0, 3072], sizes = [8, 1024], strides = [1, 1]} : vector<8x6144xf32> to vector<8x1024xf32>
    %12 = arith.mulf %10, %11 : vector<8x1024xf32>
    %13 = vector.extract_strided_slice %2 {offsets = [0, 4096], sizes = [8, 1024], strides = [1, 1]} : vector<8x6144xf32> to vector<8x1024xf32>
    %14 = arith.mulf %10, %13 : vector<8x1024xf32>
    %15 = vector.extract_strided_slice %2 {offsets = [0, 5120], sizes = [8, 1024], strides = [1, 1]} : vector<8x6144xf32> to vector<8x1024xf32>
    %16 = arith.mulf %10, %15 : vector<8x1024xf32>
    %17 = vector.extract_strided_slice %2 {offsets = [0, 2048], sizes = [8, 1024], strides = [1, 1]} : vector<8x6144xf32> to vector<8x1024xf32>
    %18 = vector.extract_strided_slice %2 {offsets = [0, 3072], sizes = [8, 1024], strides = [1, 1]} : vector<8x6144xf32> to vector<8x1024xf32>
    %19 = arith.mulf %17, %18 : vector<8x1024xf32>
    %20 = vector.extract_strided_slice %2 {offsets = [0, 4096], sizes = [8, 1024], strides = [1, 1]} : vector<8x6144xf32> to vector<8x1024xf32>
    %21 = arith.mulf %17, %20 : vector<8x1024xf32>
    %22 = vector.extract_strided_slice %2 {offsets = [0, 5120], sizes = [8, 1024], strides = [1, 1]} : vector<8x6144xf32> to vector<8x1024xf32>
    %23 = arith.mulf %17, %22 : vector<8x1024xf32>
    %cst_3 = arith.constant 1.000000e+00 : f32
    %24 = vector.broadcast %cst_3 : f32 to vector<8x1024xf32>
    %25 = tpu.concatenate %5, %7, %9, %12, %14, %16, %19, %21, %23, %24 in 0 : vector<8x1024xf32>, vector<8x1024xf32>, vector<8x1024xf32>, vector<8x1024xf32>, vector<8x1024xf32>, vector<8x1024xf32>, vector<8x1024xf32>, vector<8x1024xf32>, vector<8x1024xf32>, vector<8x1024xf32> -> vector<80x1024xf32>
    %c0_4 = arith.constant 0 : index
    %c0_5 = arith.constant 0 : index
    %26 = vector.load %arg3[%c0_4, %c0_5] : memref<128x80xf32, #tpu.memory_space<vmem>>, vector<128x80xf32>
    %cst_6 = arith.constant dense<0.000000e+00> : vector<128x1024xf32>
    %27 = tpu.matmul %26, %25, %cst_6 {dimension_numbers = #tpu.dot_dimension_numbers<[1], [0], [0], [1], [0, 0, 1, 1], [], []>} : vector<128x80xf32>, vector<80x1024xf32>, vector<128x1024xf32> -> vector<128x1024xf32>
    %cst_7 = arith.constant 0.000000e+00 : f32
    %28 = vector.broadcast %cst_7 : f32 to vector<128x1024xf32>
    %29 = arith.maximumf %27, %28 : vector<128x1024xf32>
    %30 = math.absf %27 : vector<128x1024xf32>
    %cst_8 = arith.constant 0.000000e+00 : f32
    %31 = vector.broadcast %cst_8 : f32 to vector<128x1024xf32>
    %32 = arith.subf %31, %30 : vector<128x1024xf32>
    %33 = math.exp %32 : vector<128x1024xf32>
    %cst_9 = arith.constant 1.000000e+00 : f32
    %34 = vector.broadcast %cst_9 : f32 to vector<128x1024xf32>
    %35 = arith.addf %34, %33 : vector<128x1024xf32>
    %36 = math.log %35 : vector<128x1024xf32>
    %37 = arith.addf %29, %36 : vector<128x1024xf32>
    %c0_10 = arith.constant 0 : index
    %c0_11 = arith.constant 0 : index
    %38 = vector.load %arg4[%c0_10, %c0_11] : memref<128x1024xf32, #tpu.memory_space<vmem>>, vector<128x1024xf32>
    tpu.vector_store %arg4[%c0_10, %c0_11], %37 {strides = array<i32>} : memref<128x1024xf32, #tpu.memory_space<vmem>>, vector<128x1024xf32>,
    return
  }
  func.func @transform_0(%arg0: i32) -> (i32, i32) {
    %c0_i32 = arith.constant 0 : i32
    %c0_i32_0 = arith.constant 0 : i32
    return %arg0, %c0_i32 : i32, i32
  }
  func.func @transform_1(%arg0: i32) -> (i32, i32) {
    %c0_i32 = arith.constant 0 : i32
    %c0_i32_0 = arith.constant 0 : i32
    %c0_i32_1 = arith.constant 0 : i32
    return %c0_i32, %c0_i32_0 : i32, i32
  }
  func.func @transform_2(%arg0: i32) -> (i32, i32) {
    %c0_i32 = arith.constant 0 : i32
    %c0_i32_0 = arith.constant 0 : i32
    %c0_i32_1 = arith.constant 0 : i32
    return %c0_i32, %c0_i32_0 : i32, i32
  }
  func.func @transform_3(%arg0: i32) -> (i32, i32) {
    %c0_i32 = arith.constant 0 : i32
    %c0_i32_0 = arith.constant 0 : i32
    return %arg0, %c0_i32 : i32, i32
  }
}

</mosaic_0001>

<bundles_post_ra>
// kernel: tpu_custom_call.1
= control target key start
LH: loop header
LB: loop body
LE: loop exit
PB: predicated region body
PF: predicated region fallthrough
CT: control target
= control target key end

     0   :  { %8 = vsyncpa [#allocation3], 0  ;;  %s5186_s0 = inlined_call_operand.vmem [shape: f32[8,13], index: 0, kind: input, shape index: {}]   ;;  %s5187_s1 = inlined_call_operand.hbm [shape: f32[13,6144], index: 1, kind: input, shape index: {}]   ;;  %s5188_s2 = inlined_call_operand.vmem [shape: f32[128,80], index: 2, kind: input, shape index: {}]   ;;  %s5189_s3 = inlined_call_operand.hbm [shape: f32[128,1024], index: 3, kind: output, shape index: {}]  }
   0x1   :  { %9 = vsyncpa [#allocation4], 0  ;;  %s16_s14 = sshll.u32 %s5187_s1, 4  ;;  %s3993_s15 = smov [#allocation2]   ;;  %s17_s14 = int_to_ptr.hbm [resolvable:$true] %s16_s14 }
   0x2   :  { %s18_s16 = sshll.u32 %s3993_s15, 4  ;;  %s3994_s17 = smov 6144   ;;  %s19_s16 = int_to_ptr.vmem [resolvable:$true] %s18_s16 }
   0x3   :  { %s3995_s18 = smov 384  }
   0x4   :  { %24 = dma.hbm_to_vmem [thread:$0]  %s17_s14, 12288, %s19_s16, [#allocation3], %s3994_s17, %s3994_s17, %s3995_s18  }
   0x5   :  { %3989 = dma.done.wait [#allocation3], 12288  }
   0x6   :  { %3990 = vsyncadd [#allocation3], 4294955008  ;;  %vm132_vm0 = vcmask 1044480   ;;  %v80_v0 = vld [vmem:[#allocation2 + $0x180] sm:$0x1f]  ;;  %v33_v5 = vld [vmem:[#allocation2 + $0x8] sm:$0xff] }
   0x7   :  { %v81_v1 = vld [vmem:[#allocation2 + $0x188] sm:$0x1f]  ;;  %v82_v2 = vld [vmem:[#allocation2 + $0x190] sm:$0x1f]  ;;  %3193 = vmatpush.msk.msra.mxu0 %vm132_vm0, %v80_v0  ;;  %v83_v3 = vld [vmem:[#allocation2 + $0x198] sm:$0x1f] }
   0x8   :  { %3195 = vmatpush.msk.msra.mxu1 %vm132_vm0, %v81_v1  ;;  %v32_v4 = vld [vmem:[#allocation2] sm:$0xff]  ;;  %3197 = vmatpush.msk.msra.mxu2 %vm132_vm0, %v82_v2  ;;  %v34_v6 = vld [vmem:[#allocation2 + $0x10] sm:$0xff]  ;;  %v35_v7 = vld [vmem:[#allocation2 + $0x18] sm:$0xff]  ;;  %vm128_vm1 = vcmask 105472   ;;  %vm1325_vm2 = vcmask 654336   ;;  %s3180_s8 = sshll.u32 %s5189_s3, 4  ;;  %s3181_s8 = int_to_ptr.hbm [resolvable:$true] %s3180_s8 }
   0x9   :  { %3199 = vmatpush.msk.msra.mxu3 %vm132_vm0, %v83_v3  ;;  %v4030_v8 = vld [vmem:[%s5186_s0] sm:$0xff]  ;;  %292 = vmatpush.msra.mxu0 %v32_v4  ;;  %v86_v9 = vld [vmem:[#allocation2 + $0x1b0] sm:$0x1f]  ;;  %v87_v10 = vld [vmem:[#allocation2 + $0x1b8] sm:$0x1f]  ;;  %s3998_s9 = smov 1024  }
   0xa   :  { %312 = vmatpush.msra.mxu1 %v33_v5  ;;  %332 = vmatpush.msra.mxu2 %v34_v6  ;;  %v84_v11 = vld [vmem:[#allocation2 + $0x1a0] sm:$0x1f]  ;;  %v85_v12 = vld [vmem:[#allocation2 + $0x1a8] sm:$0x1f]  ;;  %v38_v13 = vld [vmem:[#allocation2 + $0x30] sm:$0xff]  ;;  %s3999_s10 = smov 64  }
   0xb   :  { %352 = vmatpush.msra.mxu3 %v35_v7  ;;  %3194 = vmatmul.msk.f32.vlgmr.msra.gmra.mxu0 %vm128_vm1, %v4030_v8  ;;  %v39_v14 = vld [vmem:[#allocation2 + $0x38] sm:$0xff]  ;;  %v36_v15 = vld [vmem:[#allocation2 + $0x20] sm:$0xff]  ;;  %v37_v16 = vld [vmem:[#allocation2 + $0x28] sm:$0xff] }
   0xc   :  { %3196 = vmatmul.msk.f32.vlgmr.msra.gmra.mxu1 %vm128_vm1, %v4030_v8  ;;  %3198 = vmatmul.msk.f32.vlgmr.msra.gmra.mxu2 %vm128_vm1, %v4030_v8  ;;  %v90_v17 = vld [vmem:[#allocation2 + $0x1d0] sm:$0x1f]  ;;  %v91_v18 = vld [vmem:[#allocation2 + $0x1d8] sm:$0x1f]  ;;  %v88_v19 = vld [vmem:[#allocation2 + $0x1c0] sm:$0x1f] }
   0xd   :  { %3200 = vmatmul.msk.f32.vlgmr.msra.gmra.mxu3 %vm128_vm1, %v4030_v8  ;;  %3205 = vmatpush.msk.msrb.mxu2 %vm132_vm0, %v86_v9  ;;  %v89_v20 = vld [vmem:[#allocation2 + $0x1c8] sm:$0x1f]  ;;  %v42_v21 = vld [vmem:[#allocation2 + $0x50] sm:$0xff]  ;;  %v43_v22 = vld [vmem:[#allocation2 + $0x58] sm:$0xff] }
   0xe   :  { %3207 = vmatpush.msk.msrb.mxu3 %vm132_vm0, %v87_v10  ;;  %3201 = vmatpush.msk.msrb.mxu0 %vm132_vm0, %v84_v11  ;;  %v40_v23 = vld [vmem:[#allocation2 + $0x40] sm:$0xff]  ;;  %v41_v24 = vld [vmem:[#allocation2 + $0x48] sm:$0xff]  ;;  %v94_v25 = vld [vmem:[#allocation2 + $0x1f0] sm:$0x1f] }
   0xf   :  { %3203 = vmatpush.msk.msrb.mxu1 %vm132_vm0, %v85_v12  ;;  %412 = vmatpush.msrb.mxu2 %v38_v13  ;;  %v95_v26 = vld [vmem:[#allocation2 + $0x1f8] sm:$0x1f]  ;;  %v92_v27 = vld [vmem:[#allocation2 + $0x1e0] sm:$0x1f]  ;;  %v93_v28 = vld [vmem:[#allocation2 + $0x1e8] sm:$0x1f] }
  0x10   :  { %432 = vmatpush.msrb.mxu3 %v39_v14  ;;  %372 = vmatpush.msrb.mxu0 %v36_v15  ;;  %v46_v29 = vld [vmem:[#allocation2 + $0x70] sm:$0xff]  ;;  %v47_v30 = vld [vmem:[#allocation2 + $0x78] sm:$0xff]  ;;  %v44_v31 = vld [vmem:[#allocation2 + $0x60] sm:$0xff] }
  0x11   :  { %392 = vmatpush.msrb.mxu1 %v37_v16  ;;  %3213 = vmatpush.msk.msra.mxu2 %vm132_vm0, %v90_v17  ;;  %v45_v32 = vld [vmem:[#allocation2 + $0x68] sm:$0xff]  ;;  %v98_v33 = vld [vmem:[#allocation2 + $0x210] sm:$0x1f]  ;;  %v99_v34 = vld [vmem:[#allocation2 + $0x218] sm:$0x1f] }
  0x12   :  { %3215 = vmatpush.msk.msra.mxu3 %vm132_vm0, %v91_v18  ;;  %3209 = vmatpush.msk.msra.mxu0 %vm132_vm0, %v88_v19  ;;  %v96_v35 = vld [vmem:[#allocation2 + $0x200] sm:$0x1f]  ;;  %v97_v36 = vld [vmem:[#allocation2 + $0x208] sm:$0x1f]  ;;  %v50_v37 = vld [vmem:[#allocation2 + $0x90] sm:$0xff] }
  0x13   :  { %3211 = vmatpush.msk.msra.mxu1 %vm132_vm0, %v89_v20  ;;  %3202 = vmatmul.msk.f32.vlgmr.msrb.gmra.mxu0 %vm128_vm1, %v4030_v8  ;;  %v51_v38 = vld [vmem:[#allocation2 + $0x98] sm:$0xff]  ;;  %v48_v39 = vld [vmem:[#allocation2 + $0x80] sm:$0xff]  ;;  %v49_v40 = vld [vmem:[#allocation2 + $0x88] sm:$0xff] }
  0x14   :  { %3204 = vmatmul.msk.f32.vlgmr.msrb.gmra.mxu1 %vm128_vm1, %v4030_v8  ;;  %3206 = vmatmul.msk.f32.vlgmr.msrb.gmra.mxu2 %vm128_vm1, %v4030_v8  ;;  %v102_v41 = vld [vmem:[#allocation2 + $0x230] sm:$0x1f]  ;;  %v103_v42 = vld [vmem:[#allocation2 + $0x238] sm:$0x1f]  ;;  %v100_v43 = vld [vmem:[#allocation2 + $0x220] sm:$0x1f] }
  0x15   :  { %3208 = vmatmul.msk.f32.vlgmr.msrb.gmra.mxu3 %vm128_vm1, %v4030_v8  ;;  %492 = vmatpush.msra.mxu2 %v42_v21  ;;  %v101_v44 = vld [vmem:[#allocation2 + $0x228] sm:$0x1f]  ;;  %v54_v45 = vld [vmem:[#allocation2 + $0xb0] sm:$0xff]  ;;  %v55_v46 = vld [vmem:[#allocation2 + $0xb8] sm:$0xff] }
  0x16   :  { %512 = vmatpush.msra.mxu3 %v43_v22  ;;  %452 = vmatpush.msra.mxu0 %v40_v23  ;;  %v52_v47 = vld [vmem:[#allocation2 + $0xa0] sm:$0xff]  ;;  %v53_v48 = vld [vmem:[#allocation2 + $0xa8] sm:$0xff]  ;;  %v106_v49 = vld [vmem:[#allocation2 + $0x250] sm:$0x1f] }
  0x17   :  { %472 = vmatpush.msra.mxu1 %v41_v24  ;;  %3221 = vmatpush.msk.msrb.mxu2 %vm132_vm0, %v94_v25  ;;  %v107_v50 = vld [vmem:[#allocation2 + $0x258] sm:$0x1f]  ;;  %v104_v51 = vld [vmem:[#allocation2 + $0x240] sm:$0x1f]  ;;  %v105_v52 = vld [vmem:[#allocation2 + $0x248] sm:$0x1f] }
  0x18   :  { %3223 = vmatpush.msk.msrb.mxu3 %vm132_vm0, %v95_v26  ;;  %3217 = vmatpush.msk.msrb.mxu0 %vm132_vm0, %v92_v27  ;;  %v58_v53 = vld [vmem:[#allocation2 + $0xd0] sm:$0xff]  ;;  %v59_v54 = vld [vmem:[#allocation2 + $0xd8] sm:$0xff]  ;;  %v56_v55 = vld [vmem:[#allocation2 + $0xc0] sm:$0xff] }
  0x19   :  { %3219 = vmatpush.msk.msrb.mxu1 %vm132_vm0, %v93_v28  ;;  %572 = vmatpush.msrb.mxu2 %v46_v29  ;;  %v57_v56 = vld [vmem:[#allocation2 + $0xc8] sm:$0xff]  ;;  %v110_v57 = vld [vmem:[#allocation2 + $0x270] sm:$0x1f]  ;;  %v111_v58 = vld [vmem:[#allocation2 + $0x278] sm:$0x1f] }
  0x1a   :  { %592 = vmatpush.msrb.mxu3 %v47_v30  ;;  %532 = vmatpush.msrb.mxu0 %v44_v31  ;;  %v108_v59 = vld [vmem:[#allocation2 + $0x260] sm:$0x1f]  ;;  %v109_v60 = vld [vmem:[#allocation2 + $0x268] sm:$0x1f]  ;;  %v62_v61 = vld [vmem:[#allocation2 + $0xf0] sm:$0xff] }
  0x1b   :  { %552 = vmatpush.msrb.mxu1 %v45_v32  ;;  %3210 = vmatmul.msk.f32.vlgmr.msra.gmra.mxu0 %vm128_vm1, %v4030_v8  ;;  %v63_v62 = vld [vmem:[#allocation2 + $0xf8] sm:$0xff]  ;;  %v60_v63 = vld [vmem:[#allocation2 + $0xe0] sm:$0xff]  ;;  %v61_v0 = vld [vmem:[#allocation2 + $0xe8] sm:$0xff] }
  0x1c   :  { %3212 = vmatmul.msk.f32.vlgmr.msra.gmra.mxu1 %vm128_vm1, %v4030_v8  ;;  %3214 = vmatmul.msk.f32.vlgmr.msra.gmra.mxu2 %vm128_vm1, %v4030_v8  ;;  %v114_v1 = vld [vmem:[#allocation2 + $0x290] sm:$0x1f]  ;;  %v115_v2 = vld [vmem:[#allocation2 + $0x298] sm:$0x1f]  ;;  %v112_v3 = vld [vmem:[#allocation2 + $0x280] sm:$0x1f] }
  0x1d   :  { %3216 = vmatmul.msk.f32.vlgmr.msra.gmra.mxu3 %vm128_vm1, %v4030_v8  ;;  %3229 = vmatpush.msk.msra.mxu2 %vm132_vm0, %v98_v33  ;;  %v113_v4 = vld [vmem:[#allocation2 + $0x288] sm:$0x1f]  ;;  %v66_v5 = vld [vmem:[#allocation2 + $0x110] sm:$0xff]  ;;  %v67_v6 = vld [vmem:[#allocation2 + $0x118] sm:$0xff] }
  0x1e   :  { %3231 = vmatpush.msk.msra.mxu3 %vm132_vm0, %v99_v34  ;;  %3225 = vmatpush.msk.msra.mxu0 %vm132_vm0, %v96_v35  ;;  %v64_v7 = vld [vmem:[#allocation2 + $0x100] sm:$0xff]  ;;  %v65_v9 = vld [vmem:[#allocation2 + $0x108] sm:$0xff]  ;;  %v118_v10 = vld [vmem:[#allocation2 + $0x2b0] sm:$0x1f] }
  0x1f   :  { %3227 = vmatpush.msk.msra.mxu1 %vm132_vm0, %v97_v36  ;;  %652 = vmatpush.msra.mxu2 %v50_v37  ;;  %v119_v11 = vld [vmem:[#allocation2 + $0x2b8] sm:$0x1f]  ;;  %v116_v12 = vld [vmem:[#allocation2 + $0x2a0] sm:$0x1f]  ;;  %v117_v13 = vld [vmem:[#allocation2 + $0x2a8] sm:$0x1f] }
  0x20   :  { %672 = vmatpush.msra.mxu3 %v51_v38  ;;  %612 = vmatpush.msra.mxu0 %v48_v39  ;;  %v70_v14 = vld [vmem:[#allocation2 + $0x130] sm:$0xff]  ;;  %v71_v15 = vld [vmem:[#allocation2 + $0x138] sm:$0xff]  ;;  %v68_v16 = vld [vmem:[#allocation2 + $0x120] sm:$0xff] }
  0x21   :  { %632 = vmatpush.msra.mxu1 %v49_v40  ;;  %v69_v17 = vld [vmem:[#allocation2 + $0x128] sm:$0xff]  ;;  %v122_v18 = vld [vmem:[#allocation2 + $0x2d0] sm:$0x1f]  ;;  %v123_v19 = vld [vmem:[#allocation2 + $0x2d8] sm:$0x1f] }
  0x22   :  { %v120_v20 = vld [vmem:[#allocation2 + $0x2c0] sm:$0x1f]  ;;  %v121_v21 = vld [vmem:[#allocation2 + $0x2c8] sm:$0x1f]  ;;  %v74_v22 = vld [vmem:[#allocation2 + $0x150] sm:$0xff] }
  0x23   :  { %3218 = vmatmul.msk.f32.vlgmr.msrb.gmra.mxu0 %vm128_vm1, %v4030_v8  ;;  %v75_v23 = vld [vmem:[#allocation2 + $0x158] sm:$0xff]  ;;  %v72_v24 = vld [vmem:[#allocation2 + $0x140] sm:$0xff]  ;;  %v73_v25 = vld [vmem:[#allocation2 + $0x148] sm:$0xff] }
  0x24   :  { %3220 = vmatmul.msk.f32.vlgmr.msrb.gmra.mxu1 %vm128_vm1, %v4030_v8  ;;  %3222 = vmatmul.msk.f32.vlgmr.msrb.gmra.mxu2 %vm128_vm1, %v4030_v8  ;;  %v124_v26 = vld [vmem:[#allocation2 + $0x2e0] sm:$0x1f]  ;;  %v125_v27 = vld [vmem:[#allocation2 + $0x2e8] sm:$0x1f]  ;;  %v126_v28 = vld [vmem:[#allocation2 + $0x2f0] sm:$0x1f] }
  0x25   :  { %3224 = vmatmul.msk.f32.vlgmr.msrb.gmra.mxu3 %vm128_vm1, %v4030_v8  ;;  %3237 = vmatpush.msk.msrb.mxu2 %vm132_vm0, %v102_v41  ;;  %v127_v29 = vld [vmem:[#allocation2 + $0x2f8] sm:$0x1f]  ;;  %v76_v30 = vld [vmem:[#allocation2 + $0x160] sm:$0xff]  ;;  %v77_v31 = vld [vmem:[#allocation2 + $0x168] sm:$0xff] }
  0x26   :  { %3239 = vmatpush.msk.msrb.mxu3 %vm132_vm0, %v103_v42  ;;  %3233 = vmatpush.msk.msrb.mxu0 %vm132_vm0, %v100_v43  ;;  %v78_v32 = vld [vmem:[#allocation2 + $0x170] sm:$0xff]  ;;  %v79_v33 = vld [vmem:[#allocation2 + $0x178] sm:$0xff] }
  0x27   :  { %3235 = vmatpush.msk.msrb.mxu1 %vm132_vm0, %v101_v44  ;;  %732 = vmatpush.msrb.mxu2 %v54_v45 }
  0x28   :  { %752 = vmatpush.msrb.mxu3 %v55_v46  ;;  %692 = vmatpush.msrb.mxu0 %v52_v47 }
  0x29   :  { %712 = vmatpush.msrb.mxu1 %v53_v48 }
  0x2b   :  { %3226 = vmatmul.msk.f32.vlgmr.msra.gmra.mxu0 %vm128_vm1, %v4030_v8 }
  0x2c   :  { %3228 = vmatmul.msk.f32.vlgmr.msra.gmra.mxu1 %vm128_vm1, %v4030_v8  ;;  %3230 = vmatmul.msk.f32.vlgmr.msra.gmra.mxu2 %vm128_vm1, %v4030_v8 }
  0x2d   :  { %3232 = vmatmul.msk.f32.vlgmr.msra.gmra.mxu3 %vm128_vm1, %v4030_v8  ;;  %3245 = vmatpush.msk.msra.mxu2 %vm132_vm0, %v106_v49 }
  0x2e   :  { %3247 = vmatpush.msk.msra.mxu3 %vm132_vm0, %v107_v50  ;;  %3241 = vmatpush.msk.msra.mxu0 %vm132_vm0, %v104_v51 }
  0x2f   :  { %3243 = vmatpush.msk.msra.mxu1 %vm132_vm0, %v105_v52  ;;  %812 = vmatpush.msra.mxu2 %v58_v53 }
  0x30   :  { %832 = vmatpush.msra.mxu3 %v59_v54  ;;  %772 = vmatpush.msra.mxu0 %v56_v55 }
  0x31   :  { %792 = vmatpush.msra.mxu1 %v57_v56 }
  0x33   :  { %3234 = vmatmul.msk.f32.vlgmr.msrb.gmra.mxu0 %vm128_vm1, %v4030_v8 }
  0x34   :  { %3236 = vmatmul.msk.f32.vlgmr.msrb.gmra.mxu1 %vm128_vm1, %v4030_v8  ;;  %3238 = vmatmul.msk.f32.vlgmr.msrb.gmra.mxu2 %vm128_vm1, %v4030_v8 }
  0x35   :  { %3240 = vmatmul.msk.f32.vlgmr.msrb.gmra.mxu3 %vm128_vm1, %v4030_v8  ;;  %3253 = vmatpush.msk.msrb.mxu2 %vm132_vm0, %v110_v57 }
  0x36   :  { %3255 = vmatpush.msk.msrb.mxu3 %vm132_vm0, %v111_v58  ;;  %3249 = vmatpush.msk.msrb.mxu0 %vm132_vm0, %v108_v59  ;;  %v3996_v59 = vmov 1.0  }
  0x37   :  { %3251 = vmatpush.msk.msrb.mxu1 %vm132_vm0, %v109_v60  ;;  %892 = vmatpush.msrb.mxu2 %v62_v61 }
  0x38   :  { %912 = vmatpush.msrb.mxu3 %v63_v62  ;;  %852 = vmatpush.msrb.mxu0 %v60_v63 }
  0x39   :  { %872 = vmatpush.msrb.mxu1 %v61_v0 }
  0x3b   :  { %3242 = vmatmul.msk.f32.vlgmr.msra.gmra.mxu0 %vm128_vm1, %v4030_v8 }
  0x3c   :  { %3244 = vmatmul.msk.f32.vlgmr.msra.gmra.mxu1 %vm128_vm1, %v4030_v8  ;;  %3246 = vmatmul.msk.f32.vlgmr.msra.gmra.mxu2 %vm128_vm1, %v4030_v8 }
  0x3d   :  { %3248 = vmatmul.msk.f32.vlgmr.msra.gmra.mxu3 %vm128_vm1, %v4030_v8  ;;  %3261 = vmatpush.msk.msra.mxu2 %vm132_vm0, %v114_v1 }
  0x3e   :  { %3263 = vmatpush.msk.msra.mxu3 %vm132_vm0, %v115_v2  ;;  %3257 = vmatpush.msk.msra.mxu0 %vm132_vm0, %v112_v3 }
  0x3f   :  { %3259 = vmatpush.msk.msra.mxu1 %vm132_vm0, %v113_v4  ;;  %972 = vmatpush.msra.mxu2 %v66_v5 }
  0x40   :  { %992 = vmatpush.msra.mxu3 %v67_v6  ;;  %932 = vmatpush.msra.mxu0 %v64_v7 }
  0x41   :  { %952 = vmatpush.msra.mxu1 %v65_v9 }
  0x43   :  { %3250 = vmatmul.msk.f32.vlgmr.msrb.gmra.mxu0 %vm128_vm1, %v4030_v8 }
  0x44   :  { %3252 = vmatmul.msk.f32.vlgmr.msrb.gmra.mxu1 %vm128_vm1, %v4030_v8  ;;  %3254 = vmatmul.msk.f32.vlgmr.msrb.gmra.mxu2 %vm128_vm1, %v4030_v8 }
  0x45   :  { %3256 = vmatmul.msk.f32.vlgmr.msrb.gmra.mxu3 %vm128_vm1, %v4030_v8  ;;  %3269 = vmatpush.msk.msrb.mxu2 %vm132_vm0, %v118_v10 }
  0x46   :  { %3271 = vmatpush.msk.msrb.mxu3 %vm132_vm0, %v119_v11  ;;  %3265 = vmatpush.msk.msrb.mxu0 %vm132_vm0, %v116_v12 }
  0x47   :  { %3267 = vmatpush.msk.msrb.mxu1 %vm132_vm0, %v117_v13  ;;  %1052 = vmatpush.msrb.mxu2 %v70_v14 }
  0x48   :  { %1072 = vmatpush.msrb.mxu3 %v71_v15  ;;  %1012 = vmatpush.msrb.mxu0 %v68_v16 }
  0x49   :  { %1032 = vmatpush.msrb.mxu1 %v69_v17 }
  0x4b   :  { %3258 = vmatmul.msk.f32.vlgmr.msra.gmra.mxu0 %vm128_vm1, %v4030_v8 }
  0x4c   :  { %3260 = vmatmul.msk.f32.vlgmr.msra.gmra.mxu1 %vm128_vm1, %v4030_v8  ;;  %3262 = vmatmul.msk.f32.vlgmr.msra.gmra.mxu2 %vm128_vm1, %v4030_v8 }
  0x4d   :  { %3264 = vmatmul.msk.f32.vlgmr.msra.gmra.mxu3 %vm128_vm1, %v4030_v8  ;;  %3277 = vmatpush.msk.msra.mxu2 %vm132_vm0, %v122_v18 }
  0x4e   :  { %3279 = vmatpush.msk.msra.mxu3 %vm132_vm0, %v123_v19  ;;  %3273 = vmatpush.msk.msra.mxu0 %vm132_vm0, %v120_v20 }
  0x4f   :  { %3275 = vmatpush.msk.msra.mxu1 %vm132_vm0, %v121_v21  ;;  %1132 = vmatpush.msra.mxu2 %v74_v22 }
  0x50   :  { %1152 = vmatpush.msra.mxu3 %v75_v23  ;;  %1092 = vmatpush.msra.mxu0 %v72_v24 }
  0x51   :  { %1112 = vmatpush.msra.mxu1 %v73_v25 }
  0x53   :  { %3266 = vmatmul.msk.f32.vlgmr.msrb.gmra.mxu0 %vm128_vm1, %v4030_v8 }
  0x54   :  { %3268 = vmatmul.msk.f32.vlgmr.msrb.gmra.mxu1 %vm128_vm1, %v4030_v8  ;;  %3270 = vmatmul.msk.f32.vlgmr.msrb.gmra.mxu2 %vm128_vm1, %v4030_v8 }
  0x55   :  { %3272 = vmatmul.msk.f32.vlgmr.msrb.gmra.mxu3 %vm128_vm1, %v4030_v8  ;;  %3281 = vmatpush.msk.msrb.mxu0 %vm132_vm0, %v124_v26 }
  0x56   :  { %3283 = vmatpush.msk.msrb.mxu1 %vm132_vm0, %v125_v27  ;;  %3285 = vmatpush.msk.msrb.mxu2 %vm132_vm0, %v126_v28 }
  0x57   :  { %3287 = vmatpush.msk.msrb.mxu3 %vm132_vm0, %v127_v29  ;;  %1172 = vmatpush.msrb.mxu0 %v76_v30 }
  0x58   :  { %1192 = vmatpush.msrb.mxu1 %v77_v31  ;;  %1212 = vmatpush.msrb.mxu2 %v78_v32 }
  0x59   :  { %1232 = vmatpush.msrb.mxu3 %v79_v33 }
  0x5b   :  { %3274 = vmatmul.msk.f32.vlgmr.msra.gmra.mxu0 %vm128_vm1, %v4030_v8 }
  0x5c   :  { %3276 = vmatmul.msk.f32.vlgmr.msra.gmra.mxu1 %vm128_vm1, %v4030_v8  ;;  %3278 = vmatmul.msk.f32.vlgmr.msra.gmra.mxu2 %vm128_vm1, %v4030_v8 }
  0x5d   :  { %3280 = vmatmul.msk.f32.vlgmr.msra.gmra.mxu3 %vm128_vm1, %v4030_v8  ;;  %1380 = vmatpush.msra.mxu0 %v3996_v59 }
  0x5e   :  { %1445 = vmatpush.msra.mxu1 %v3996_v59  ;;  %1510 = vmatpush.msra.mxu2 %v3996_v59 }
  0x5f   :  { %1575 = vmatpush.msra.mxu3 %v3996_v59 }
  0x63   :  { %3282 = vmatmul.msk.f32.vlgmr.msrb.gmra.mxu0 %vm128_vm1, %v4030_v8 }
  0x64   :  { %3284 = vmatmul.msk.f32.vlgmr.msrb.gmra.mxu1 %vm128_vm1, %v4030_v8  ;;  %3286 = vmatmul.msk.f32.vlgmr.msrb.gmra.mxu2 %vm128_vm1, %v4030_v8 }
  0x65   :  { %3288 = vmatmul.msk.f32.vlgmr.msrb.gmra.mxu3 %vm128_vm1, %v4030_v8 }
  0x88   :  { %v4172_v34 = vpop.f32.mrf.mxu0 }
  0x89   :  { %v4174_v35 = vpop.f32.mrf.mxu1 }
  0x8f   :  { %v4176_v36 = vpop.f32.mrf.mxu2 }
  0x90   :  { %v4178_v37 = vpop.f32.mrf.mxu3  ;;  %v4180_v38 = vpop.f32.mrf.mxu0 }
  0x91   :  { %v4182_v39 = vpop.f32.mrf.mxu1 }
  0x97   :  { %v4184_v40 = vpop.f32.mrf.mxu2 }
  0x98   :  { %v4186_v41 = vpop.f32.mrf.mxu3  ;;  %v4188_v42 = vpop.f32.mrf.mxu0 }
  0x99   :  { %v4190_v43 = vpop.f32.mrf.mxu1 }
  0x9f   :  { %v4192_v8 = vpop.f32.mrf.mxu2 }
  0xa0   :  { %v4194_v44 = vpop.f32.mrf.mxu3  ;;  %v4196_v45 = vpop.f32.mrf.mxu0 }
  0xa1   :  { %v4198_v46 = vpop.f32.mrf.mxu1 }
  0xa7   :  { %v4200_v47 = vpop.f32.mrf.mxu2 }
  0xa8   :  { %v4202_v48 = vpop.f32.mrf.mxu3  ;;  %v614_v49 = vpop.f32.mrf.mxu0 }
  0xa9   :  { %v634_v50 = vpop.f32.mrf.mxu1 }
  0xaf   :  { %v654_v51 = vpop.f32.mrf.mxu2 }
  0xb0   :  { %v674_v52 = vpop.f32.mrf.mxu3  ;;  %v4204_v53 = vpop.f32.mrf.mxu0 }
  0xb1   :  { %v4206_v54 = vpop.f32.mrf.mxu1 }
  0xb7   :  { %v4208_v55 = vpop.f32.mrf.mxu2 }
  0xb8   :  { %v4210_v56 = vpop.f32.mrf.mxu3  ;;  %v4212_v57 = vpop.f32.mrf.mxu0 }
  0xb9   :  { %v4214_v58 = vpop.f32.mrf.mxu1  ;;  %v1285_v17 = vmul.f32 %v4212_v57, %v614_v49  ;;  %v1261_v29 = vmul.f32 %v4212_v57, %v4188_v42 }
  0xba   :  { %v1286_v18 = vmul.f32 %v4214_v58, %v634_v50  ;;  %v1262_v30 = vmul.f32 %v4214_v58, %v4190_v43 }
  0xbf   :  { %v4220_v60 = vpop.f32.mrf.mxu2 }
  0xc0   :  { %v4222_v61 = vpop.f32.mrf.mxu3  ;;  %v4224_v62 = vpop.f32.mrf.mxu0  ;;  %v1287_v31 = vmul.f32 %v4220_v60, %v654_v51 }
  0xc1   :  { %v4226_v63 = vpop.f32.mrf.mxu1  ;;  %v1288_v32 = vmul.f32 %v4222_v61, %v674_v52 }
  0xc7   :  { %v4228_v0 = vpop.f32.mrf.mxu2 }
  0xc8   :  { %v4230_v1 = vpop.f32.mrf.mxu3  ;;  %v934_v2 = vpop.f32.mrf.mxu0 }
  0xc9   :  { %v954_v3 = vpop.f32.mrf.mxu1  ;;  %v1293_v15 = vmul.f32 %v934_v2, %v614_v49  ;;  %v1269_v25 = vmul.f32 %v934_v2, %v4188_v42 }
  0xca   :  { %v1294_v16 = vmul.f32 %v954_v3, %v634_v50  ;;  %v1270_v26 = vmul.f32 %v954_v3, %v4190_v43 }
  0xcf   :  { %v4232_v4 = vpop.f32.mrf.mxu2 }
  0xd0   :  { %v4234_v5 = vpop.f32.mrf.mxu3  ;;  %v4236_v6 = vpop.f32.mrf.mxu0  ;;  %v1295_v27 = vmul.f32 %v4232_v4, %v654_v51 }
  0xd1   :  { %v4238_v7 = vpop.f32.mrf.mxu1  ;;  %v1296_v28 = vmul.f32 %v4234_v5, %v674_v52 }
  0xd7   :  { %v4240_v9 = vpop.f32.mrf.mxu2 }
  0xd8   :  { %v4242_v10 = vpop.f32.mrf.mxu3  ;;  %v1094_v11 = vpop.f32.mrf.mxu0 }
  0xd9   :  { %v1114_v12 = vpop.f32.mrf.mxu1  ;;  %v1301_v13 = vmul.f32 %v1094_v11, %v614_v49  ;;  %v1277_v21 = vmul.f32 %v1094_v11, %v4188_v42  ;;  %v1253_v33 = vmul.f32 %v1094_v11, %v4172_v34  ;;  %v1272_v11 = vmul.f32 %v4234_v5, %v4194_v44 }
  0xda   :  { %v1302_v14 = vmul.f32 %v1114_v12, %v634_v50  ;;  %v1278_v22 = vmul.f32 %v1114_v12, %v4190_v43  ;;  %v1254_v49 = vmul.f32 %v1114_v12, %v4174_v35  ;;  %v1245_v43 = vmul.f32 %v934_v2, %v4172_v34 }
  0xdb   :  { %1381 = vmatpush.msra.mxu0 %v1301_v13  ;;  %v1237_v12 = vmul.f32 %v4212_v57, %v4172_v34  ;;  %v1238_v13 = vmul.f32 %v4214_v58, %v4174_v35  ;;  %v1263_v2 = vmul.f32 %v4220_v60, %v4192_v8  ;;  %v1247_v58 = vmul.f32 %v4232_v4, %v4176_v36 }
  0xdc   :  { %1446 = vmatpush.msra.mxu1 %v1302_v14  ;;  %v4279_v14 = vld [vmem:[%s5188_s2] sm:$0xff] }
  0xdd   :  { %1382 = vmatpush.msra.mxu0 %v1293_v15 }
  0xde   :  { %1447 = vmatpush.msra.mxu1 %v1294_v16  ;;  %v1248_v16 = vmul.f32 %v4234_v5, %v4178_v37  ;;  %v1290_v5 = vmul.f32 %v4226_v63, %v4206_v54 }
  0xdf   :  { %v1134_v19 = vpop.f32.mrf.mxu2  ;;  %1383 = vmatpush.msra.mxu0 %v1285_v17  ;;  %v1297_v17 = vmul.f32 %v4236_v6, %v4204_v53 }
  0xe0   :  { %v1154_v20 = vpop.f32.mrf.mxu3  ;;  %1448 = vmatpush.msra.mxu1 %v1286_v18  ;;  %v1303_v23 = vmul.f32 %v1134_v19, %v654_v51  ;;  %v1279_v50 = vmul.f32 %v1134_v19, %v4192_v8  ;;  %v1246_v51 = vmul.f32 %v954_v3, %v4174_v35  ;;  %v1264_v3 = vmul.f32 %v4222_v61, %v4194_v44  ;;  %v4281_v15 = vpop.f32.mrf.mxu0 }
  0xe1   :  { %v1304_v24 = vmul.f32 %v1154_v20, %v674_v52  ;;  %1384 = vmatpush.msra.mxu0 %v1277_v21  ;;  %v1280_v42 = vmul.f32 %v1154_v20, %v4194_v44  ;;  %v1271_v52 = vmul.f32 %v4232_v4, %v4192_v8  ;;  %v4283_v34 = vpop.f32.mrf.mxu1  ;;  %v1255_v35 = vmul.f32 %v1134_v19, %v4176_v36 }
  0xe2   :  { %1449 = vmatpush.msra.mxu1 %v1278_v22  ;;  %1511 = vmatpush.msra.mxu2 %v1303_v23  ;;  %v1256_v8 = vmul.f32 %v1154_v20, %v4178_v37  ;;  %v1305_v44 = vmul.f32 %v4281_v15, %v4204_v53  ;;  %v1306_v57 = vmul.f32 %v4283_v34, %v4206_v54 }
  0xe3   :  { %1576 = vmatpush.msra.mxu3 %v1304_v24  ;;  %1385 = vmatpush.msra.mxu0 %v1269_v25  ;;  %v1298_v18 = vmul.f32 %v4238_v7, %v4206_v54  ;;  %v1239_v19 = vmul.f32 %v4220_v60, %v4176_v36  ;;  %v1240_v20 = vmul.f32 %v4222_v61, %v4178_v37  ;;  %v4324_v36 = vld [vmem:[%s5188_s2 + $0x8] sm:$0xff] }
  0xe4   :  { %1450 = vmatpush.msra.mxu1 %v1270_v26  ;;  %1512 = vmatpush.msra.mxu2 %v1295_v27  ;;  %v1289_v4 = vmul.f32 %v4224_v62, %v4204_v53  ;;  %v1281_v37 = vmul.f32 %v4281_v15, %v4196_v45  ;;  %v1282_v53 = vmul.f32 %v4283_v34, %v4198_v46 }
  0xe5   :  { %1577 = vmatpush.msra.mxu3 %v1296_v28  ;;  %1386 = vmatpush.msra.mxu0 %v1261_v29  ;;  %v1274_v61 = vmul.f32 %v4238_v7, %v4198_v46  ;;  %v1299_v23 = vmul.f32 %v4240_v9, %v4208_v55  ;;  %v1300_v24 = vmul.f32 %v4242_v10, %v4210_v56 }
  0xe6   :  { %1451 = vmatpush.msra.mxu1 %v1262_v30  ;;  %1513 = vmatpush.msra.mxu2 %v1287_v31  ;;  %v1265_v25 = vmul.f32 %v4224_v62, %v4196_v45  ;;  %v1266_v26 = vmul.f32 %v4226_v63, %v4198_v46  ;;  %v1291_v27 = vmul.f32 %v4228_v0, %v4208_v55 }
  0xe7   :  { %1578 = vmatpush.msra.mxu3 %v1288_v32  ;;  %1387 = vmatpush.msra.mxu0 %v1253_v33  ;;  %v4313_v21 = vpop.f32.mrf.mxu2  ;;  %v1292_v28 = vmul.f32 %v4230_v1, %v4210_v56  ;;  %v1257_v29 = vmul.f32 %v4281_v15, %v4180_v38  ;;  %v1249_v30 = vmul.f32 %v4236_v6, %v4180_v38 }
  0xe8   :  { %1452 = vmatpush.msra.mxu1 %v1254_v49  ;;  %1514 = vmatpush.msra.mxu2 %v1279_v50  ;;  %v4315_v22 = vpop.f32.mrf.mxu3  ;;  %v1307_v54 = vmul.f32 %v4313_v21, %v4208_v55  ;;  %v1283_v46 = vmul.f32 %v4313_v21, %v4200_v47  ;;  %v1250_v31 = vmul.f32 %v4238_v7, %v4182_v39 }
  0xe9   :  { %1579 = vmatpush.msra.mxu3 %v1280_v42  ;;  %1388 = vmatpush.msra.mxu0 %v1245_v43  ;;  %v1308_v60 = vmul.f32 %v4315_v22, %v4210_v56  ;;  %v1284_v55 = vmul.f32 %v4315_v22, %v4202_v48  ;;  %v4371_v56 = vld [vmem:[%s5188_s2 + $0x10] sm:$0xff]  ;;  %v1275_v32 = vmul.f32 %v4240_v9, %v4200_v47 }
  0xea   :  { %1453 = vmatpush.msra.mxu1 %v1246_v51  ;;  %1515 = vmatpush.msra.mxu2 %v1271_v52  ;;  %v1276_v33 = vmul.f32 %v4242_v10, %v4202_v48  ;;  %v1242_v7 = vmul.f32 %v4226_v63, %v4182_v39  ;;  %v1267_v49 = vmul.f32 %v4228_v0, %v4200_v47  ;;  %v4503_v43 = vld [vmem:[%s5188_s2 + $0x50] sm:$0xff]  ;;  %v1320_v51 = vld [vmem:[%s5188_s2 + $0x58] sm:$0xff]  ;;  %v1321_v52 = vld [vmem:[%s5188_s2 + $0x60] sm:$0xff] }
  0xeb   :  { %1580 = vmatpush.msra.mxu3 %v1272_v11  ;;  %1389 = vmatpush.msra.mxu0 %v1237_v12  ;;  %v1268_v50 = vmul.f32 %v4230_v1, %v4202_v48  ;;  %v1259_v42 = vmul.f32 %v4313_v21, %v4184_v40  ;;  %v1252_v47 = vmul.f32 %v4242_v10, %v4186_v41  ;;  %v4408_v48 = vld [vmem:[%s5188_s2 + $0x18] sm:$0xff]  ;;  %v4490_v10 = vld [vmem:[%s5188_s2 + $0x48] sm:$0xff]  ;;  %v1323_v12 = vld [vmem:[%s5188_s2 + $0x70] sm:$0xff] }
  0xec   :  { %1454 = vmatpush.msra.mxu1 %v1238_v13  ;;  %1516 = vmatpush.msra.mxu2 %v1263_v2  ;;  %v1244_v63 = vmul.f32 %v4230_v1, %v4186_v41  ;;  %v4464_v1 = vld [vmem:[%s5188_s2 + $0x38] sm:$0xff]  ;;  %v1322_v11 = vld [vmem:[%s5188_s2 + $0x68] sm:$0xff] }
  0xed   :  { %1581 = vmatpush.msra.mxu3 %v1264_v3  ;;  %3289 = vmatmul.msk.f32.vlgmr.msra.gmra.mxu0 %vm1325_vm2, %v4279_v14  ;;  %v1324_v13 = vld [vmem:[%s5188_s2 + $0x78] sm:$0xff] }
  0xee   :  { %3305 = vmatmul.msk.f32.vlgmr.msra.gmra.mxu1 %vm1325_vm2, %v4279_v14  ;;  %1640 = vmatpush.msrb.mxu0 %v3996_v59 }
  0xef   :  { %1705 = vmatpush.msrb.mxu1 %v3996_v59  ;;  %1517 = vmatpush.msra.mxu2 %v1255_v35 }
  0xf0   :  { %1582 = vmatpush.msra.mxu3 %v1256_v8  ;;  %1641 = vmatpush.msrb.mxu0 %v1305_v44 }
  0xf1   :  { %1706 = vmatpush.msrb.mxu1 %v1306_v57  ;;  %1518 = vmatpush.msra.mxu2 %v1247_v58 }
  0xf2   :  { %1583 = vmatpush.msra.mxu3 %v1248_v16  ;;  %1642 = vmatpush.msrb.mxu0 %v1297_v17 }
  0xf3   :  { %1707 = vmatpush.msrb.mxu1 %v1298_v18  ;;  %1519 = vmatpush.msra.mxu2 %v1239_v19 }
  0xf4   :  { %1584 = vmatpush.msra.mxu3 %v1240_v20  ;;  %3321 = vmatmul.msk.f32.vlgmr.msra.gmra.mxu2 %vm1325_vm2, %v4279_v14 }
  0xf5   :  { %3337 = vmatmul.msk.f32.vlgmr.msra.gmra.mxu3 %vm1325_vm2, %v4279_v14  ;;  %1643 = vmatpush.msrb.mxu0 %v1289_v4 }
  0xf6   :  { %1708 = vmatpush.msrb.mxu1 %v1290_v5  ;;  %1770 = vmatpush.msrb.mxu2 %v3996_v59 }
  0xf7   :  { %1835 = vmatpush.msrb.mxu3 %v3996_v59  ;;  %3290 = vmatmul.msk.f32.gmra.mxu0 %vm1325_vm2, %v4324_v36  ;;  %v1273_v59 = vmul.f32 %v4236_v6, %v4196_v45  ;;  %v1258_v45 = vmul.f32 %v4283_v34, %v4182_v39  ;;  %v1241_v6 = vmul.f32 %v4224_v62, %v4180_v38 }
  0xf8   :  { %3306 = vmatmul.msk.f32.gmra.mxu1 %vm1325_vm2, %v4324_v36  ;;  %1644 = vmatpush.msrb.mxu0 %v1281_v37  ;;  %v1260_v38 = vmul.f32 %v4315_v22, %v4186_v41  ;;  %v1251_v39 = vmul.f32 %v4240_v9, %v4184_v40  ;;  %v1243_v62 = vmul.f32 %v4228_v0, %v4184_v40  ;;  %v4425_v40 = vld [vmem:[%s5188_s2 + $0x20] sm:$0xff]  ;;  %v4438_v41 = vld [vmem:[%s5188_s2 + $0x28] sm:$0xff]  ;;  %v4451_v0 = vld [vmem:[%s5188_s2 + $0x30] sm:$0xff] }
  0xf9   :  { %1709 = vmatpush.msrb.mxu1 %v1282_v53  ;;  %1771 = vmatpush.msrb.mxu2 %v1307_v54  ;;  %v4477_v9 = vld [vmem:[%s5188_s2 + $0x40] sm:$0xff] }
  0xfa   :  { %1836 = vmatpush.msrb.mxu3 %v1308_v60  ;;  %1645 = vmatpush.msrb.mxu0 %v1273_v59 }
  0xfb   :  { %1710 = vmatpush.msrb.mxu1 %v1274_v61  ;;  %1772 = vmatpush.msrb.mxu2 %v1299_v23 }
  0xfc   :  { %1837 = vmatpush.msrb.mxu3 %v1300_v24  ;;  %1646 = vmatpush.msrb.mxu0 %v1265_v25 }
  0xfd   :  { %1711 = vmatpush.msrb.mxu1 %v1266_v26  ;;  %1773 = vmatpush.msrb.mxu2 %v1291_v27 }
  0xfe   :  { %1838 = vmatpush.msrb.mxu3 %v1292_v28  ;;  %3322 = vmatmul.msk.f32.gmra.mxu2 %vm1325_vm2, %v4324_v36 }
  0xff   :  { %3338 = vmatmul.msk.f32.gmra.mxu3 %vm1325_vm2, %v4324_v36  ;;  %1647 = vmatpush.msrb.mxu0 %v1257_v29 }
 0x100   :  { %1712 = vmatpush.msrb.mxu1 %v1258_v45  ;;  %1774 = vmatpush.msrb.mxu2 %v1283_v46 }
 0x101   :  { %1839 = vmatpush.msrb.mxu3 %v1284_v55  ;;  %3291 = vmatmul.msk.f32.gmra.mxu0 %vm1325_vm2, %v4371_v56 }
 0x102   :  { %3307 = vmatmul.msk.f32.gmra.mxu1 %vm1325_vm2, %v4371_v56  ;;  %1648 = vmatpush.msrb.mxu0 %v1249_v30 }
 0x103   :  { %1713 = vmatpush.msrb.mxu1 %v1250_v31  ;;  %1775 = vmatpush.msrb.mxu2 %v1275_v32 }
 0x104   :  { %1840 = vmatpush.msrb.mxu3 %v1276_v33  ;;  %1649 = vmatpush.msrb.mxu0 %v1241_v6 }
 0x105   :  { %1714 = vmatpush.msrb.mxu1 %v1242_v7  ;;  %1776 = vmatpush.msrb.mxu2 %v1267_v49 }
 0x106   :  { %1841 = vmatpush.msrb.mxu3 %v1268_v50  ;;  %3323 = vmatmul.msk.f32.gmra.mxu2 %vm1325_vm2, %v4371_v56 }
 0x107   :  { %3339 = vmatmul.msk.f32.gmra.mxu3 %vm1325_vm2, %v4371_v56  ;;  %1777 = vmatpush.msrb.mxu2 %v1259_v42 }
 0x108   :  { %1842 = vmatpush.msrb.mxu3 %v1260_v38 }
 0x109   :  { %1778 = vmatpush.msrb.mxu2 %v1251_v39  ;;  %3292 = vmatmul.msk.f32.gmra.mxu0 %vm1325_vm2, %v4408_v48 }
 0x10a   :  { %1843 = vmatpush.msrb.mxu3 %v1252_v47  ;;  %3308 = vmatmul.msk.f32.gmra.mxu1 %vm1325_vm2, %v4408_v48 }
 0x10b   :  { %1779 = vmatpush.msrb.mxu2 %v1243_v62 }
 0x10c   :  { %1844 = vmatpush.msrb.mxu3 %v1244_v63 }
 0x10e   :  { %3324 = vmatmul.msk.f32.gmra.mxu2 %vm1325_vm2, %v4408_v48 }
 0x10f   :  { %3340 = vmatmul.msk.f32.gmra.mxu3 %vm1325_vm2, %v4408_v48 }
 0x111   :  { %3293 = vmatmul.msk.f32.gmra.mxu0 %vm1325_vm2, %v4425_v40 }
 0x112   :  { %3309 = vmatmul.msk.f32.gmra.mxu1 %vm1325_vm2, %v4425_v40 }
 0x116   :  { %3325 = vmatmul.msk.f32.gmra.mxu2 %vm1325_vm2, %v4425_v40 }
 0x117   :  { %3341 = vmatmul.msk.f32.gmra.mxu3 %vm1325_vm2, %v4425_v40 }
 0x119   :  { %3294 = vmatmul.msk.f32.gmra.mxu0 %vm1325_vm2, %v4438_v41 }
 0x11a   :  { %3310 = vmatmul.msk.f32.gmra.mxu1 %vm1325_vm2, %v4438_v41 }
 0x11e   :  { %3326 = vmatmul.msk.f32.gmra.mxu2 %vm1325_vm2, %v4438_v41 }
 0x11f   :  { %3342 = vmatmul.msk.f32.gmra.mxu3 %vm1325_vm2, %v4438_v41 }
 0x121   :  { %3295 = vmatmul.msk.f32.gmra.mxu0 %vm1325_vm2, %v4451_v0 }
 0x122   :  { %3311 = vmatmul.msk.f32.gmra.mxu1 %vm1325_vm2, %v4451_v0 }
 0x126   :  { %3327 = vmatmul.msk.f32.gmra.mxu2 %vm1325_vm2, %v4451_v0 }
 0x127   :  { %3343 = vmatmul.msk.f32.gmra.mxu3 %vm1325_vm2, %v4451_v0 }
 0x129   :  { %3296 = vmatmul.msk.f32.gmra.mxu0 %vm1325_vm2, %v4464_v1 }
 0x12a   :  { %3312 = vmatmul.msk.f32.gmra.mxu1 %vm1325_vm2, %v4464_v1 }
 0x12e   :  { %3328 = vmatmul.msk.f32.gmra.mxu2 %vm1325_vm2, %v4464_v1 }
 0x12f   :  { %3344 = vmatmul.msk.f32.gmra.mxu3 %vm1325_vm2, %v4464_v1 }
 0x131   :  { %3297 = vmatmul.msk.f32.gmra.mxu0 %vm1325_vm2, %v4477_v9 }
 0x132   :  { %3313 = vmatmul.msk.f32.gmra.mxu1 %vm1325_vm2, %v4477_v9 }
 0x136   :  { %3329 = vmatmul.msk.f32.gmra.mxu2 %vm1325_vm2, %v4477_v9 }
 0x137   :  { %3345 = vmatmul.msk.f32.gmra.mxu3 %vm1325_vm2, %v4477_v9 }
 0x139   :  { %3298 = vmatmul.msk.f32.gmra.mxu0 %vm1325_vm2, %v4490_v10 }
 0x13a   :  { %3314 = vmatmul.msk.f32.gmra.mxu1 %vm1325_vm2, %v4490_v10 }
 0x13e   :  { %3330 = vmatmul.msk.f32.gmra.mxu2 %vm1325_vm2, %v4490_v10 }
 0x13f   :  { %3346 = vmatmul.msk.f32.gmra.mxu3 %vm1325_vm2, %v4490_v10 }
 0x141   :  { %3299 = vmatmul.msk.f32.gmra.mxu0 %vm1325_vm2, %v4503_v43 }
 0x142   :  { %3315 = vmatmul.msk.f32.gmra.mxu1 %vm1325_vm2, %v4503_v43 }
 0x146   :  { %3331 = vmatmul.msk.f32.gmra.mxu2 %vm1325_vm2, %v4503_v43 }
 0x147   :  { %3347 = vmatmul.msk.f32.gmra.mxu3 %vm1325_vm2, %v4503_v43 }
 0x149   :  { %3300 = vmatmul.msk.f32.gmra.mxu0 %vm1325_vm2, %v1320_v51 }
 0x14a   :  { %3316 = vmatmul.msk.f32.gmra.mxu1 %vm1325_vm2, %v1320_v51 }
 0x14e   :  { %3332 = vmatmul.msk.f32.gmra.mxu2 %vm1325_vm2, %v1320_v51 }
 0x14f   :  { %3348 = vmatmul.msk.f32.gmra.mxu3 %vm1325_vm2, %v1320_v51 }
 0x151   :  { %3301 = vmatmul.msk.f32.gmra.mxu0 %vm1325_vm2, %v1321_v52 }
 0x152   :  { %3317 = vmatmul.msk.f32.gmra.mxu1 %vm1325_vm2, %v1321_v52 }
 0x156   :  { %3333 = vmatmul.msk.f32.gmra.mxu2 %vm1325_vm2, %v1321_v52 }
 0x157   :  { %3349 = vmatmul.msk.f32.gmra.mxu3 %vm1325_vm2, %v1321_v52 }
 0x159   :  { %3302 = vmatmul.msk.f32.gmra.mxu0 %vm1325_vm2, %v1322_v11 }
 0x15a   :  { %3318 = vmatmul.msk.f32.gmra.mxu1 %vm1325_vm2, %v1322_v11 }
 0x15e   :  { %3334 = vmatmul.msk.f32.gmra.mxu2 %vm1325_vm2, %v1322_v11 }
 0x15f   :  { %3350 = vmatmul.msk.f32.gmra.mxu3 %vm1325_vm2, %v1322_v11 }
 0x161   :  { %3303 = vmatmul.msk.f32.gmra.mxu0 %vm1325_vm2, %v1323_v12 }
 0x162   :  { %3319 = vmatmul.msk.f32.gmra.mxu1 %vm1325_vm2, %v1323_v12 }
 0x166   :  { %3335 = vmatmul.msk.f32.gmra.mxu2 %vm1325_vm2, %v1323_v12 }
 0x167   :  { %3351 = vmatmul.msk.f32.gmra.mxu3 %vm1325_vm2, %v1323_v12 }
 0x169   :  { %3304 = vmatmul.msk.f32.gmra.mxu0 %vm1325_vm2, %v1324_v13 }
 0x16a   :  { %3320 = vmatmul.msk.f32.gmra.mxu1 %vm1325_vm2, %v1324_v13  ;;  %v4546_v2 = vpop.f32.mrf.mxu0 }
 0x16b   :  { %v4548_v3 = vpop.f32.mrf.mxu1  ;;  %v2022_v15 = vand.u32 2147483647, %v4546_v2  ;;  %v1894_v55 = vmax.f32 %v4546_v2, 0.0 }
 0x16c   :  { %v2023_v34 = vand.u32 2147483647, %v4548_v3  ;;  %v1895_v7 = vmax.f32 %v4548_v3, 0.0 }
 0x16d   :  { %v2150_v35 = vsub.f32 0.0, %v2022_v15 }
 0x16e   :  { %v2151_v8 = vsub.f32 0.0, %v2023_v34  ;;  %3336 = vmatmul.msk.f32.gmra.mxu2 %vm1325_vm2, %v1324_v13 }
 0x16f   :  { %3352 = vmatmul.msk.f32.gmra.mxu3 %vm1325_vm2, %v1324_v13  ;;  %v2278_v44 = vmul.f32 1.442695, %v2150_v35 }
 0x170   :  { %v2280_v57 = vmul.f32 1.442695, %v2151_v8 }
 0x171   :  { %3424 = vpow2.f32 %v2278_v44  ;;  %3353 = vmatmul.msk.f32.vlgmr.msrb.gmra.mxu0 %vm1325_vm2, %v4279_v14 }
 0x172   :  { %3426 = vpow2.f32 %v2280_v57  ;;  %3369 = vmatmul.msk.f32.vlgmr.msrb.gmra.mxu1 %vm1325_vm2, %v4279_v14 }
 0x174   :  { %v4558_v58 = vpop.f32.mrf.mxu0 }
 0x175   :  { %v4560_v16 = vpop.f32.mrf.mxu1  ;;  %v2030_v17 = vand.u32 2147483647, %v4558_v58 }
 0x176   :  { %v2031_v18 = vand.u32 2147483647, %v4560_v16  ;;  %3385 = vmatmul.msk.f32.vlgmr.msrb.gmra.mxu2 %vm1325_vm2, %v4279_v14 }
 0x177   :  { %3401 = vmatmul.msk.f32.vlgmr.msrb.gmra.mxu3 %vm1325_vm2, %v4279_v14  ;;  %v3425_v19 = vpop.eup %3424  ;;  %v2158_v20 = vsub.f32 0.0, %v2030_v17  ;;  %v4568_v5 = vpop.f32.mrf.mxu2 }
 0x178   :  { %v2159_v4 = vsub.f32 0.0, %v2031_v18  ;;  %v4570_v21 = vpop.f32.mrf.mxu3  ;;  %v3427_v22 = vpop.eup %3426  ;;  %v2534_v37 = vadd.f32 1.0, %v3425_v19  ;;  %v2024_v53 = vand.u32 2147483647, %v4568_v5 }
 0x179   :  { %v2535_v54 = vadd.f32 1.0, %v3427_v22  ;;  %v2294_v60 = vmul.f32 1.442695, %v2158_v20  ;;  %3354 = vmatmul.msk.f32.gmra.mxu0 %vm1325_vm2, %v4324_v36  ;;  %v2025_v61 = vand.u32 2147483647, %v4570_v21 }
 0x17a   :  { %v2296_v59 = vmul.f32 1.442695, %v2159_v4  ;;  %3428 = vlog2.f32 %v2534_v37  ;;  %3370 = vmatmul.msk.f32.gmra.mxu1 %vm1325_vm2, %v4324_v36  ;;  %v2152_v14 = vsub.f32 0.0, %v2024_v53  ;;  %v1903_v37 = vmax.f32 %v4560_v16, 0.0 }
 0x17b   :  { %3430 = vlog2.f32 %v2535_v54  ;;  %v2153_v24 = vsub.f32 0.0, %v2025_v61 }
 0x17c   :  { %3432 = vpow2.f32 %v2294_v60  ;;  %v2282_v23 = vmul.f32 1.442695, %v2152_v14 }
 0x17d   :  { %3434 = vpow2.f32 %v2296_v59  ;;  %v2284_v25 = vmul.f32 1.442695, %v2153_v24  ;;  %v1896_v24 = vmax.f32 %v4568_v5, 0.0 }
 0x17e   :  { %3436 = vpow2.f32 %v2282_v23  ;;  %v4578_v26 = vpop.f32.mrf.mxu0  ;;  %3386 = vmatmul.msk.f32.gmra.mxu2 %vm1325_vm2, %v4324_v36 }
 0x17f   :  { %v4580_v27 = vpop.f32.mrf.mxu1  ;;  %3402 = vmatmul.msk.f32.gmra.mxu3 %vm1325_vm2, %v4324_v36  ;;  %v2038_v28 = vand.u32 2147483647, %v4578_v26  ;;  %3438 = vpow2.f32 %v2284_v25 }
 0x180   :  { %v2039_v29 = vand.u32 2147483647, %v4580_v27  ;;  %v3429_v45 = vpop.eup %3428 }
 0x181   :  { %v3431_v46 = vpop.eup %3430  ;;  %v2663_v30 = vmul.f32 0.6931472, %v3429_v45  ;;  %v2166_v31 = vsub.f32 0.0, %v2038_v28  ;;  %v4589_v32 = vpop.f32.mrf.mxu2  ;;  %3355 = vmatmul.msk.f32.gmra.mxu0 %vm1325_vm2, %v4371_v56 }
 0x182   :  { %v4591_v33 = vpop.f32.mrf.mxu3  ;;  %v3433_v6 = vpop.eup %3432  ;;  %v2665_v49 = vmul.f32 0.6931472, %v3431_v46  ;;  %v2167_v36 = vsub.f32 0.0, %v2039_v29  ;;  %3371 = vmatmul.msk.f32.gmra.mxu1 %vm1325_vm2, %v4371_v56  ;;  %v2032_v50 = vand.u32 2147483647, %v4589_v32 }
 0x183   :  { %v3435_v42 = vpop.eup %3434  ;;  %v2918_v38 = vadd.f32 %v2663_v30, %v1894_v55  ;;  %v2542_v39 = vadd.f32 1.0, %v3433_v6  ;;  %v2310_v47 = vmul.f32 1.442695, %v2166_v31  ;;  %v2033_v11 = vand.u32 2147483647, %v4591_v33 }
 0x184   :  { %v3437_v62 = vpop.eup %3436  ;;  %v2919_v63 = vadd.f32 %v2665_v49, %v1895_v7  ;;  %v2543_v51 = vadd.f32 1.0, %v3435_v42  ;;  %v2160_v52 = vsub.f32 0.0, %v2032_v50  ;;  %v2312_v2 = vmul.f32 1.442695, %v2167_v36 }
 0x185   :  { %3046 = vst [vmem:[#allocation5] sm:$0xff] %v2918_v38  ;;  %3440 = vlog2.f32 %v2542_v39  ;;  %v2536_v12 = vadd.f32 1.0, %v3437_v62  ;;  %v3439_v13 = vpop.eup %3438  ;;  %v2161_v3 = vsub.f32 0.0, %v2033_v11  ;;  %v1897_v50 = vmax.f32 %v4570_v21, 0.0 }
 0x186   :  { %3047 = vst [vmem:[#allocation5 + $0x8] sm:$0xff] %v2919_v63  ;;  %3442 = vlog2.f32 %v2543_v51  ;;  %3387 = vmatmul.msk.f32.gmra.mxu2 %vm1325_vm2, %v4371_v56  ;;  %v2537_v15 = vadd.f32 1.0, %v3439_v13  ;;  %v2298_v34 = vmul.f32 1.442695, %v2160_v52  ;;  %v4604_v35 = vpop.f32.mrf.mxu0 }
 0x187   :  { %3403 = vmatmul.msk.f32.gmra.mxu3 %vm1325_vm2, %v4371_v56  ;;  %3444 = vlog2.f32 %v2536_v12  ;;  %v4606_v8 = vpop.f32.mrf.mxu1  ;;  %v2300_v44 = vmul.f32 1.442695, %v2161_v3  ;;  %v2046_v57 = vand.u32 2147483647, %v4604_v35  ;;  %v1902_v56 = vmax.f32 %v4558_v58, 0.0 }
 0x188   :  { %3446 = vpow2.f32 %v2310_v47  ;;  %v2047_v17 = vand.u32 2147483647, %v4606_v8 }
 0x189   :  { %3448 = vlog2.f32 %v2537_v15  ;;  %v4610_v18 = vpop.f32.mrf.mxu2  ;;  %v2174_v20 = vsub.f32 0.0, %v2046_v57  ;;  %3356 = vmatmul.msk.f32.gmra.mxu0 %vm1325_vm2, %v4408_v48 }
 0x18a   :  { %v4612_v19 = vpop.f32.mrf.mxu3  ;;  %3450 = vpow2.f32 %v2312_v2  ;;  %3372 = vmatmul.msk.f32.gmra.mxu1 %vm1325_vm2, %v4408_v48  ;;  %v2040_v4 = vand.u32 2147483647, %v4610_v18  ;;  %v2175_v53 = vsub.f32 0.0, %v2047_v17  ;;  %v1910_v2 = vmax.f32 %v4578_v26, 0.0 }
 0x18b   :  { %v3441_v22 = vpop.eup %3440  ;;  %3452 = vpow2.f32 %v2298_v34  ;;  %v2041_v54 = vand.u32 2147483647, %v4612_v19  ;;  %v2326_v58 = vmul.f32 1.442695, %v2174_v20  ;;  %v1904_v20 = vmax.f32 %v4589_v32, 0.0 }
 0x18c   :  { %v3443_v60 = vpop.eup %3442  ;;  %v2679_v59 = vmul.f32 0.6931472, %v3441_v22  ;;  %3454 = vpow2.f32 %v2300_v44  ;;  %v2168_v14 = vsub.f32 0.0, %v2040_v4  ;;  %v2328_v25 = vmul.f32 1.442695, %v2175_v53 }
 0x18d   :  { %v3445_v61 = vpop.eup %3444  ;;  %v2681_v23 = vmul.f32 0.6931472, %v3443_v60  ;;  %v2169_v28 = vsub.f32 0.0, %v2041_v54  ;;  %3456 = vpow2.f32 %v2326_v58  ;;  %v1911_v44 = vmax.f32 %v4580_v27, 0.0 }
 0x18e   :  { %v3447_v29 = vpop.eup %3446  ;;  %v2926_v45 = vadd.f32 %v2679_v59, %v1902_v56  ;;  %v2667_v46 = vmul.f32 0.6931472, %v3445_v61  ;;  %v2314_v16 = vmul.f32 1.442695, %v2168_v14  ;;  %3388 = vmatmul.msk.f32.gmra.mxu2 %vm1325_vm2, %v4408_v48  ;;  %3458 = vpow2.f32 %v2328_v25  ;;  %v4627_v7 = vpop.f32.mrf.mxu0 }
 0x18f   :  { %3404 = vmatmul.msk.f32.gmra.mxu3 %vm1325_vm2, %v4408_v48  ;;  %v3449_v55 = vpop.eup %3448  ;;  %v2927_v30 = vadd.f32 %v2681_v23, %v1903_v37  ;;  %v2550_v31 = vadd.f32 1.0, %v3447_v29  ;;  %v2316_v6 = vmul.f32 1.442695, %v2169_v28  ;;  %v4629_v5 = vpop.f32.mrf.mxu1  ;;  %v2054_v39 = vand.u32 2147483647, %v4627_v7 }
 0x190   :  { %v3451_v49 = vpop.eup %3450  ;;  %3054 = vst [vmem:[#allocation5 + $0x40] sm:$0xff] %v2926_v45  ;;  %v2920_v36 = vadd.f32 %v2667_v46, %v1896_v24  ;;  %v2669_v42 = vmul.f32 0.6931472, %v3449_v55  ;;  %3460 = vpow2.f32 %v2314_v16  ;;  %v2055_v11 = vand.u32 2147483647, %v4629_v5 }
 0x191   :  { %v3453_v38 = vpop.eup %3452  ;;  %3055 = vst [vmem:[#allocation5 + $0x48] sm:$0xff] %v2927_v30  ;;  %3462 = vlog2.f32 %v2550_v31  ;;  %v2551_v48 = vadd.f32 1.0, %v3451_v49  ;;  %v4633_v47 = vpop.f32.mrf.mxu2  ;;  %3357 = vmatmul.msk.f32.gmra.mxu0 %vm1325_vm2, %v4425_v40  ;;  %v2182_v12 = vsub.f32 0.0, %v2054_v39  ;;  %v1905_v53 = vmax.f32 %v4591_v33, 0.0 }
 0x192   :  { %v4635_v62 = vpop.f32.mrf.mxu3  ;;  %v3455_v63 = vpop.eup %3454  ;;  %3048 = vst [vmem:[#allocation5 + $0x10] sm:$0xff] %v2920_v36  ;;  %v2921_v51 = vadd.f32 %v2669_v42, %v1897_v50  ;;  %v2544_v52 = vadd.f32 1.0, %v3453_v38  ;;  %3464 = vpow2.f32 %v2316_v6  ;;  %3373 = vmatmul.msk.f32.gmra.mxu1 %vm1325_vm2, %v4425_v40  ;;  %v2183_v3 = vsub.f32 0.0, %v2055_v11 }
 0x193   :  { %3466 = vlog2.f32 %v2551_v48  ;;  %v2545_v21 = vadd.f32 1.0, %v3455_v63  ;;  %v3457_v13 = vpop.eup %3456  ;;  %v2048_v15 = vand.u32 2147483647, %v4633_v47  ;;  %v2049_v17 = vand.u32 2147483647, %v4635_v62 }
 0x194   :  { %3049 = vst [vmem:[#allocation5 + $0x18] sm:$0xff] %v2921_v51  ;;  %3468 = vlog2.f32 %v2544_v52  ;;  %v3459_v34 = vpop.eup %3458  ;;  %v2558_v57 = vadd.f32 1.0, %v3457_v13  ;;  %v2342_v22 = vmul.f32 1.442695, %v2182_v12  ;;  %v1918_v14 = vmax.f32 %v4604_v35, 0.0 }
 0x195   :  { %3470 = vlog2.f32 %v2545_v21  ;;  %v2559_v4 = vadd.f32 1.0, %v3459_v34  ;;  %v2176_v37 = vsub.f32 0.0, %v2048_v15  ;;  %v2177_v54 = vsub.f32 0.0, %v2049_v17 }
 0x196   :  { %v3461_v56 = vpop.eup %3460  ;;  %3389 = vmatmul.msk.f32.gmra.mxu2 %vm1325_vm2, %v4425_v40  ;;  %3472 = vlog2.f32 %v2558_v57  ;;  %v4652_v60 = vpop.f32.mrf.mxu0  ;;  %v2344_v61 = vmul.f32 1.442695, %v2183_v3  ;;  %v1919_v36 = vmax.f32 %v4606_v8, 0.0  ;;  %v1912_v21 = vmax.f32 %v4610_v18, 0.0 }
 0x197   :  { %3405 = vmatmul.msk.f32.gmra.mxu3 %vm1325_vm2, %v4425_v40  ;;  %v3463_v26 = vpop.eup %3462  ;;  %v2552_v27 = vadd.f32 1.0, %v3461_v56  ;;  %v4654_v59 = vpop.f32.mrf.mxu1  ;;  %3474 = vlog2.f32 %v2559_v4  ;;  %v2330_v40 = vmul.f32 1.442695, %v2176_v37  ;;  %v2062_v25 = vand.u32 2147483647, %v4652_v60 }
 0x198   :  { %v3465_v32 = vpop.eup %3464  ;;  %v2695_v58 = vmul.f32 0.6931472, %v3463_v26  ;;  %v2332_v16 = vmul.f32 1.442695, %v2177_v54  ;;  %v2063_v31 = vand.u32 2147483647, %v4654_v59 }
 0x199   :  { %v3467_v23 = vpop.eup %3466  ;;  %3476 = vlog2.f32 %v2552_v27  ;;  %v2553_v24 = vadd.f32 1.0, %v3465_v32  ;;  %v4658_v33 = vpop.f32.mrf.mxu2  ;;  %3358 = vmatmul.msk.f32.gmra.mxu0 %vm1325_vm2, %v4438_v41  ;;  %v2190_v30 = vsub.f32 0.0, %v2062_v25  ;;  %v1913_v56 = vmax.f32 %v4612_v19, 0.0 }
 0x19a   :  { %v4660_v28 = vpop.f32.mrf.mxu3  ;;  %v3469_v29 = vpop.eup %3468  ;;  %v2934_v45 = vadd.f32 %v2695_v58, %v1910_v2  ;;  %v2697_v46 = vmul.f32 0.6931472, %v3467_v23  ;;  %3478 = vpow2.f32 %v2342_v22  ;;  %3374 = vmatmul.msk.f32.gmra.mxu1 %vm1325_vm2, %v4438_v41  ;;  %v2191_v48 = vsub.f32 0.0, %v2063_v31 }
 0x19b   :  { %v3471_v35 = vpop.eup %3470  ;;  %v2683_v55 = vmul.f32 0.6931472, %v3469_v29  ;;  %3480 = vlog2.f32 %v2553_v24  ;;  %v2358_v38 = vmul.f32 1.442695, %v2190_v30  ;;  %v2056_v52 = vand.u32 2147483647, %v4658_v33 }
 0x19c   :  { %3062 = vst [vmem:[#allocation5 + $0x80] sm:$0xff] %v2934_v45  ;;  %v2935_v6 = vadd.f32 %v2697_v46, %v1911_v44  ;;  %v2685_v49 = vmul.f32 0.6931472, %v3471_v35  ;;  %3482 = vpow2.f32 %v2344_v61  ;;  %v3473_v50 = vpop.eup %3472  ;;  %v2360_v12 = vmul.f32 1.442695, %v2191_v48 }
 0x19d   :  { %v2928_v42 = vadd.f32 %v2683_v55, %v1904_v20  ;;  %3484 = vpow2.f32 %v2330_v40  ;;  %v3475_v39 = vpop.eup %3474  ;;  %v2711_v51 = vmul.f32 0.6931472, %v3473_v50  ;;  %v2184_v44 = vsub.f32 0.0, %v2056_v52 }
 0x19e   :  { %3063 = vst [vmem:[#allocation5 + $0x88] sm:$0xff] %v2935_v6  ;;  %v2929_v63 = vadd.f32 %v2685_v49, %v1905_v53  ;;  %3486 = vpow2.f32 %v2332_v16  ;;  %3390 = vmatmul.msk.f32.gmra.mxu2 %vm1325_vm2, %v4438_v41  ;;  %v2713_v11 = vmul.f32 0.6931472, %v3475_v39  ;;  %v4674_v13 = vpop.f32.mrf.mxu0  ;;  %v2057_v57 = vand.u32 2147483647, %v4660_v28 }
 0x19f   :  { %3406 = vmatmul.msk.f32.gmra.mxu3 %vm1325_vm2, %v4438_v41  ;;  %v3477_v8 = vpop.eup %3476  ;;  %3056 = vst [vmem:[#allocation5 + $0x50] sm:$0xff] %v2928_v42  ;;  %3488 = vpow2.f32 %v2358_v38  ;;  %v4676_v2 = vpop.f32.mrf.mxu1  ;;  %v2942_v15 = vadd.f32 %v2711_v51, %v1918_v14  ;;  %v2346_v53 = vmul.f32 1.442695, %v2184_v44  ;;  %v1926_v19 = vmax.f32 %v4627_v7, 0.0 }
 0x1a0   :  { %v3479_v3 = vpop.eup %3478  ;;  %3057 = vst [vmem:[#allocation5 + $0x58] sm:$0xff] %v2929_v63  ;;  %v2699_v34 = vmul.f32 0.6931472, %v3477_v8  ;;  %v2943_v41 = vadd.f32 %v2713_v11, %v1919_v36  ;;  %3490 = vpow2.f32 %v2360_v12  ;;  %v2185_v27 = vsub.f32 0.0, %v2057_v57 }
 0x1a1   :  { %v3481_v17 = vpop.eup %3480  ;;  %v2566_v20 = vadd.f32 1.0, %v3479_v3  ;;  %v4680_v18 = vpop.f32.mrf.mxu2  ;;  %3070 = vst [vmem:[#allocation5 + $0xc0] sm:$0xff] %v2942_v15  ;;  %3359 = vmatmul.msk.f32.gmra.mxu0 %vm1325_vm2, %v4451_v0  ;;  %v2070_v58 = vand.u32 2147483647, %v4674_v13  ;;  %v2071_v45 = vand.u32 2147483647, %v4676_v2 }
 0x1a2   :  { %v4682_v4 = vpop.f32.mrf.mxu3  ;;  %v3483_v22 = vpop.eup %3482  ;;  %v2936_v37 = vadd.f32 %v2699_v34, %v1912_v21  ;;  %v2701_v26 = vmul.f32 0.6931472, %v3481_v17  ;;  %3375 = vmatmul.msk.f32.gmra.mxu1 %vm1325_vm2, %v4451_v0  ;;  %3071 = vst [vmem:[#allocation5 + $0xc8] sm:$0xff] %v2943_v41  ;;  %v2348_v24 = vmul.f32 1.442695, %v2185_v27  ;;  %v1927_v46 = vmax.f32 %v4629_v5, 0.0 }
 0x1a3   :  { %v3485_v54 = vpop.eup %3484  ;;  %3492 = vlog2.f32 %v2566_v20  ;;  %v2567_v32 = vadd.f32 1.0, %v3483_v22  ;;  %v2198_v29 = vsub.f32 0.0, %v2070_v58  ;;  %v2064_v16 = vand.u32 2147483647, %v4680_v18 }
 0x1a4   :  { %v3487_v14 = vpop.eup %3486  ;;  %3064 = vst [vmem:[#allocation5 + $0x90] sm:$0xff] %v2936_v37  ;;  %v2937_v61 = vadd.f32 %v2701_v26, %v1913_v56  ;;  %v2560_v23 = vadd.f32 1.0, %v3485_v54  ;;  %3494 = vpow2.f32 %v2346_v53  ;;  %v1920_v55 = vmax.f32 %v4633_v47, 0.0 }
 0x1a5   :  { %v3489_v40 = vpop.eup %3488  ;;  %3496 = vlog2.f32 %v2567_v32  ;;  %v2561_v25 = vadd.f32 1.0, %v3487_v14  ;;  %v2374_v30 = vmul.f32 1.442695, %v2198_v29  ;;  %v2199_v31 = vsub.f32 0.0, %v2071_v45 }
 0x1a6   :  { %3065 = vst [vmem:[#allocation5 + $0x98] sm:$0xff] %v2937_v61  ;;  %3498 = vlog2.f32 %v2560_v23  ;;  %v2574_v7 = vadd.f32 1.0, %v3489_v40  ;;  %3391 = vmatmul.msk.f32.gmra.mxu2 %vm1325_vm2, %v4451_v0  ;;  %v3491_v35 = vpop.eup %3490  ;;  %v4698_v6 = vpop.f32.mrf.mxu0  ;;  %v2192_v36 = vsub.f32 0.0, %v2064_v16  ;;  %v2065_v50 = vand.u32 2147483647, %v4682_v4 }
 0x1a7   :  { %3407 = vmatmul.msk.f32.gmra.mxu3 %vm1325_vm2, %v4451_v0  ;;  %3500 = vlog2.f32 %v2561_v25  ;;  %v4700_v49 = vpop.f32.mrf.mxu1  ;;  %v2575_v5 = vadd.f32 1.0, %v3491_v35  ;;  %v1921_v38 = vmax.f32 %v4635_v62, 0.0  ;;  %v2376_v0 = vmul.f32 1.442695, %v2199_v31 }
 0x1a8   :  { %3502 = vlog2.f32 %v2574_v7  ;;  %v2078_v48 = vand.u32 2147483647, %v4698_v6  ;;  %v2362_v52 = vmul.f32 1.442695, %v2192_v36  ;;  %v2193_v8 = vsub.f32 0.0, %v2065_v50 }
 0x1a9   :  { %v3493_v42 = vpop.eup %3492  ;;  %3504 = vpow2.f32 %v2348_v24  ;;  %v4705_v47 = vpop.f32.mrf.mxu2  ;;  %3360 = vmatmul.msk.f32.gmra.mxu0 %vm1325_vm2, %v4464_v1  ;;  %v1934_v11 = vmax.f32 %v4652_v60, 0.0  ;;  %v2079_v56 = vand.u32 2147483647, %v4700_v49  ;;  %v1935_v60 = vmax.f32 %v4654_v59, 0.0 }
 0x1aa   :  { %v4707_v39 = vpop.f32.mrf.mxu3  ;;  %v3495_v63 = vpop.eup %3494  ;;  %v2727_v51 = vmul.f32 0.6931472, %v3493_v42  ;;  %3506 = vlog2.f32 %v2575_v5  ;;  %3376 = vmatmul.msk.f32.gmra.mxu1 %vm1325_vm2, %v4464_v1  ;;  %v2206_v12 = vsub.f32 0.0, %v2078_v48  ;;  %v2364_v44 = vmul.f32 1.442695, %v2193_v8 }
 0x1ab   :  { %v3497_v62 = vpop.eup %3496  ;;  %v2568_v21 = vadd.f32 1.0, %v3495_v63  ;;  %3508 = vpow2.f32 %v2374_v30  ;;  %v2207_v54 = vsub.f32 0.0, %v2079_v56  ;;  %v2072_v61 = vand.u32 2147483647, %v4705_v47 }
 0x1ac   :  { %v3499_v3 = vpop.eup %3498  ;;  %v2950_v15 = vadd.f32 %v2727_v51, %v1926_v19  ;;  %v2729_v34 = vmul.f32 0.6931472, %v3497_v62  ;;  %3510 = vpow2.f32 %v2376_v0  ;;  %v2390_v41 = vmul.f32 1.442695, %v2206_v12 }
 0x1ad   :  { %v3501_v57 = vpop.eup %3500  ;;  %v2715_v17 = vmul.f32 0.6931472, %v3499_v3  ;;  %3512 = vlog2.f32 %v2568_v21  ;;  %v1928_v40 = vmax.f32 %v4658_v33, 0.0  ;;  %v2392_v25 = vmul.f32 1.442695, %v2207_v54 }
 0x1ae   :  { %v3503_v20 = vpop.eup %3502  ;;  %3078 = vst [vmem:[#allocation5 + $0x100] sm:$0xff] %v2950_v15  ;;  %v2951_v22 = vadd.f32 %v2729_v34, %v1927_v46  ;;  %v2717_v37 = vmul.f32 0.6931472, %v3501_v57  ;;  %3514 = vpow2.f32 %v2362_v52  ;;  %3392 = vmatmul.msk.f32.gmra.mxu2 %vm1325_vm2, %v4464_v1  ;;  %v4720_v19 = vpop.f32.mrf.mxu0  ;;  %v2200_v16 = vsub.f32 0.0, %v2072_v61 }
 0x1af   :  { %3408 = vmatmul.msk.f32.gmra.mxu3 %vm1325_vm2, %v4464_v1  ;;  %v3505_v26 = vpop.eup %3504  ;;  %v2944_v53 = vadd.f32 %v2715_v17, %v1920_v55  ;;  %v2743_v27 = vmul.f32 0.6931472, %v3503_v20  ;;  %3516 = vpow2.f32 %v2364_v44  ;;  %v4722_v32 = vpop.f32.mrf.mxu1  ;;  %v2073_v35 = vand.u32 2147483647, %v4707_v39 }
 0x1b0   :  { %v3507_v58 = vpop.eup %3506  ;;  %3079 = vst [vmem:[#allocation5 + $0x108] sm:$0xff] %v2951_v22  ;;  %v2945_v14 = vadd.f32 %v2717_v37, %v1921_v38  ;;  %v2569_v59 = vadd.f32 1.0, %v3505_v26  ;;  %3518 = vpow2.f32 %v2390_v41  ;;  %v1929_v30 = vmax.f32 %v4660_v28, 0.0 }
 0x1b1   :  { %v3509_v23 = vpop.eup %3508  ;;  %3072 = vst [vmem:[#allocation5 + $0xd0] sm:$0xff] %v2944_v53  ;;  %v2958_v24 = vadd.f32 %v2743_v27, %v1934_v11  ;;  %v2745_v1 = vmul.f32 0.6931472, %v3507_v58  ;;  %v4726_v29 = vpop.f32.mrf.mxu2  ;;  %3361 = vmatmul.msk.f32.gmra.mxu0 %vm1325_vm2, %v4477_v9  ;;  %v2378_v50 = vmul.f32 1.442695, %v2200_v16  ;;  %v2201_v42 = vsub.f32 0.0, %v2073_v35 }
 0x1b2   :  { %v4728_v45 = vpop.f32.mrf.mxu3  ;;  %v3511_v46 = vpop.eup %3510  ;;  %3073 = vst [vmem:[#allocation5 + $0xd8] sm:$0xff] %v2945_v14  ;;  %3520 = vlog2.f32 %v2569_v59  ;;  %v2582_v7 = vadd.f32 1.0, %v3509_v23  ;;  %3377 = vmatmul.msk.f32.gmra.mxu1 %vm1325_vm2, %v4477_v9  ;;  %v1942_v0 = vmax.f32 %v4674_v13, 0.0  ;;  %v2086_v63 = vand.u32 2147483647, %v4720_v19 }
 0x1b3   :  { %v3513_v55 = vpop.eup %3512  ;;  %3086 = vst [vmem:[#allocation5 + $0x140] sm:$0xff] %v2958_v24  ;;  %v2959_v33 = vadd.f32 %v2745_v1, %v1935_v60  ;;  %v2583_v31 = vadd.f32 1.0, %v3511_v46  ;;  %3522 = vpow2.f32 %v2392_v25  ;;  %v2380_v28 = vmul.f32 1.442695, %v2201_v42 }
 0x1b4   :  { %v3515_v5 = vpop.eup %3514  ;;  %v2731_v36 = vmul.f32 0.6931472, %v3513_v55  ;;  %3524 = vlog2.f32 %v2582_v7  ;;  %v2214_v11 = vsub.f32 0.0, %v2086_v63  ;;  %v2087_v13 = vand.u32 2147483647, %v4722_v32 }
 0x1b5   :  { %v3517_v38 = vpop.eup %3516  ;;  %3087 = vst [vmem:[#allocation5 + $0x148] sm:$0xff] %v2959_v33  ;;  %3526 = vlog2.f32 %v2583_v31  ;;  %v2576_v48 = vadd.f32 1.0, %v3515_v5  ;;  %v1943_v15 = vmax.f32 %v4676_v2, 0.0  ;;  %v1936_v34 = vmax.f32 %v4680_v18, 0.0 }
 0x1b6   :  { %v3519_v51 = vpop.eup %3518  ;;  %v2952_v52 = vadd.f32 %v2731_v36, %v1928_v40  ;;  %v2577_v8 = vadd.f32 1.0, %v3517_v38  ;;  %3528 = vpow2.f32 %v2378_v50  ;;  %3393 = vmatmul.msk.f32.gmra.mxu2 %vm1325_vm2, %v4477_v9  ;;  %v4743_v21 = vpop.f32.mrf.mxu0  ;;  %v2080_v44 = vand.u32 2147483647, %v4726_v29 }
 0x1b7   :  { %3409 = vmatmul.msk.f32.gmra.mxu3 %vm1325_vm2, %v4477_v9  ;;  %3530 = vlog2.f32 %v2576_v48  ;;  %v2590_v62 = vadd.f32 1.0, %v3519_v51  ;;  %v4745_v12 = vpop.f32.mrf.mxu1  ;;  %v2406_v17 = vmul.f32 1.442695, %v2214_v11  ;;  %v2215_v41 = vsub.f32 0.0, %v2087_v13 }
 0x1b8   :  { %v3521_v3 = vpop.eup %3520  ;;  %3080 = vst [vmem:[#allocation5 + $0x110] sm:$0xff] %v2952_v52  ;;  %3532 = vlog2.f32 %v2577_v8  ;;  %v2208_v60 = vsub.f32 0.0, %v2080_v44  ;;  %v2081_v2 = vand.u32 2147483647, %v4728_v45  ;;  %v1937_v24 = vmax.f32 %v4682_v4, 0.0 }
 0x1b9   :  { %v3523_v57 = vpop.eup %3522  ;;  %v2733_v9 = vmul.f32 0.6931472, %v3521_v3  ;;  %3534 = vlog2.f32 %v2590_v62  ;;  %v4750_v56 = vpop.f32.mrf.mxu2  ;;  %3362 = vmatmul.msk.f32.gmra.mxu0 %vm1325_vm2, %v4490_v10  ;;  %v2408_v27 = vmul.f32 1.442695, %v2215_v41  ;;  %v1950_v55 = vmax.f32 %v4698_v6, 0.0 }
 0x1ba   :  { %v4752_v20 = vpop.f32.mrf.mxu3  ;;  %v3525_v22 = vpop.eup %3524  ;;  %v2591_v37 = vadd.f32 1.0, %v3523_v57  ;;  %3536 = vpow2.f32 %v2380_v28  ;;  %3378 = vmatmul.msk.f32.gmra.mxu1 %vm1325_vm2, %v4490_v10  ;;  %v2394_v14 = vmul.f32 1.442695, %v2208_v60  ;;  %v2209_v59 = vsub.f32 0.0, %v2081_v2 }
 0x1bb   :  { %v3527_v18 = vpop.eup %3526  ;;  %v2953_v26 = vadd.f32 %v2733_v9, %v1929_v30  ;;  %v2759_v53 = vmul.f32 0.6931472, %v3525_v22  ;;  %3538 = vpow2.f32 %v2406_v17  ;;  %v2094_v4 = vand.u32 2147483647, %v4743_v21 }
 0x1bc   :  { %v3529_v54 = vpop.eup %3528  ;;  %v2761_v58 = vmul.f32 0.6931472, %v3527_v18  ;;  %3540 = vlog2.f32 %v2591_v37  ;;  %v2396_v7 = vmul.f32 1.442695, %v2209_v59  ;;  %v2095_v50 = vand.u32 2147483647, %v4745_v12 }
 0x1bd   :  { %v3531_v61 = vpop.eup %3530  ;;  %3081 = vst [vmem:[#allocation5 + $0x118] sm:$0xff] %v2953_v26  ;;  %v2966_v23 = vadd.f32 %v2759_v53, %v1942_v0  ;;  %v2584_v1 = vadd.f32 1.0, %v3529_v54  ;;  %3542 = vpow2.f32 %v2408_v27  ;;  %v1951_v38 = vmax.f32 %v4700_v49, 0.0 }
 0x1be   :  { %v3533_v40 = vpop.eup %3532  ;;  %v2967_v25 = vadd.f32 %v2761_v58, %v1943_v15  ;;  %v2747_v46 = vmul.f32 0.6931472, %v3531_v61  ;;  %3544 = vpow2.f32 %v2394_v14  ;;  %3394 = vmatmul.msk.f32.gmra.mxu2 %vm1325_vm2, %v4490_v10  ;;  %v4766_v33 = vpop.f32.mrf.mxu0  ;;  %v2222_v6 = vsub.f32 0.0, %v2094_v4 }
 0x1bf   :  { %3410 = vmatmul.msk.f32.gmra.mxu3 %vm1325_vm2, %v4490_v10  ;;  %v3535_v16 = vpop.eup %3534  ;;  %3094 = vst [vmem:[#allocation5 + $0x180] sm:$0xff] %v2966_v23  ;;  %v2749_v35 = vmul.f32 0.6931472, %v3533_v40  ;;  %3546 = vlog2.f32 %v2584_v1  ;;  %v4768_v30 = vpop.f32.mrf.mxu1  ;;  %v2223_v28 = vsub.f32 0.0, %v2095_v50  ;;  %v2088_v62 = vand.u32 2147483647, %v4750_v56 }
 0x1c0   :  { %v3537_v31 = vpop.eup %3536  ;;  %3095 = vst [vmem:[#allocation5 + $0x188] sm:$0xff] %v2967_v25  ;;  %v2960_v5 = vadd.f32 %v2747_v46, %v1936_v34  ;;  %v2775_v36 = vmul.f32 0.6931472, %v3535_v16  ;;  %3548 = vpow2.f32 %v2396_v7  ;;  %v1944_v13 = vmax.f32 %v4705_v47, 0.0  ;;  %v3936_v7 = vld [vmem:[%s5188_s2 + $0x58] sm:$0xff] }
 0x1c1   :  { %v3539_v10 = vpop.eup %3538  ;;  %v2961_v42 = vadd.f32 %v2749_v35, %v1937_v24  ;;  %v2585_v0 = vadd.f32 1.0, %v3537_v31  ;;  %v4772_v48 = vpop.f32.mrf.mxu2  ;;  %3363 = vmatmul.msk.f32.gmra.mxu0 %vm1325_vm2, %v4503_v43  ;;  %v2422_v3 = vmul.f32 1.442695, %v2222_v6  ;;  %v2424_v44 = vmul.f32 1.442695, %v2223_v28 }
 0x1c2   :  { %v4774_v63 = vpop.f32.mrf.mxu3  ;;  %v3541_v51 = vpop.eup %3540  ;;  %3088 = vst [vmem:[#allocation5 + $0x150] sm:$0xff] %v2960_v5  ;;  %v2974_v52 = vadd.f32 %v2775_v36, %v1950_v55  ;;  %v2598_v8 = vadd.f32 1.0, %v3539_v10  ;;  %3379 = vmatmul.msk.f32.gmra.mxu1 %vm1325_vm2, %v4503_v43  ;;  %v2216_v57 = vsub.f32 0.0, %v2088_v62  ;;  %v2089_v22 = vand.u32 2147483647, %v4752_v20 }
 0x1c3   :  { %v3543_v49 = vpop.eup %3542  ;;  %3089 = vst [vmem:[#allocation5 + $0x158] sm:$0xff] %v2961_v42  ;;  %v2777_v11 = vmul.f32 0.6931472, %v3541_v51  ;;  %3550 = vlog2.f32 %v2585_v0  ;;  %v1945_v2 = vmax.f32 %v4707_v39, 0.0  ;;  %v2102_v53 = vand.u32 2147483647, %v4766_v33 }
 0x1c4   :  { %v3545_v15 = vpop.eup %3544  ;;  %3102 = vst [vmem:[#allocation5 + $0x1c0] sm:$0xff] %v2974_v52  ;;  %3552 = vlog2.f32 %v2598_v8  ;;  %v2599_v34 = vadd.f32 1.0, %v3543_v49  ;;  %v2410_v47 = vmul.f32 1.442695, %v2216_v57  ;;  %v2217_v26 = vsub.f32 0.0, %v2089_v22 }
 0x1c5   :  { %v3547_v9 = vpop.eup %3546  ;;  %v2975_v17 = vadd.f32 %v2777_v11, %v1951_v38  ;;  %v2592_v41 = vadd.f32 1.0, %v3545_v15  ;;  %3554 = vpow2.f32 %v2422_v3  ;;  %v1958_v39 = vmax.f32 %v4720_v19, 0.0 }
 0x1c6   :  { %v3549_v37 = vpop.eup %3548  ;;  %v2763_v60 = vmul.f32 0.6931472, %v3547_v9  ;;  %3556 = vlog2.f32 %v2599_v34  ;;  %3395 = vmatmul.msk.f32.gmra.mxu2 %vm1325_vm2, %v4503_v43  ;;  %v4789_v27 = vpop.f32.mrf.mxu0  ;;  %v2103_v14 = vand.u32 2147483647, %v4768_v30  ;;  %v1959_v61 = vmax.f32 %v4722_v32, 0.0 }
 0x1c7   :  { %3411 = vmatmul.msk.f32.gmra.mxu3 %vm1325_vm2, %v4503_v43  ;;  %3103 = vst [vmem:[#allocation5 + $0x1c8] sm:$0xff] %v2975_v17  ;;  %3558 = vlog2.f32 %v2592_v41  ;;  %v2593_v18 = vadd.f32 1.0, %v3549_v37  ;;  %v4791_v54 = vpop.f32.mrf.mxu1  ;;  %v2412_v43 = vmul.f32 1.442695, %v2217_v26  ;;  %v2230_v23 = vsub.f32 0.0, %v2102_v53 }
 0x1c8   :  { %v2968_v58 = vadd.f32 %v2763_v60, %v1944_v13  ;;  %3560 = vpow2.f32 %v2424_v44  ;;  %v2231_v46 = vsub.f32 0.0, %v2103_v14  ;;  %v2096_v19 = vand.u32 2147483647, %v4772_v48 }
 0x1c9   :  { %v3551_v59 = vpop.eup %3550  ;;  %3562 = vlog2.f32 %v2593_v18  ;;  %v4796_v24 = vpop.f32.mrf.mxu2  ;;  %3364 = vmatmul.msk.f32.gmra.mxu0 %vm1325_vm2, %v3936_v7  ;;  %v1952_v35 = vmax.f32 %v4726_v29, 0.0  ;;  %v2438_v55 = vmul.f32 1.442695, %v2230_v23  ;;  %v2097_v0 = vand.u32 2147483647, %v4774_v63  ;;  %v3937_v18 = vld [vmem:[%s5188_s2 + $0x60] sm:$0xff] }
 0x1ca   :  { %v4798_v1 = vpop.f32.mrf.mxu3  ;;  %v3553_v40 = vpop.eup %3552  ;;  %3096 = vst [vmem:[#allocation5 + $0x190] sm:$0xff] %v2968_v58  ;;  %v2765_v25 = vmul.f32 0.6931472, %v3551_v59  ;;  %3564 = vpow2.f32 %v2410_v47  ;;  %3380 = vmatmul.msk.f32.gmra.mxu1 %vm1325_vm2, %v3936_v7  ;;  %v2440_v36 = vmul.f32 1.442695, %v2231_v46  ;;  %v2224_v50 = vsub.f32 0.0, %v2096_v19 }
 0x1cb   :  { %v3555_v32 = vpop.eup %3554  ;;  %v2791_v16 = vmul.f32 0.6931472, %v3553_v40  ;;  %3566 = vpow2.f32 %v2412_v43  ;;  %v1953_v52 = vmax.f32 %v4728_v45, 0.0  ;;  %v2225_v49 = vsub.f32 0.0, %v2097_v0 }
 0x1cc   :  { %v3557_v4 = vpop.eup %3556  ;;  %v2969_v31 = vadd.f32 %v2765_v25, %v1945_v2  ;;  %v2606_v5 = vadd.f32 1.0, %v3555_v32  ;;  %3568 = vpow2.f32 %v2438_v55  ;;  %v2426_v29 = vmul.f32 1.442695, %v2224_v50 }
 0x1cd   :  { %v3559_v10 = vpop.eup %3558  ;;  %v2982_v42 = vadd.f32 %v2791_v16, %v1958_v39  ;;  %v2793_v38 = vmul.f32 0.6931472, %v3557_v4  ;;  %v2110_v45 = vand.u32 2147483647, %v4789_v27  ;;  %v1966_v57 = vmax.f32 %v4743_v21, 0.0 }
 0x1ce   :  { %v3561_v6 = vpop.eup %3560  ;;  %3097 = vst [vmem:[#allocation5 + $0x198] sm:$0xff] %v2969_v31  ;;  %v2779_v51 = vmul.f32 0.6931472, %v3559_v10  ;;  %3570 = vlog2.f32 %v2606_v5  ;;  %3396 = vmatmul.msk.f32.gmra.mxu2 %vm1325_vm2, %v3936_v7  ;;  %v4811_v11 = vpop.f32.mrf.mxu0  ;;  %v2428_v17 = vmul.f32 1.442695, %v2225_v49  ;;  %v1967_v26 = vmax.f32 %v4745_v12, 0.0 }
 0x1cf   :  { %3412 = vmatmul.msk.f32.gmra.mxu3 %vm1325_vm2, %v3936_v7  ;;  %v3563_v8 = vpop.eup %3562  ;;  %3110 = vst [vmem:[#allocation5 + $0x200] sm:$0xff] %v2982_v42  ;;  %v2983_v28 = vadd.f32 %v2793_v38, %v1959_v61  ;;  %v2607_v62 = vadd.f32 1.0, %v3561_v6  ;;  %3572 = vpow2.f32 %v2440_v36  ;;  %v4813_v13 = vpop.f32.mrf.mxu1  ;;  %v2238_v2 = vsub.f32 0.0, %v2110_v45 }
 0x1d0   :  { %v3565_v3 = vpop.eup %3564  ;;  %v2976_v15 = vadd.f32 %v2779_v51, %v1952_v35  ;;  %v2781_v34 = vmul.f32 0.6931472, %v3563_v8  ;;  %3574 = vpow2.f32 %v2426_v29  ;;  %v2111_v47 = vand.u32 2147483647, %v4791_v54  ;;  %v3938_v8 = vld [vmem:[%s5188_s2 + $0x68] sm:$0xff] }
 0x1d1   :  { %v3567_v44 = vpop.eup %3566  ;;  %3111 = vst [vmem:[#allocation5 + $0x208] sm:$0xff] %v2983_v28  ;;  %3576 = vlog2.f32 %v2607_v62  ;;  %v2600_v9 = vadd.f32 1.0, %v3565_v3  ;;  %v4817_v41 = vpop.f32.mrf.mxu2  ;;  %3365 = vmatmul.msk.f32.gmra.mxu0 %vm1325_vm2, %v3937_v18  ;;  %v1960_v53 = vmax.f32 %v4750_v56, 0.0  ;;  %v2104_v58 = vand.u32 2147483647, %v4796_v24 }
 0x1d2   :  { %v4819_v22 = vpop.f32.mrf.mxu3  ;;  %3104 = vst [vmem:[#allocation5 + $0x1d0] sm:$0xff] %v2976_v15  ;;  %v2977_v37 = vadd.f32 %v2781_v34, %v1953_v52  ;;  %v2601_v60 = vadd.f32 1.0, %v3567_v44  ;;  %3381 = vmatmul.msk.f32.gmra.mxu1 %vm1325_vm2, %v3937_v18  ;;  %v3569_v21 = vpop.eup %3568  ;;  %v2454_v59 = vmul.f32 1.442695, %v2238_v2  ;;  %v2239_v61 = vsub.f32 0.0, %v2111_v47 }
 0x1d3   :  { %3578 = vlog2.f32 %v2600_v9  ;;  %v2614_v14 = vadd.f32 1.0, %v3569_v21  ;;  %v2232_v40 = vsub.f32 0.0, %v2104_v58  ;;  %v2105_v25 = vand.u32 2147483647, %v4798_v1 }
 0x1d4   :  { %v3571_v39 = vpop.eup %3570  ;;  %3105 = vst [vmem:[#allocation5 + $0x1d8] sm:$0xff] %v2977_v37  ;;  %3580 = vlog2.f32 %v2601_v60  ;;  %v1961_v12 = vmax.f32 %v4752_v20, 0.0  ;;  %v2456_v19 = vmul.f32 1.442695, %v2239_v61  ;;  %v2118_v20 = vand.u32 2147483647, %v4811_v11 }
 0x1d5   :  { %v3573_v43 = vpop.eup %3572  ;;  %v2807_v23 = vmul.f32 0.6931472, %v3571_v39  ;;  %3582 = vpow2.f32 %v2428_v17  ;;  %v2442_v35 = vmul.f32 1.442695, %v2232_v40  ;;  %v2233_v5 = vsub.f32 0.0, %v2105_v25 }
 0x1d6   :  { %v3575_v46 = vpop.eup %3574  ;;  %3584 = vlog2.f32 %v2614_v14  ;;  %v2615_v56 = vadd.f32 1.0, %v3573_v43  ;;  %3397 = vmatmul.msk.f32.gmra.mxu2 %vm1325_vm2, %v3937_v18  ;;  %v4834_v55 = vpop.f32.mrf.mxu0  ;;  %v1974_v50 = vmax.f32 %v4766_v33, 0.0  ;;  %v1975_v10 = vmax.f32 %v4768_v30, 0.0 }
 0x1d7   :  { %3413 = vmatmul.msk.f32.gmra.mxu3 %vm1325_vm2, %v3937_v18  ;;  %v3577_v7 = vpop.eup %3576  ;;  %v2990_v32 = vadd.f32 %v2807_v23, %v1966_v57  ;;  %v2608_v16 = vadd.f32 1.0, %v3575_v46  ;;  %3586 = vpow2.f32 %v2454_v59  ;;  %v4836_v4 = vpop.f32.mrf.mxu1  ;;  %v2119_v42 = vand.u32 2147483647, %v4813_v13 }
 0x1d8   :  { %v2809_v31 = vmul.f32 0.6931472, %v3577_v7  ;;  %3588 = vlog2.f32 %v2615_v56  ;;  %v2444_v29 = vmul.f32 1.442695, %v2233_v5  ;;  %v2246_v28 = vsub.f32 0.0, %v2118_v20 }
 0x1d9   :  { %v3579_v36 = vpop.eup %3578  ;;  %3118 = vst [vmem:[#allocation5 + $0x240] sm:$0xff] %v2990_v32  ;;  %3590 = vlog2.f32 %v2608_v16  ;;  %v4842_v38 = vpop.f32.mrf.mxu2  ;;  %3366 = vmatmul.msk.f32.gmra.mxu0 %vm1325_vm2, %v3938_v8  ;;  %v2247_v62 = vsub.f32 0.0, %v2119_v42  ;;  %v2112_v34 = vand.u32 2147483647, %v4817_v41  ;;  %v1968_v60 = vmax.f32 %v4772_v48, 0.0 }
 0x1da   :  { %v4844_v0 = vpop.f32.mrf.mxu3  ;;  %v3581_v6 = vpop.eup %3580  ;;  %v2991_v51 = vadd.f32 %v2809_v31, %v1967_v26  ;;  %v2795_v52 = vmul.f32 0.6931472, %v3579_v36  ;;  %3592 = vpow2.f32 %v2456_v19  ;;  %3382 = vmatmul.msk.f32.gmra.mxu1 %vm1325_vm2, %v3938_v8  ;;  %v2470_v9 = vmul.f32 1.442695, %v2246_v28 }
 0x1db   :  { %v3583_v33 = vpop.eup %3582  ;;  %v2797_v30 = vmul.f32 0.6931472, %v3581_v6  ;;  %3594 = vpow2.f32 %v2442_v35  ;;  %v2472_v17 = vmul.f32 1.442695, %v2247_v62  ;;  %v2240_v47 = vsub.f32 0.0, %v2112_v34 }
 0x1dc   :  { %v3585_v49 = vpop.eup %3584  ;;  %3119 = vst [vmem:[#allocation5 + $0x248] sm:$0xff] %v2991_v51  ;;  %v2984_v3 = vadd.f32 %v2795_v52, %v1960_v53  ;;  %v2609_v15 = vadd.f32 1.0, %v3583_v33  ;;  %3596 = vpow2.f32 %v2444_v29  ;;  %v2113_v53 = vand.u32 2147483647, %v4819_v22 }
 0x1dd   :  { %v3587_v45 = vpop.eup %3586  ;;  %v2985_v44 = vadd.f32 %v2797_v30, %v1961_v12  ;;  %v2823_v57 = vmul.f32 0.6931472, %v3585_v49  ;;  %v1969_v59 = vmax.f32 %v4774_v63, 0.0  ;;  %v2458_v61 = vmul.f32 1.442695, %v2240_v47  ;;  %v3939_v63 = vld [vmem:[%s5188_s2 + $0x70] sm:$0xff] }
 0x1de   :  { %v3589_v37 = vpop.eup %3588  ;;  %3112 = vst [vmem:[#allocation5 + $0x210] sm:$0xff] %v2984_v3  ;;  %3598 = vlog2.f32 %v2609_v15  ;;  %v2622_v2 = vadd.f32 1.0, %v3587_v45  ;;  %3398 = vmatmul.msk.f32.gmra.mxu2 %vm1325_vm2, %v3938_v8  ;;  %v4856_v58 = vpop.f32.mrf.mxu0  ;;  %v2241_v25 = vsub.f32 0.0, %v2113_v53  ;;  %v2126_v32 = vand.u32 2147483647, %v4834_v55 }
 0x1df   :  { %3414 = vmatmul.msk.f32.gmra.mxu3 %vm1325_vm2, %v3938_v8  ;;  %v3591_v18 = vpop.eup %3590  ;;  %3113 = vst [vmem:[#allocation5 + $0x218] sm:$0xff] %v2985_v44  ;;  %v2998_v21 = vadd.f32 %v2823_v57, %v1974_v50  ;;  %v2825_v26 = vmul.f32 0.6931472, %v3589_v37  ;;  %3600 = vpow2.f32 %v2470_v9  ;;  %v4858_v39 = vpop.f32.mrf.mxu1  ;;  %v1982_v16 = vmax.f32 %v4789_v27, 0.0 }
 0x1e0   :  { %v3593_v14 = vpop.eup %3592  ;;  %v2811_v48 = vmul.f32 0.6931472, %v3591_v18  ;;  %3602 = vlog2.f32 %v2622_v2  ;;  %v2460_v31 = vmul.f32 1.442695, %v2241_v25  ;;  %v1983_v20 = vmax.f32 %v4791_v54, 0.0 }
 0x1e1   :  { %v3595_v43 = vpop.eup %3594  ;;  %3126 = vst [vmem:[#allocation5 + $0x280] sm:$0xff] %v2998_v21  ;;  %v2999_v23 = vadd.f32 %v2825_v26, %v1975_v10  ;;  %v2623_v40 = vadd.f32 1.0, %v3593_v14  ;;  %3604 = vpow2.f32 %v2472_v17  ;;  %v4861_v46 = vpop.f32.mrf.mxu2  ;;  %3367 = vmatmul.msk.f32.gmra.mxu0 %vm1325_vm2, %v3939_v63  ;;  %v2254_v36 = vsub.f32 0.0, %v2126_v32 }
 0x1e2   :  { %v4863_v12 = vpop.f32.mrf.mxu3  ;;  %v3597_v56 = vpop.eup %3596  ;;  %v2992_v19 = vadd.f32 %v2811_v48, %v1968_v60  ;;  %v2616_v7 = vadd.f32 1.0, %v3595_v43  ;;  %3606 = vpow2.f32 %v2458_v61  ;;  %3383 = vmatmul.msk.f32.gmra.mxu1 %vm1325_vm2, %v3939_v63  ;;  %v2127_v50 = vand.u32 2147483647, %v4836_v4 }
 0x1e3   :  { %3127 = vst [vmem:[#allocation5 + $0x288] sm:$0xff] %v2999_v23  ;;  %3608 = vlog2.f32 %v2623_v40  ;;  %v2617_v35 = vadd.f32 1.0, %v3597_v56  ;;  %v1976_v6 = vmax.f32 %v4796_v24, 0.0  ;;  %v2120_v51 = vand.u32 2147483647, %v4842_v38 }
 0x1e4   :  { %v3599_v5 = vpop.eup %3598  ;;  %3120 = vst [vmem:[#allocation5 + $0x250] sm:$0xff] %v2992_v19  ;;  %3610 = vlog2.f32 %v2616_v7  ;;  %v2486_v29 = vmul.f32 1.442695, %v2254_v36  ;;  %v2255_v8 = vsub.f32 0.0, %v2127_v50  ;;  %v2121_v62 = vand.u32 2147483647, %v4844_v0 }
 0x1e5   :  { %v3601_v10 = vpop.eup %3600  ;;  %v2813_v42 = vmul.f32 0.6931472, %v3599_v5  ;;  %3612 = vlog2.f32 %v2617_v35  ;;  %v2248_v28 = vsub.f32 0.0, %v2120_v51  ;;  %v1977_v15 = vmax.f32 %v4798_v1, 0.0  ;;  %v3940_v1 = vld [vmem:[%s5188_s2 + $0x78] sm:$0xff]  ;;  %s3997_s2 = smov [#allocation5]  }
 0x1e6   :  { %v3603_v52 = vpop.eup %3602  ;;  %v2630_v27 = vadd.f32 1.0, %v3601_v10  ;;  %3614 = vpow2.f32 %v2460_v31  ;;  %3399 = vmatmul.msk.f32.gmra.mxu2 %vm1325_vm2, %v3939_v63  ;;  %v4879_v49 = vpop.f32.mrf.mxu0  ;;  %v2488_v45 = vmul.f32 1.442695, %v2255_v8  ;;  %v2249_v18 = vsub.f32 0.0, %v2121_v62  ;;  %s3178_s5 = sshll.u32 %s3997_s2, 4  ;;  %s3179_s5 = int_to_ptr.vmem [resolvable:$true] %s3178_s5 }
 0x1e7   :  { %3415 = vmatmul.msk.f32.gmra.mxu3 %vm1325_vm2, %v3939_v63  ;;  %v3605_v54 = vpop.eup %3604  ;;  %v2993_v33 = vadd.f32 %v2813_v42, %v1969_v59  ;;  %v2839_v30 = vmul.f32 0.6931472, %v3603_v52  ;;  %v4881_v24 = vpop.f32.mrf.mxu1  ;;  %v2474_v17 = vmul.f32 1.442695, %v2248_v28  ;;  %v2134_v21 = vand.u32 2147483647, %v4856_v58 }
 0x1e8   :  { %v3607_v3 = vpop.eup %3606  ;;  %3616 = vlog2.f32 %v2630_v27  ;;  %v2631_v34 = vadd.f32 1.0, %v3605_v54  ;;  %v1990_v14 = vmax.f32 %v4811_v11, 0.0  ;;  %v2135_v48 = vand.u32 2147483647, %v4858_v39 }
 0x1e9   :  { %v3609_v44 = vpop.eup %3608  ;;  %3121 = vst [vmem:[#allocation5 + $0x258] sm:$0xff] %v2993_v33  ;;  %v3006_v57 = vadd.f32 %v2839_v30, %v1982_v16  ;;  %v2624_v9 = vadd.f32 1.0, %v3607_v3  ;;  %3618 = vpow2.f32 %v2486_v29  ;;  %v4884_v37 = vpop.f32.mrf.mxu2  ;;  %3368 = vmatmul.msk.f32.gmra.mxu0 %vm1325_vm2, %v3940_v1  ;;  %v2476_v23 = vmul.f32 1.442695, %v2249_v18 }
 0x1ea   :  { %v4886_v60 = vpop.f32.mrf.mxu3  ;;  %v3611_v2 = vpop.eup %3610  ;;  %v2841_v47 = vmul.f32 0.6931472, %v3609_v44  ;;  %3620 = vlog2.f32 %v2631_v34  ;;  %3384 = vmatmul.msk.f32.gmra.mxu1 %vm1325_vm2, %v3940_v1  ;;  %v2262_v56 = vsub.f32 0.0, %v2134_v21  ;;  %v1991_v32 = vmax.f32 %v4813_v13, 0.0 }
 0x1eb   :  { %v3613_v26 = vpop.eup %3612  ;;  %3134 = vst [vmem:[#allocation5 + $0x2c0] sm:$0xff] %v3006_v57  ;;  %v2827_v53 = vmul.f32 0.6931472, %v3611_v2  ;;  %3622 = vlog2.f32 %v2624_v9  ;;  %v2263_v63 = vsub.f32 0.0, %v2135_v48  ;;  %v1984_v35 = vmax.f32 %v4817_v41, 0.0 }
 0x1ec   :  { %v3615_v59 = vpop.eup %3614  ;;  %v3007_v61 = vadd.f32 %v2841_v47, %v1983_v20  ;;  %v2829_v43 = vmul.f32 0.6931472, %v3613_v26  ;;  %3624 = vpow2.f32 %v2488_v45  ;;  %v2502_v31 = vmul.f32 1.442695, %v2262_v56 }
 0x1ed   :  { %v3000_v40 = vadd.f32 %v2827_v53, %v1976_v6  ;;  %v2625_v25 = vadd.f32 1.0, %v3615_v59  ;;  %3626 = vpow2.f32 %v2474_v17  ;;  %v2504_v50 = vmul.f32 1.442695, %v2263_v63 }
 0x1ee   :  { %v3617_v19 = vpop.eup %3616  ;;  %3135 = vst [vmem:[#allocation5 + $0x2c8] sm:$0xff] %v3007_v61  ;;  %v3001_v7 = vadd.f32 %v2829_v43, %v1977_v15  ;;  %3628 = vpow2.f32 %v2476_v23  ;;  %3400 = vmatmul.msk.f32.gmra.mxu2 %vm1325_vm2, %v3940_v1  ;;  %v4900_v5 = vpop.f32.mrf.mxu0  ;;  %v2128_v10 = vand.u32 2147483647, %v4861_v46  ;;  %v2129_v52 = vand.u32 2147483647, %v4863_v12 }
 0x1ef   :  { %3416 = vmatmul.msk.f32.gmra.mxu3 %vm1325_vm2, %v3940_v1  ;;  %v3619_v11 = vpop.eup %3618  ;;  %3128 = vst [vmem:[#allocation5 + $0x290] sm:$0xff] %v3000_v40  ;;  %v2855_v16 = vmul.f32 0.6931472, %v3617_v19  ;;  %3630 = vlog2.f32 %v2625_v25  ;;  %v4902_v20 = vpop.f32.mrf.mxu1  ;;  %v1985_v54 = vmax.f32 %v4819_v22, 0.0  ;;  %v2142_v57 = vand.u32 2147483647, %v4879_v49 }
 0x1f0   :  { %v3621_v36 = vpop.eup %3620  ;;  %3129 = vst [vmem:[#allocation5 + $0x298] sm:$0xff] %v3001_v7  ;;  %v2638_v13 = vadd.f32 1.0, %v3619_v11  ;;  %3632 = vpow2.f32 %v2502_v31  ;;  %v2256_v33 = vsub.f32 0.0, %v2128_v10  ;;  %v2257_v3 = vsub.f32 0.0, %v2129_v52 }
 0x1f1   :  { %v3623_v42 = vpop.eup %3622  ;;  %v3014_v6 = vadd.f32 %v2855_v16, %v1990_v14  ;;  %v2857_v51 = vmul.f32 0.6931472, %v3621_v36  ;;  %v4906_v27 = vpop.f32.mrf.mxu2  ;;  %v1998_v17 = vmax.f32 %v4834_v55, 0.0  ;;  %v2270_v18 = vsub.f32 0.0, %v2142_v57 }
 0x1f2   :  { %v4908_v41 = vpop.f32.mrf.mxu3  ;;  %v3625_v29 = vpop.eup %3624  ;;  %v2843_v8 = vmul.f32 0.6931472, %v3623_v42  ;;  %3634 = vlog2.f32 %v2638_v13  ;;  %v2490_v44 = vmul.f32 1.442695, %v2256_v33  ;;  %v2492_v2 = vmul.f32 1.442695, %v2257_v3 }
 0x1f3   :  { %v3627_v30 = vpop.eup %3626  ;;  %3142 = vst [vmem:[#allocation5 + $0x300] sm:$0xff] %v3014_v6  ;;  %v3015_v28 = vadd.f32 %v2857_v51, %v1991_v32  ;;  %v2639_v62 = vadd.f32 1.0, %v3625_v29  ;;  %3636 = vpow2.f32 %v2504_v50  ;;  %v2143_v21 = vand.u32 2147483647, %v4881_v24 }
 0x1f4   :  { %v3629_v15 = vpop.eup %3628  ;;  %v3008_v34 = vadd.f32 %v2843_v8, %v1984_v35  ;;  %v2632_v45 = vadd.f32 1.0, %v3627_v30  ;;  %v1999_v26 = vmax.f32 %v4836_v4, 0.0  ;;  %v1992_v53 = vmax.f32 %v4842_v38, 0.0 }
 0x1f5   :  { %v3631_v9 = vpop.eup %3630  ;;  %3143 = vst [vmem:[#allocation5 + $0x308] sm:$0xff] %v3015_v28  ;;  %3638 = vlog2.f32 %v2639_v62  ;;  %v2633_v22 = vadd.f32 1.0, %v3629_v15  ;;  %v2136_v14 = vand.u32 2147483647, %v4884_v37  ;;  %v2518_v23 = vmul.f32 1.442695, %v2270_v18 }
 0x1f6   :  { %3136 = vst [vmem:[#allocation5 + $0x2d0] sm:$0xff] %v3008_v34  ;;  %v2845_v47 = vmul.f32 0.6931472, %v3631_v9  ;;  %3640 = vlog2.f32 %v2632_v45  ;;  %v3633_v1 = vpop.eup %3632  ;;  %v4917_v48 = vpop.f32.mrf.mxu0  ;;  %v2271_v56 = vsub.f32 0.0, %v2143_v21  ;;  %v1993_v7 = vmax.f32 %v4844_v0, 0.0 }
 0x1f7   :  { %3642 = vlog2.f32 %v2633_v22  ;;  %v4919_v55 = vpop.f32.mrf.mxu1  ;;  %v2646_v43 = vadd.f32 1.0, %v3633_v1  ;;  %v2264_v19 = vsub.f32 0.0, %v2136_v14  ;;  %v2137_v63 = vand.u32 2147483647, %v4886_v60 }
 0x1f8   :  { %v3635_v59 = vpop.eup %3634  ;;  %v3009_v61 = vadd.f32 %v2845_v47, %v1985_v54  ;;  %3644 = vpow2.f32 %v2490_v44  ;;  %v2520_v35 = vmul.f32 1.442695, %v2271_v56  ;;  %v2026_v10 = vand.u32 2147483647, %v4900_v5 }
 0x1f9   :  { %v3637_v40 = vpop.eup %3636  ;;  %v2871_v25 = vmul.f32 0.6931472, %v3635_v59  ;;  %3646 = vpow2.f32 %v2492_v2  ;;  %v4921_v4 = vpop.f32.mrf.mxu2  ;;  %v2506_v31 = vmul.f32 1.442695, %v2264_v19  ;;  %v2265_v50 = vsub.f32 0.0, %v2137_v63 }
 0x1fa   :  { %v4923_v38 = vpop.f32.mrf.mxu3  ;;  %3137 = vst [vmem:[#allocation5 + $0x2d8] sm:$0xff] %v3009_v61  ;;  %3648 = vlog2.f32 %v2646_v43  ;;  %v2647_v32 = vadd.f32 1.0, %v3637_v40  ;;  %v2006_v0 = vmax.f32 %v4856_v58, 0.0  ;;  %v2027_v51 = vand.u32 2147483647, %v4902_v20 }
 0x1fb   :  { %v3639_v11 = vpop.eup %3638  ;;  %v3022_v16 = vadd.f32 %v2871_v25, %v1998_v17  ;;  %3650 = vpow2.f32 %v2518_v23  ;;  %v2508_v54 = vmul.f32 1.442695, %v2265_v50  ;;  %v2154_v62 = vsub.f32 0.0, %v2026_v10 }
 0x1fc   :  { %v3641_v36 = vpop.eup %3640  ;;  %v2873_v13 = vmul.f32 0.6931472, %v3639_v11  ;;  %3652 = vlog2.f32 %v2647_v32  ;;  %v2155_v3 = vsub.f32 0.0, %v2027_v51  ;;  %v2007_v58 = vmax.f32 %v4858_v39, 0.0 }
 0x1fd   :  { %v3643_v42 = vpop.eup %3642  ;;  %3150 = vst [vmem:[#allocation5 + $0x340] sm:$0xff] %v3022_v16  ;;  %v2859_v6 = vmul.f32 0.6931472, %v3641_v36  ;;  %3654 = vpow2.f32 %v2520_v35  ;;  %v2000_v22 = vmax.f32 %v4861_v46, 0.0  ;;  %v2286_v2 = vmul.f32 1.442695, %v2154_v62 }
 0x1fe   :  { %v3645_v52 = vpop.eup %3644  ;;  %v3023_v29 = vadd.f32 %v2873_v13, %v1999_v26  ;;  %v2861_v8 = vmul.f32 0.6931472, %v3643_v42  ;;  %3656 = vpow2.f32 %v2506_v31  ;;  %v4930_v15 = vpop.f32.mrf.mxu0  ;;  %v2288_v39 = vmul.f32 1.442695, %v2155_v3 }
 0x1ff   :  { %v3647_v33 = vpop.eup %3646  ;;  %v3016_v30 = vadd.f32 %v2859_v6, %v1992_v53  ;;  %v2640_v28 = vadd.f32 1.0, %v3645_v52  ;;  %3658 = vpow2.f32 %v2508_v54  ;;  %v4933_v57 = vpop.f32.mrf.mxu1  ;;  %v2144_v26 = vand.u32 2147483647, %v4906_v27 }
 0x200   :  { %v3649_v34 = vpop.eup %3648  ;;  %3151 = vst [vmem:[#allocation5 + $0x348] sm:$0xff] %v3023_v29  ;;  %v3017_v45 = vadd.f32 %v2861_v8, %v1993_v7  ;;  %v2641_v44 = vadd.f32 1.0, %v3647_v33  ;;  %v2145_v61 = vand.u32 2147483647, %v4908_v41  ;;  %v2001_v43 = vmax.f32 %v4863_v12, 0.0 }
 0x201   :  { %v3651_v9 = vpop.eup %3650  ;;  %3144 = vst [vmem:[#allocation5 + $0x310] sm:$0xff] %v3016_v30  ;;  %v2887_v17 = vmul.f32 0.6931472, %v3649_v34  ;;  %3660 = vlog2.f32 %v2640_v28  ;;  %v4936_v47 = vpop.f32.mrf.mxu2  ;;  %v2272_v40 = vsub.f32 0.0, %v2144_v26  ;;  %v2014_v32 = vmax.f32 %v4879_v49, 0.0 }
 0x202   :  { %v4938_v18 = vpop.f32.mrf.mxu3  ;;  %v3653_v21 = vpop.eup %3652  ;;  %3145 = vst [vmem:[#allocation5 + $0x318] sm:$0xff] %v3017_v45  ;;  %3662 = vlog2.f32 %v2641_v44  ;;  %v2654_v1 = vadd.f32 1.0, %v3651_v9  ;;  %v2273_v19 = vsub.f32 0.0, %v2145_v61  ;;  %v2034_v11 = vand.u32 2147483647, %v4917_v48 }
 0x203   :  { %v3655_v53 = vpop.eup %3654  ;;  %v3030_v14 = vadd.f32 %v2887_v17, %v2006_v0  ;;  %v2889_v59 = vmul.f32 0.6931472, %v3653_v21  ;;  %3664 = vpow2.f32 %v2286_v2  ;;  %v2522_v63 = vmul.f32 1.442695, %v2272_v40 }
 0x204   :  { %v3657_v46 = vpop.eup %3656  ;;  %3666 = vlog2.f32 %v2654_v1  ;;  %v2655_v23 = vadd.f32 1.0, %v3655_v53  ;;  %v2524_v12 = vmul.f32 1.442695, %v2273_v19  ;;  %v2035_v31 = vand.u32 2147483647, %v4919_v55 }
 0x205   :  { %3158 = vst [vmem:[#allocation5 + $0x380] sm:$0xff] %v3030_v14  ;;  %v3031_v25 = vadd.f32 %v2889_v59, %v2007_v58  ;;  %v2648_v56 = vadd.f32 1.0, %v3657_v46  ;;  %3668 = vpow2.f32 %v2288_v39  ;;  %v3659_v7 = vpop.eup %3658  ;;  %v2015_v50 = vmax.f32 %v4881_v24, 0.0 }
 0x206   :  { %3670 = vlog2.f32 %v2655_v23  ;;  %v2649_v35 = vadd.f32 1.0, %v3659_v7  ;;  %v2162_v10 = vsub.f32 0.0, %v2034_v11  ;;  %v4947_v42 = vpop.f32.mrf.mxu0  ;;  %v2163_v0 = vsub.f32 0.0, %v2035_v31 }
 0x207   :  { %v3661_v16 = vpop.eup %3660  ;;  %3159 = vst [vmem:[#allocation5 + $0x388] sm:$0xff] %v3031_v25  ;;  %3672 = vlog2.f32 %v2648_v56  ;;  %v2028_v51 = vand.u32 2147483647, %v4921_v4  ;;  %v4954_v24 = vpop.f32.mrf.mxu1  ;;  %v2008_v44 = vmax.f32 %v4884_v37, 0.0  ;;  %v2029_v17 = vand.u32 2147483647, %v4923_v38 }
 0x208   :  { %v3663_v36 = vpop.eup %3662  ;;  %v2875_v13 = vmul.f32 0.6931472, %v3661_v16  ;;  %3674 = vpow2.f32 %v2522_v63  ;;  %v2302_v30 = vmul.f32 1.442695, %v2162_v10  ;;  %v2304_v34 = vmul.f32 1.442695, %v2163_v0 }
 0x209   :  { %v3665_v49 = vpop.eup %3664  ;;  %v2877_v6 = vmul.f32 0.6931472, %v3663_v36  ;;  %3676 = vlog2.f32 %v2649_v35  ;;  %v4950_v52 = vpop.f32.mrf.mxu2  ;;  %v2156_v45 = vsub.f32 0.0, %v2028_v51  ;;  %v2009_v53 = vmax.f32 %v4886_v60, 0.0 }
 0x20a   :  { %v4952_v29 = vpop.f32.mrf.mxu3  ;;  %v3667_v8 = vpop.eup %3666  ;;  %v3024_v54 = vadd.f32 %v2875_v13, %v2000_v22  ;;  %v2538_v33 = vadd.f32 1.0, %v3665_v49  ;;  %3678 = vpow2.f32 %v2524_v12  ;;  %v2157_v14 = vsub.f32 0.0, %v2029_v17 }
 0x20b   :  { %v3669_v28 = vpop.eup %3668  ;;  %v3025_v62 = vadd.f32 %v2877_v6, %v2001_v43  ;;  %v2903_v3 = vmul.f32 0.6931472, %v3667_v8  ;;  %v2290_v1 = vmul.f32 1.442695, %v2156_v45  ;;  %v2042_v46 = vand.u32 2147483647, %v4930_v15 }
 0x20c   :  { %v3671_v58 = vpop.eup %3670  ;;  %3152 = vst [vmem:[#allocation5 + $0x350] sm:$0xff] %v3024_v54  ;;  %3680 = vlog2.f32 %v2538_v33  ;;  %v2539_v9 = vadd.f32 1.0, %v3669_v28  ;;  %v2292_v25 = vmul.f32 1.442695, %v2157_v14  ;;  %v1898_v56 = vmax.f32 %v4900_v5, 0.0 }
 0x20d   :  { %v3673_v2 = vpop.eup %3672  ;;  %3153 = vst [vmem:[#allocation5 + $0x358] sm:$0xff] %v3025_v62  ;;  %v3038_v22 = vadd.f32 %v2903_v3, %v2014_v32  ;;  %v2905_v21 = vmul.f32 0.6931472, %v3671_v58  ;;  %3682 = vpow2.f32 %v2302_v30  ;;  %v2170_v60 = vsub.f32 0.0, %v2042_v46 }
 0x20e   :  { %v3675_v39 = vpop.eup %3674  ;;  %v2891_v26 = vmul.f32 0.6931472, %v3673_v2  ;;  %3684 = vlog2.f32 %v2539_v9  ;;  %v1899_v11 = vmax.f32 %v4902_v20, 0.0  ;;  %v2043_v16 = vand.u32 2147483647, %v4933_v57  ;;  %v4968_v13 = vpop.f32.mrf.mxu0 }
 0x20f   :  { %v3677_v59 = vpop.eup %3676  ;;  %3166 = vst [vmem:[#allocation5 + $0x3c0] sm:$0xff] %v3038_v22  ;;  %v3039_v61 = vadd.f32 %v2905_v21, %v2015_v50  ;;  %v2656_v37 = vadd.f32 1.0, %v3675_v39  ;;  %3686 = vpow2.f32 %v2304_v34  ;;  %v2318_v36 = vmul.f32 1.442695, %v2170_v60  ;;  %v4972_v0 = vpop.f32.mrf.mxu1 }
 0x210   :  { %v3679_v43 = vpop.eup %3678  ;;  %v3032_v23 = vadd.f32 %v2891_v26, %v2008_v44  ;;  %v2893_v40 = vmul.f32 0.6931472, %v3677_v59  ;;  %3688 = vpow2.f32 %v2290_v1  ;;  %v2036_v5 = vand.u32 2147483647, %v4936_v47 }
 0x211   :  { %3167 = vst [vmem:[#allocation5 + $0x3c8] sm:$0xff] %v3039_v61  ;;  %3690 = vlog2.f32 %v2656_v37  ;;  %v2657_v19 = vadd.f32 1.0, %v3679_v43  ;;  %v4961_v7 = vpop.f32.mrf.mxu2  ;;  %v2016_v10 = vmax.f32 %v4906_v27, 0.0  ;;  %v2171_v6 = vsub.f32 0.0, %v2043_v16 }
 0x212   :  { %v3681_v32 = vpop.eup %3680  ;;  %3160 = vst [vmem:[#allocation5 + $0x390] sm:$0xff] %v3032_v23  ;;  %v3033_v63 = vadd.f32 %v2893_v40, %v2009_v53  ;;  %3692 = vpow2.f32 %v2292_v25  ;;  %v4965_v35 = vpop.f32.mrf.mxu3  ;;  %v2037_v20 = vand.u32 2147483647, %v4938_v18  ;;  %v2164_v33 = vsub.f32 0.0, %v2036_v5 }
 0x213   :  { %v3683_v12 = vpop.eup %3682  ;;  %v2671_v31 = vmul.f32 0.6931472, %v3681_v32  ;;  %3694 = vlog2.f32 %v2657_v19  ;;  %v2320_v62 = vmul.f32 1.442695, %v2171_v6  ;;  %v2017_v27 = vmax.f32 %v4908_v41, 0.0 }
 0x214   :  { %v3685_v50 = vpop.eup %3684  ;;  %3161 = vst [vmem:[#allocation5 + $0x398] sm:$0xff] %v3033_v63  ;;  %v2546_v49 = vadd.f32 1.0, %v3683_v12  ;;  %3696 = vpow2.f32 %v2318_v36  ;;  %v2165_v3 = vsub.f32 0.0, %v2037_v20  ;;  %v1906_v58 = vmax.f32 %v4917_v48, 0.0 }
 0x215   :  { %v3687_v51 = vpop.eup %3686  ;;  %v2922_v8 = vadd.f32 %v2671_v31, %v1898_v56  ;;  %v2673_v54 = vmul.f32 0.6931472, %v3685_v50  ;;  %v2306_v2 = vmul.f32 1.442695, %v2164_v33  ;;  %v2050_v22 = vand.u32 2147483647, %v4947_v42 }
 0x216   :  { %v3689_v30 = vpop.eup %3688  ;;  %3698 = vlog2.f32 %v2546_v49  ;;  %v2547_v28 = vadd.f32 1.0, %v3687_v51  ;;  %v2308_v39 = vmul.f32 1.442695, %v2165_v3  ;;  %v2051_v26 = vand.u32 2147483647, %v4954_v24  ;;  %v4984_v63 = vpop.f32.mrf.mxu0 }
 0x217   :  { %v3691_v34 = vpop.eup %3690  ;;  %3050 = vst [vmem:[#allocation5 + $0x20] sm:$0xff] %v2922_v8  ;;  %v2923_v45 = vadd.f32 %v2673_v54, %v1899_v11  ;;  %v2540_v44 = vadd.f32 1.0, %v3689_v30  ;;  %v2178_v41 = vsub.f32 0.0, %v2050_v22  ;;  %v1907_v48 = vmax.f32 %v4919_v55, 0.0  ;;  %v4989_v31 = vpop.f32.mrf.mxu1 }
 0x218   :  { %v3693_v9 = vpop.eup %3692  ;;  %v2907_v17 = vmul.f32 0.6931472, %v3691_v34  ;;  %3700 = vlog2.f32 %v2547_v28  ;;  %v2179_v61 = vsub.f32 0.0, %v2051_v26  ;;  %v2044_v37 = vand.u32 2147483647, %v4950_v52 }
 0x219   :  { %v3695_v21 = vpop.eup %3694  ;;  %3051 = vst [vmem:[#allocation5 + $0x28] sm:$0xff] %v2923_v45  ;;  %3702 = vlog2.f32 %v2540_v44  ;;  %v2541_v1 = vadd.f32 1.0, %v3693_v9  ;;  %v4980_v46 = vpop.f32.mrf.mxu2  ;;  %v2334_v25 = vmul.f32 1.442695, %v2178_v41  ;;  %v1900_v11 = vmax.f32 %v4921_v4, 0.0 }
 0x21a   :  { %v3040_v53 = vadd.f32 %v2907_v17, %v2016_v10  ;;  %v2909_v14 = vmul.f32 0.6931472, %v3695_v21  ;;  %3704 = vpow2.f32 %v2320_v62  ;;  %v3697_v59 = vpop.eup %3696  ;;  %v4982_v56 = vpop.f32.mrf.mxu3  ;;  %v2336_v60 = vmul.f32 1.442695, %v2179_v61 }
 0x21b   :  { %3706 = vlog2.f32 %v2541_v1  ;;  %v2554_v40 = vadd.f32 1.0, %v3697_v59  ;;  %v2172_v32 = vsub.f32 0.0, %v2044_v37  ;;  %v1901_v16 = vmax.f32 %v4923_v38, 0.0 }
 0x21c   :  { %v3699_v43 = vpop.eup %3698  ;;  %3168 = vst [vmem:[#allocation5 + $0x3d0] sm:$0xff] %v3040_v53  ;;  %v3041_v23 = vadd.f32 %v2909_v14, %v2017_v27  ;;  %3708 = vpow2.f32 %v2306_v2  ;;  %v2045_v12 = vand.u32 2147483647, %v4952_v29  ;;  %v2058_v51 = vand.u32 2147483647, %v4968_v13 }
 0x21d   :  { %v2687_v19 = vmul.f32 0.6931472, %v3699_v43  ;;  %3710 = vpow2.f32 %v2308_v39  ;;  %v2322_v10 = vmul.f32 1.442695, %v2172_v32  ;;  %v1914_v38 = vmax.f32 %v4930_v15, 0.0 }
 0x21e   :  { %v3701_v55 = vpop.eup %3700  ;;  %3169 = vst [vmem:[#allocation5 + $0x3d8] sm:$0xff] %v3041_v23  ;;  %3712 = vlog2.f32 %v2554_v40  ;;  %v2173_v20 = vsub.f32 0.0, %v2045_v12  ;;  %v2186_v3 = vsub.f32 0.0, %v2058_v51  ;;  %v1915_v45 = vmax.f32 %v4933_v57, 0.0  ;;  %v5002_v43 = vpop.f32.mrf.mxu0 }
 0x21f   :  { %v3703_v36 = vpop.eup %3702  ;;  %v2930_v5 = vadd.f32 %v2687_v19, %v1906_v58  ;;  %v2689_v50 = vmul.f32 0.6931472, %v3701_v55  ;;  %3714 = vpow2.f32 %v2334_v25  ;;  %v2059_v58 = vand.u32 2147483647, %v4972_v0  ;;  %v5004_v19 = vpop.f32.mrf.mxu1 }
 0x220   :  { %v3705_v49 = vpop.eup %3704  ;;  %v2675_v6 = vmul.f32 0.6931472, %v3703_v36  ;;  %3716 = vpow2.f32 %v2336_v60  ;;  %v2324_v62 = vmul.f32 1.442695, %v2173_v20  ;;  %v2350_v15 = vmul.f32 1.442695, %v2186_v3 }
 0x221   :  { %v3707_v8 = vpop.eup %3706  ;;  %3058 = vst [vmem:[#allocation5 + $0x60] sm:$0xff] %v2930_v5  ;;  %v2931_v4 = vadd.f32 %v2689_v50, %v1907_v48  ;;  %v2555_v54 = vadd.f32 1.0, %v3705_v49  ;;  %3718 = vpow2.f32 %v2322_v10  ;;  %v2187_v21 = vsub.f32 0.0, %v2059_v58  ;;  %v4996_v39 = vpop.f32.mrf.mxu2 }
 0x222   :  { %v3709_v33 = vpop.eup %3708  ;;  %v2924_v30 = vadd.f32 %v2675_v6, %v1900_v11  ;;  %v2677_v28 = vmul.f32 0.6931472, %v3707_v8  ;;  %v2052_v1 = vand.u32 2147483647, %v4961_v7  ;;  %v1908_v57 = vmax.f32 %v4936_v47, 0.0  ;;  %v5000_v41 = vpop.f32.mrf.mxu3 }
 0x223   :  { %v3711_v34 = vpop.eup %3710  ;;  %3059 = vst [vmem:[#allocation5 + $0x68] sm:$0xff] %v2931_v4  ;;  %3720 = vlog2.f32 %v2555_v54  ;;  %v2548_v27 = vadd.f32 1.0, %v3709_v33  ;;  %v2053_v14 = vand.u32 2147483647, %v4965_v35  ;;  %v2352_v37 = vmul.f32 1.442695, %v2187_v21 }
 0x224   :  { %v3713_v44 = vpop.eup %3712  ;;  %3052 = vst [vmem:[#allocation5 + $0x30] sm:$0xff] %v2924_v30  ;;  %v2925_v9 = vadd.f32 %v2677_v28, %v1901_v16  ;;  %v2549_v17 = vadd.f32 1.0, %v3711_v34  ;;  %3722 = vpow2.f32 %v2324_v62  ;;  %v2180_v40 = vsub.f32 0.0, %v2052_v1 }
 0x225   :  { %v3715_v2 = vpop.eup %3714  ;;  %v2703_v22 = vmul.f32 0.6931472, %v3713_v44  ;;  %3724 = vlog2.f32 %v2548_v27  ;;  %v2181_v25 = vsub.f32 0.0, %v2053_v14  ;;  %v1909_v60 = vmax.f32 %v4938_v18, 0.0 }
 0x226   :  { %v3717_v26 = vpop.eup %3716  ;;  %3053 = vst [vmem:[#allocation5 + $0x38] sm:$0xff] %v2925_v9  ;;  %3726 = vlog2.f32 %v2549_v17  ;;  %v2562_v53 = vadd.f32 1.0, %v3715_v2  ;;  %v1922_v32 = vmax.f32 %v4947_v42, 0.0  ;;  %v2066_v55 = vand.u32 2147483647, %v4984_v63  ;;  %v5018_v1 = vpop.f32.mrf.mxu0 }
 0x227   :  { %v3719_v59 = vpop.eup %3718  ;;  %v2938_v48 = vadd.f32 %v2703_v22, %v1914_v38  ;;  %v2563_v61 = vadd.f32 1.0, %v3717_v26  ;;  %3728 = vpow2.f32 %v2350_v15  ;;  %v2338_v12 = vmul.f32 1.442695, %v2180_v40 }
 0x228   :  { %3730 = vlog2.f32 %v2562_v53  ;;  %v2556_v23 = vadd.f32 1.0, %v3719_v59  ;;  %v2340_v36 = vmul.f32 1.442695, %v2181_v25  ;;  %v2194_v10 = vsub.f32 0.0, %v2066_v55 }
 0x229   :  { %v3721_v47 = vpop.eup %3720  ;;  %3066 = vst [vmem:[#allocation5 + $0xa0] sm:$0xff] %v2938_v48  ;;  %3732 = vlog2.f32 %v2563_v61  ;;  %v2067_v49 = vand.u32 2147483647, %v4989_v31  ;;  %v1923_v18 = vmax.f32 %v4954_v24, 0.0  ;;  %v2060_v28 = vand.u32 2147483647, %v4980_v46  ;;  %v5012_v27 = vpop.f32.mrf.mxu2 }
 0x22a   :  { %v3723_v11 = vpop.eup %3722  ;;  %v2705_v16 = vmul.f32 0.6931472, %v3721_v47  ;;  %3734 = vlog2.f32 %v2556_v23  ;;  %v2366_v4 = vmul.f32 1.442695, %v2194_v10  ;;  %v1916_v44 = vmax.f32 %v4950_v52, 0.0  ;;  %v5015_v17 = vpop.f32.mrf.mxu3 }
 0x22b   :  { %v3725_v5 = vpop.eup %3724  ;;  %v2557_v50 = vadd.f32 1.0, %v3723_v11  ;;  %3736 = vpow2.f32 %v2352_v37  ;;  %v2195_v38 = vsub.f32 0.0, %v2067_v49  ;;  %v2188_v9 = vsub.f32 0.0, %v2060_v28  ;;  %v5021_v52 = vpop.f32.mrf.mxu1 }
 0x22c   :  { %v3727_v6 = vpop.eup %3726  ;;  %v2939_v20 = vadd.f32 %v2705_v16, %v1915_v45  ;;  %v2691_v51 = vmul.f32 0.6931472, %v3725_v5  ;;  %3738 = vpow2.f32 %v2338_v12  ;;  %v2061_v21 = vand.u32 2147483647, %v4982_v56 }
 0x22d   :  { %v3729_v42 = vpop.eup %3728  ;;  %v2693_v8 = vmul.f32 0.6931472, %v3727_v6  ;;  %3740 = vlog2.f32 %v2557_v50  ;;  %v2368_v45 = vmul.f32 1.442695, %v2195_v38  ;;  %v1917_v53 = vmax.f32 %v4952_v29, 0.0 }
 0x22e   :  { %v3731_v54 = vpop.eup %3730  ;;  %3067 = vst [vmem:[#allocation5 + $0xa8] sm:$0xff] %v2939_v20  ;;  %v2932_v33 = vadd.f32 %v2691_v51, %v1908_v57  ;;  %v2570_v30 = vadd.f32 1.0, %v3729_v42  ;;  %3742 = vpow2.f32 %v2340_v36  ;;  %v2354_v59 = vmul.f32 1.442695, %v2188_v9 }
 0x22f   :  { %v3733_v62 = vpop.eup %3732  ;;  %v2933_v3 = vadd.f32 %v2693_v8, %v1909_v60  ;;  %v2719_v34 = vmul.f32 0.6931472, %v3731_v54  ;;  %3744 = vpow2.f32 %v2366_v4  ;;  %v2189_v23 = vsub.f32 0.0, %v2061_v21 }
 0x230   :  { %v3735_v24 = vpop.eup %3734  ;;  %3060 = vst [vmem:[#allocation5 + $0x70] sm:$0xff] %v2932_v33  ;;  %v2721_v58 = vmul.f32 0.6931472, %v3733_v62  ;;  %3746 = vlog2.f32 %v2570_v30  ;;  %v2074_v40 = vand.u32 2147483647, %v5002_v43  ;;  %v1930_v60 = vmax.f32 %v4968_v13, 0.0 }
 0x231   :  { %v3737_v15 = vpop.eup %3736  ;;  %3061 = vst [vmem:[#allocation5 + $0x78] sm:$0xff] %v2933_v3  ;;  %v2946_v2 = vadd.f32 %v2719_v34, %v1922_v32  ;;  %v2707_v22 = vmul.f32 0.6931472, %v3735_v24  ;;  %3748 = vpow2.f32 %v2368_v45  ;;  %v2075_v32 = vand.u32 2147483647, %v5004_v19  ;;  %v5030_v38 = vpop.f32.mrf.mxu2 }
 0x232   :  { %v3739_v26 = vpop.eup %3738  ;;  %v2947_v57 = vadd.f32 %v2721_v58, %v1923_v18  ;;  %v2571_v14 = vadd.f32 1.0, %v3737_v15  ;;  %v2356_v11 = vmul.f32 1.442695, %v2189_v23  ;;  %v2202_v16 = vsub.f32 0.0, %v2074_v40  ;;  %v5034_v28 = vpop.f32.mrf.mxu3 }
 0x233   :  { %v3741_v48 = vpop.eup %3740  ;;  %3074 = vst [vmem:[#allocation5 + $0xe0] sm:$0xff] %v2946_v2  ;;  %v2940_v61 = vadd.f32 %v2707_v22, %v1916_v44  ;;  %v2564_v37 = vadd.f32 1.0, %v3739_v26  ;;  %v2203_v50 = vsub.f32 0.0, %v2075_v32  ;;  %v1931_v6 = vmax.f32 %v4972_v0, 0.0  ;;  %v5037_v45 = vpop.f32.mrf.mxu0 }
 0x234   :  { %v3743_v25 = vpop.eup %3742  ;;  %3075 = vst [vmem:[#allocation5 + $0xe8] sm:$0xff] %v2947_v57  ;;  %v2709_v47 = vmul.f32 0.6931472, %v3741_v48  ;;  %3750 = vlog2.f32 %v2571_v14  ;;  %v2382_v13 = vmul.f32 1.442695, %v2202_v16  ;;  %v1924_v8 = vmax.f32 %v4961_v7, 0.0  ;;  %v5039_v9 = vpop.f32.mrf.mxu1 }
 0x235   :  { %v3745_v29 = vpop.eup %3744  ;;  %3068 = vst [vmem:[#allocation5 + $0xb0] sm:$0xff] %v2940_v61  ;;  %3752 = vlog2.f32 %v2564_v37  ;;  %v2565_v55 = vadd.f32 1.0, %v3743_v25  ;;  %v2384_v51 = vmul.f32 1.442695, %v2203_v50  ;;  %v2068_v18 = vand.u32 2147483647, %v4996_v39 }
 0x236   :  { %v3747_v12 = vpop.eup %3746  ;;  %v2941_v36 = vadd.f32 %v2709_v47, %v1917_v53  ;;  %v2578_v5 = vadd.f32 1.0, %v3745_v29  ;;  %3754 = vpow2.f32 %v2354_v59  ;;  %v2069_v4 = vand.u32 2147483647, %v5000_v41 }
 0x237   :  { %v3749_v10 = vpop.eup %3748  ;;  %v2735_v49 = vmul.f32 0.6931472, %v3747_v12  ;;  %3756 = vlog2.f32 %v2565_v55  ;;  %v1925_v33 = vmax.f32 %v4965_v35, 0.0  ;;  %v2196_v0 = vsub.f32 0.0, %v2068_v18 }
 0x238   :  { %3069 = vst [vmem:[#allocation5 + $0xb8] sm:$0xff] %v2941_v36  ;;  %3758 = vlog2.f32 %v2578_v5  ;;  %v2579_v20 = vadd.f32 1.0, %v3749_v10  ;;  %v2082_v30 = vand.u32 2147483647, %v5018_v1  ;;  %v1938_v34 = vmax.f32 %v4984_v63, 0.0 }
 0x239   :  { %v2954_v42 = vadd.f32 %v2735_v49, %v1930_v60  ;;  %3760 = vpow2.f32 %v2356_v11  ;;  %v2197_v7 = vsub.f32 0.0, %v2069_v4  ;;  %v2370_v44 = vmul.f32 1.442695, %v2196_v0  ;;  %v5046_v10 = vpop.f32.mrf.mxu2 }
 0x23a   :  { %v3751_v54 = vpop.eup %3750  ;;  %3762 = vlog2.f32 %v2579_v20  ;;  %v2210_v35 = vsub.f32 0.0, %v2082_v30  ;;  %v2083_v26 = vand.u32 2147483647, %v5021_v52  ;;  %v1939_v61 = vmax.f32 %v4989_v31, 0.0 }
 0x23b   :  { %v3753_v62 = vpop.eup %3752  ;;  %3082 = vst [vmem:[#allocation5 + $0x120] sm:$0xff] %v2954_v42  ;;  %v2737_v3 = vmul.f32 0.6931472, %v3751_v54  ;;  %3764 = vpow2.f32 %v2382_v13  ;;  %v2372_v21 = vmul.f32 1.442695, %v2197_v7  ;;  %v1932_v16 = vmax.f32 %v4980_v46, 0.0  ;;  %v5053_v4 = vpop.f32.mrf.mxu0 }
 0x23c   :  { %v3755_v24 = vpop.eup %3754  ;;  %v2723_v58 = vmul.f32 0.6931472, %v3753_v62  ;;  %3766 = vpow2.f32 %v2384_v51  ;;  %v2398_v14 = vmul.f32 1.442695, %v2210_v35  ;;  %v2211_v37 = vsub.f32 0.0, %v2083_v26  ;;  %v5050_v51 = vpop.f32.mrf.mxu3 }
 0x23d   :  { %v3757_v15 = vpop.eup %3756  ;;  %v2955_v2 = vadd.f32 %v2737_v3, %v1931_v6  ;;  %v2572_v22 = vadd.f32 1.0, %v3755_v24  ;;  %3768 = vpow2.f32 %v2370_v44  ;;  %v2076_v47 = vand.u32 2147483647, %v5012_v27  ;;  %v5056_v30 = vpop.f32.mrf.mxu1 }
 0x23e   :  { %v3759_v57 = vpop.eup %3758  ;;  %v2948_v53 = vadd.f32 %v2723_v58, %v1924_v8  ;;  %v2725_v63 = vmul.f32 0.6931472, %v3757_v15  ;;  %v2400_v55 = vmul.f32 1.442695, %v2211_v37  ;;  %v2077_v50 = vand.u32 2147483647, %v5015_v17 }
 0x23f   :  { %v3761_v59 = vpop.eup %3760  ;;  %3083 = vst [vmem:[#allocation5 + $0x128] sm:$0xff] %v2955_v2  ;;  %v2751_v48 = vmul.f32 0.6931472, %v3759_v57  ;;  %3770 = vlog2.f32 %v2572_v22  ;;  %v2204_v12 = vsub.f32 0.0, %v2076_v47  ;;  %v1933_v6 = vmax.f32 %v4982_v56, 0.0 }
 0x240   :  { %v3763_v23 = vpop.eup %3762  ;;  %3076 = vst [vmem:[#allocation5 + $0xf0] sm:$0xff] %v2948_v53  ;;  %v2949_v40 = vadd.f32 %v2725_v63, %v1925_v33  ;;  %v2573_v25 = vadd.f32 1.0, %v3761_v59  ;;  %3772 = vpow2.f32 %v2372_v21  ;;  %v2090_v20 = vand.u32 2147483647, %v5037_v45 }
 0x241   :  { %v3765_v60 = vpop.eup %3764  ;;  %v2962_v32 = vadd.f32 %v2751_v48, %v1938_v34  ;;  %v2753_v29 = vmul.f32 0.6931472, %v3763_v23  ;;  %3774 = vpow2.f32 %v2398_v14  ;;  %v2386_v13 = vmul.f32 1.442695, %v2204_v12 }
 0x242   :  { %v3767_v11 = vpop.eup %3766  ;;  %3077 = vst [vmem:[#allocation5 + $0xf8] sm:$0xff] %v2949_v40  ;;  %3776 = vlog2.f32 %v2573_v25  ;;  %v2586_v31 = vadd.f32 1.0, %v3765_v60  ;;  %v1946_v18 = vmax.f32 %v5002_v43, 0.0  ;;  %v2205_v8 = vsub.f32 0.0, %v2077_v50 }
 0x243   :  { %3090 = vst [vmem:[#allocation5 + $0x160] sm:$0xff] %v2962_v32  ;;  %v2963_v36 = vadd.f32 %v2753_v29, %v1939_v61  ;;  %v2587_v5 = vadd.f32 1.0, %v3767_v11  ;;  %3778 = vpow2.f32 %v2400_v55  ;;  %v3769_v49 = vpop.eup %3768  ;;  %v2218_v0 = vsub.f32 0.0, %v2090_v20  ;;  %v5063_v32 = vpop.f32.mrf.mxu2 }
 0x244   :  { %3780 = vlog2.f32 %v2586_v31  ;;  %v2580_v42 = vadd.f32 1.0, %v3769_v49  ;;  %v2091_v56 = vand.u32 2147483647, %v5039_v9  ;;  %v1947_v3 = vmax.f32 %v5004_v19, 0.0 }
 0x245   :  { %v3771_v46 = vpop.eup %3770  ;;  %3091 = vst [vmem:[#allocation5 + $0x168] sm:$0xff] %v2963_v36  ;;  %3782 = vlog2.f32 %v2587_v5  ;;  %v2388_v7 = vmul.f32 1.442695, %v2205_v8  ;;  %v1940_v58 = vmax.f32 %v4996_v39, 0.0  ;;  %v2414_v22 = vmul.f32 1.442695, %v2218_v0  ;;  %v5070_v5 = vpop.f32.mrf.mxu0 }
 0x246   :  { %v3773_v54 = vpop.eup %3772  ;;  %v2739_v33 = vmul.f32 0.6931472, %v3771_v46  ;;  %3784 = vpow2.f32 %v2386_v13  ;;  %v2219_v35 = vsub.f32 0.0, %v2091_v56  ;;  %v2084_v21 = vand.u32 2147483647, %v5030_v38  ;;  %v5073_v20 = vpop.f32.mrf.mxu1 }
 0x247   :  { %v3775_v62 = vpop.eup %3774  ;;  %3786 = vlog2.f32 %v2580_v42  ;;  %v2581_v34 = vadd.f32 1.0, %v3773_v54  ;;  %v2085_v53 = vand.u32 2147483647, %v5034_v28  ;;  %v1941_v37 = vmax.f32 %v5000_v41, 0.0 }
 0x248   :  { %v3777_v43 = vpop.eup %3776  ;;  %v2956_v24 = vadd.f32 %v2739_v33, %v1932_v16  ;;  %v2594_v44 = vadd.f32 1.0, %v3775_v62  ;;  %v2416_v19 = vmul.f32 1.442695, %v2219_v35  ;;  %v2212_v39 = vsub.f32 0.0, %v2084_v21  ;;  %v5065_v16 = vpop.f32.mrf.mxu3 }
 0x249   :  { %v3779_v15 = vpop.eup %3778  ;;  %v2741_v2 = vmul.f32 0.6931472, %v3777_v43  ;;  %3788 = vlog2.f32 %v2581_v34  ;;  %v2213_v23 = vsub.f32 0.0, %v2085_v53  ;;  %v1954_v41 = vmax.f32 %v5018_v1, 0.0 }
 0x24a   :  { %v3781_v26 = vpop.eup %3780  ;;  %3084 = vst [vmem:[#allocation5 + $0x130] sm:$0xff] %v2956_v24  ;;  %3790 = vlog2.f32 %v2594_v44  ;;  %v2595_v57 = vadd.f32 1.0, %v3779_v15  ;;  %v2402_v60 = vmul.f32 1.442695, %v2212_v39  ;;  %v2098_v12 = vand.u32 2147483647, %v5053_v4 }
 0x24b   :  { %v3783_v63 = vpop.eup %3782  ;;  %v2957_v14 = vadd.f32 %v2741_v2, %v1933_v6  ;;  %v2767_v59 = vmul.f32 0.6931472, %v3781_v26  ;;  %3792 = vpow2.f32 %v2388_v7  ;;  %v2404_v11 = vmul.f32 1.442695, %v2213_v23 }
 0x24c   :  { %v3785_v48 = vpop.eup %3784  ;;  %v2769_v61 = vmul.f32 0.6931472, %v3783_v63  ;;  %3794 = vlog2.f32 %v2595_v57  ;;  %v2099_v36 = vand.u32 2147483647, %v5056_v30  ;;  %v1955_v13 = vmax.f32 %v5021_v52, 0.0 }
 0x24d   :  { %v3787_v40 = vpop.eup %3786  ;;  %3085 = vst [vmem:[#allocation5 + $0x138] sm:$0xff] %v2957_v14  ;;  %v2970_v25 = vadd.f32 %v2767_v59, %v1946_v18  ;;  %v2588_v47 = vadd.f32 1.0, %v3785_v48  ;;  %3796 = vpow2.f32 %v2414_v22  ;;  %v2226_v1 = vsub.f32 0.0, %v2098_v12  ;;  %v5081_v59 = vpop.f32.mrf.mxu2 }
 0x24e   :  { %v2971_v29 = vadd.f32 %v2769_v61, %v1947_v3  ;;  %v2755_v55 = vmul.f32 0.6931472, %v3787_v40  ;;  %3798 = vpow2.f32 %v2416_v19  ;;  %v2227_v42 = vsub.f32 0.0, %v2099_v36  ;;  %v5087_v40 = vpop.f32.mrf.mxu0 }
 0x24f   :  { %v3789_v31 = vpop.eup %3788  ;;  %3098 = vst [vmem:[#allocation5 + $0x1a0] sm:$0xff] %v2970_v25  ;;  %3800 = vlog2.f32 %v2588_v47  ;;  %v1948_v33 = vmax.f32 %v5012_v27, 0.0  ;;  %v2092_v56 = vand.u32 2147483647, %v5046_v10  ;;  %v2430_v52 = vmul.f32 1.442695, %v2226_v1 }
 0x250   :  { %v3791_v50 = vpop.eup %3790  ;;  %3099 = vst [vmem:[#allocation5 + $0x1a8] sm:$0xff] %v2971_v29  ;;  %v2964_v49 = vadd.f32 %v2755_v55, %v1940_v58  ;;  %v2757_v6 = vmul.f32 0.6931472, %v3789_v31  ;;  %3802 = vpow2.f32 %v2402_v60  ;;  %v2432_v7 = vmul.f32 1.442695, %v2227_v42  ;;  %v5083_v61 = vpop.f32.mrf.mxu3 }
 0x251   :  { %v3793_v46 = vpop.eup %3792  ;;  %v2783_v18 = vmul.f32 0.6931472, %v3791_v50  ;;  %3804 = vpow2.f32 %v2404_v11  ;;  %v2220_v58 = vsub.f32 0.0, %v2092_v56  ;;  %v2093_v44 = vand.u32 2147483647, %v5050_v51  ;;  %v5092_v55 = vpop.f32.mrf.mxu1 }
 0x252   :  { %v3795_v8 = vpop.eup %3794  ;;  %3092 = vst [vmem:[#allocation5 + $0x170] sm:$0xff] %v2964_v49  ;;  %v2965_v54 = vadd.f32 %v2757_v6, %v1941_v37  ;;  %v2589_v0 = vadd.f32 1.0, %v3793_v46  ;;  %v1949_v27 = vmax.f32 %v5015_v17, 0.0  ;;  %v1962_v26 = vmax.f32 %v5037_v45, 0.0 }
 0x253   :  { %v3797_v62 = vpop.eup %3796  ;;  %v2978_v3 = vadd.f32 %v2783_v18, %v1954_v41  ;;  %v2785_v34 = vmul.f32 0.6931472, %v3795_v8  ;;  %v2221_v57 = vsub.f32 0.0, %v2093_v44  ;;  %v2418_v63 = vmul.f32 1.442695, %v2220_v58 }
 0x254   :  { %v3799_v43 = vpop.eup %3798  ;;  %3093 = vst [vmem:[#allocation5 + $0x178] sm:$0xff] %v2965_v54  ;;  %3806 = vlog2.f32 %v2589_v0  ;;  %v2602_v24 = vadd.f32 1.0, %v3797_v62  ;;  %v2106_v14 = vand.u32 2147483647, %v5070_v5  ;;  %v1963_v37 = vmax.f32 %v5039_v9, 0.0 }
 0x255   :  { %v3801_v35 = vpop.eup %3800  ;;  %3106 = vst [vmem:[#allocation5 + $0x1e0] sm:$0xff] %v2978_v3  ;;  %v2979_v15 = vadd.f32 %v2785_v34, %v1955_v13  ;;  %v2603_v2 = vadd.f32 1.0, %v3799_v43  ;;  %3808 = vpow2.f32 %v2430_v52  ;;  %v2420_v17 = vmul.f32 1.442695, %v2221_v57  ;;  %v5098_v44 = vpop.f32.mrf.mxu2 }
 0x256   :  { %v3803_v22 = vpop.eup %3802  ;;  %v2771_v21 = vmul.f32 0.6931472, %v3801_v35  ;;  %3810 = vlog2.f32 %v2602_v24  ;;  %v2234_v45 = vsub.f32 0.0, %v2106_v14  ;;  %v2107_v23 = vand.u32 2147483647, %v5073_v20 }
 0x257   :  { %v3805_v19 = vpop.eup %3804  ;;  %3107 = vst [vmem:[#allocation5 + $0x1e8] sm:$0xff] %v2979_v15  ;;  %3812 = vlog2.f32 %v2603_v2  ;;  %v2596_v53 = vadd.f32 1.0, %v3803_v22  ;;  %v1956_v47 = vmax.f32 %v5030_v38, 0.0  ;;  %v2100_v60 = vand.u32 2147483647, %v5063_v32 }
 0x258   :  { %v2972_v39 = vadd.f32 %v2771_v21, %v1948_v33  ;;  %v2597_v48 = vadd.f32 1.0, %v3805_v19  ;;  %3814 = vpow2.f32 %v2432_v7  ;;  %v2101_v29 = vand.u32 2147483647, %v5065_v16  ;;  %v5100_v2 = vpop.f32.mrf.mxu3 }
 0x259   :  { %3816 = vlog2.f32 %v2596_v53  ;;  %v2446_v9 = vmul.f32 1.442695, %v2234_v45  ;;  %v2235_v41 = vsub.f32 0.0, %v2107_v23  ;;  %v2228_v50 = vsub.f32 0.0, %v2100_v60 }
 0x25a   :  { %v3807_v25 = vpop.eup %3806  ;;  %3100 = vst [vmem:[#allocation5 + $0x1b0] sm:$0xff] %v2972_v39  ;;  %3818 = vlog2.f32 %v2597_v48  ;;  %v2229_v49 = vsub.f32 0.0, %v2101_v29  ;;  %v1957_v0 = vmax.f32 %v5034_v28, 0.0  ;;  %v2114_v52 = vand.u32 2147483647, %v5087_v40  ;;  %v5106_v48 = vpop.f32.mrf.mxu1 }
 0x25b   :  { %v3809_v11 = vpop.eup %3808  ;;  %v2773_v31 = vmul.f32 0.6931472, %v3807_v25  ;;  %3820 = vpow2.f32 %v2418_v63  ;;  %v2448_v46 = vmul.f32 1.442695, %v2235_v41  ;;  %v2434_v42 = vmul.f32 1.442695, %v2228_v50 }
 0x25c   :  { %v3811_v12 = vpop.eup %3810  ;;  %v2610_v36 = vadd.f32 1.0, %v3809_v11  ;;  %3822 = vpow2.f32 %v2420_v17  ;;  %v2436_v8 = vmul.f32 1.442695, %v2229_v49  ;;  %v1970_v24 = vmax.f32 %v5053_v4, 0.0  ;;  %v5103_v4 = vpop.f32.mrf.mxu0 }
 0x25d   :  { %v3813_v6 = vpop.eup %3812  ;;  %v2973_v13 = vadd.f32 %v2773_v31, %v1949_v27  ;;  %v2799_v38 = vmul.f32 0.6931472, %v3811_v12  ;;  %3824 = vpow2.f32 %v2446_v9  ;;  %v2115_v58 = vand.u32 2147483647, %v5092_v55 }
 0x25e   :  { %v3815_v18 = vpop.eup %3814  ;;  %v2801_v1 = vmul.f32 0.6931472, %v3813_v6  ;;  %3826 = vlog2.f32 %v2610_v36  ;;  %v2242_v27 = vsub.f32 0.0, %v2114_v52  ;;  %v2108_v39 = vand.u32 2147483647, %v5081_v59 }
 0x25f   :  { %v3817_v54 = vpop.eup %3816  ;;  %3101 = vst [vmem:[#allocation5 + $0x1b8] sm:$0xff] %v2973_v13  ;;  %v2986_v33 = vadd.f32 %v2799_v38, %v1962_v26  ;;  %v2611_v56 = vadd.f32 1.0, %v3815_v18  ;;  %3828 = vpow2.f32 %v2448_v46  ;;  %v1971_v26 = vmax.f32 %v5056_v30, 0.0 }
 0x260   :  { %v3819_v62 = vpop.eup %3818  ;;  %v2987_v3 = vadd.f32 %v2801_v1, %v1963_v37  ;;  %v2787_v34 = vmul.f32 0.6931472, %v3817_v54  ;;  %3830 = vpow2.f32 %v2434_v42  ;;  %v2243_v19 = vsub.f32 0.0, %v2115_v58  ;;  %v5115_v54 = vpop.f32.mrf.mxu2 }
 0x261   :  { %v3821_v7 = vpop.eup %3820  ;;  %3114 = vst [vmem:[#allocation5 + $0x220] sm:$0xff] %v2986_v33  ;;  %v2789_v43 = vmul.f32 0.6931472, %v3819_v62  ;;  %3832 = vlog2.f32 %v2611_v56  ;;  %v2462_v14 = vmul.f32 1.442695, %v2242_v27  ;;  %v1964_v45 = vmax.f32 %v5046_v10, 0.0  ;;  %v5118_v62 = vpop.f32.mrf.mxu3 }
 0x262   :  { %v3823_v35 = vpop.eup %3822  ;;  %3115 = vst [vmem:[#allocation5 + $0x228] sm:$0xff] %v2987_v3  ;;  %v2980_v28 = vadd.f32 %v2787_v34, %v1956_v47  ;;  %v2604_v15 = vadd.f32 1.0, %v3821_v7  ;;  %3834 = vpow2.f32 %v2436_v8  ;;  %v2464_v30 = vmul.f32 1.442695, %v2243_v19 }
 0x263   :  { %v3825_v22 = vpop.eup %3824  ;;  %v2981_v21 = vadd.f32 %v2789_v43, %v1957_v0  ;;  %v2605_v57 = vadd.f32 1.0, %v3823_v35  ;;  %v2236_v47 = vsub.f32 0.0, %v2108_v39  ;;  %v2109_v60 = vand.u32 2147483647, %v5083_v61 }
 0x264   :  { %v3827_v53 = vpop.eup %3826  ;;  %3108 = vst [vmem:[#allocation5 + $0x1f0] sm:$0xff] %v2980_v28  ;;  %3836 = vlog2.f32 %v2604_v15  ;;  %v2618_v63 = vadd.f32 1.0, %v3825_v22  ;;  %v1965_v31 = vmax.f32 %v5050_v51, 0.0  ;;  %v1978_v10 = vmax.f32 %v5070_v5, 0.0  ;;  %v5120_v43 = vpop.f32.mrf.mxu0 }
 0x265   :  { %v3829_v17 = vpop.eup %3828  ;;  %3109 = vst [vmem:[#allocation5 + $0x1f8] sm:$0xff] %v2981_v21  ;;  %v2815_v37 = vmul.f32 0.6931472, %v3827_v53  ;;  %3838 = vlog2.f32 %v2605_v57  ;;  %v2450_v36 = vmul.f32 1.442695, %v2236_v47  ;;  %v2237_v50 = vsub.f32 0.0, %v2109_v60  ;;  %v5122_v15 = vpop.f32.mrf.mxu1 }
 0x266   :  { %v3831_v23 = vpop.eup %3830  ;;  %3840 = vlog2.f32 %v2618_v63  ;;  %v2619_v25 = vadd.f32 1.0, %v3829_v17  ;;  %v2122_v6 = vand.u32 2147483647, %v5103_v4  ;;  %v2123_v51 = vand.u32 2147483647, %v5106_v48 }
 0x267   :  { %v3833_v29 = vpop.eup %3832  ;;  %v2994_v11 = vadd.f32 %v2815_v37, %v1970_v24  ;;  %v2612_v9 = vadd.f32 1.0, %v3831_v23  ;;  %3842 = vpow2.f32 %v2462_v14  ;;  %v2452_v46 = vmul.f32 1.442695, %v2237_v50 }
 0x268   :  { %v3835_v41 = vpop.eup %3834  ;;  %v2817_v12 = vmul.f32 0.6931472, %v3833_v29  ;;  %3844 = vlog2.f32 %v2619_v25  ;;  %v1979_v42 = vmax.f32 %v5073_v20, 0.0  ;;  %v2250_v8 = vsub.f32 0.0, %v2122_v6  ;;  %v5131_v50 = vpop.f32.mrf.mxu2 }
 0x269   :  { %3122 = vst [vmem:[#allocation5 + $0x260] sm:$0xff] %v2994_v11  ;;  %3846 = vlog2.f32 %v2612_v9  ;;  %v2613_v49 = vadd.f32 1.0, %v3835_v41  ;;  %v2251_v0 = vsub.f32 0.0, %v2123_v51  ;;  %v2116_v56 = vand.u32 2147483647, %v5098_v44 }
 0x26a   :  { %v3837_v13 = vpop.eup %3836  ;;  %v2995_v38 = vadd.f32 %v2817_v12, %v1971_v26  ;;  %3848 = vpow2.f32 %v2464_v30  ;;  %v2478_v7 = vmul.f32 1.442695, %v2250_v8  ;;  %v1972_v26 = vmax.f32 %v5063_v32, 0.0 }
 0x26b   :  { %v3839_v18 = vpop.eup %3838  ;;  %v2803_v1 = vmul.f32 0.6931472, %v3837_v13  ;;  %3850 = vlog2.f32 %v2613_v49  ;;  %v2480_v35 = vmul.f32 1.442695, %v2251_v0  ;;  %v2244_v28 = vsub.f32 0.0, %v2116_v56 }
 0x26c   :  { %v3841_v33 = vpop.eup %3840  ;;  %3123 = vst [vmem:[#allocation5 + $0x268] sm:$0xff] %v2995_v38  ;;  %v2805_v5 = vmul.f32 0.6931472, %v3839_v18  ;;  %3852 = vpow2.f32 %v2450_v36  ;;  %v1973_v53 = vmax.f32 %v5065_v16, 0.0  ;;  %v2117_v37 = vand.u32 2147483647, %v5100_v2  ;;  %v5133_v38 = vpop.f32.mrf.mxu3 }
 0x26d   :  { %v3843_v3 = vpop.eup %3842  ;;  %v2988_v34 = vadd.f32 %v2803_v1, %v1964_v45  ;;  %v2831_v52 = vmul.f32 0.6931472, %v3841_v33  ;;  %3854 = vpow2.f32 %v2452_v46  ;;  %v2466_v63 = vmul.f32 1.442695, %v2244_v28  ;;  %v5136_v1 = vpop.f32.mrf.mxu0 }
 0x26e   :  { %v3845_v20 = vpop.eup %3844  ;;  %v2989_v24 = vadd.f32 %v2805_v5, %v1965_v31  ;;  %v2626_v58 = vadd.f32 1.0, %v3843_v3  ;;  %3856 = vpow2.f32 %v2478_v7  ;;  %v2130_v32 = vand.u32 2147483647, %v5120_v43  ;;  %v5139_v0 = vpop.f32.mrf.mxu1 }
 0x26f   :  { %v3847_v27 = vpop.eup %3846  ;;  %3116 = vst [vmem:[#allocation5 + $0x230] sm:$0xff] %v2988_v34  ;;  %v3002_v22 = vadd.f32 %v2831_v52, %v1978_v10  ;;  %v2833_v21 = vmul.f32 0.6931472, %v3845_v20  ;;  %v2245_v16 = vsub.f32 0.0, %v2117_v37  ;;  %v2131_v31 = vand.u32 2147483647, %v5122_v15 }
 0x270   :  { %v3849_v57 = vpop.eup %3848  ;;  %3117 = vst [vmem:[#allocation5 + $0x238] sm:$0xff] %v2989_v24  ;;  %v2819_v19 = vmul.f32 0.6931472, %v3847_v27  ;;  %3858 = vlog2.f32 %v2626_v58  ;;  %v2258_v11 = vsub.f32 0.0, %v2130_v32  ;;  %v1986_v41 = vmax.f32 %v5087_v40, 0.0  ;;  %v5146_v32 = vpop.f32.mrf.mxu2 }
 0x271   :  { %v3851_v14 = vpop.eup %3850  ;;  %3130 = vst [vmem:[#allocation5 + $0x2a0] sm:$0xff] %v3002_v22  ;;  %v3003_v39 = vadd.f32 %v2833_v21, %v1979_v42  ;;  %v2627_v17 = vadd.f32 1.0, %v3849_v57  ;;  %3860 = vpow2.f32 %v2480_v35  ;;  %v2468_v12 = vmul.f32 1.442695, %v2245_v16 }
 0x272   :  { %v3853_v45 = vpop.eup %3852  ;;  %v2996_v30 = vadd.f32 %v2819_v19, %v1972_v26  ;;  %v2821_v23 = vmul.f32 0.6931472, %v3851_v14  ;;  %3862 = vpow2.f32 %v2466_v63  ;;  %v2124_v36 = vand.u32 2147483647, %v5115_v54 }
 0x273   :  { %v3855_v25 = vpop.eup %3854  ;;  %3131 = vst [vmem:[#allocation5 + $0x2a8] sm:$0xff] %v3003_v39  ;;  %3864 = vlog2.f32 %v2627_v17  ;;  %v2620_v47 = vadd.f32 1.0, %v3853_v45  ;;  %v2494_v6 = vmul.f32 1.442695, %v2258_v11  ;;  %v2259_v13 = vsub.f32 0.0, %v2131_v31 }
 0x274   :  { %3124 = vst [vmem:[#allocation5 + $0x270] sm:$0xff] %v2996_v30  ;;  %v2997_v60 = vadd.f32 %v2821_v23, %v1973_v53  ;;  %v2621_v29 = vadd.f32 1.0, %v3855_v25  ;;  %v3857_v9 = vpop.eup %3856  ;;  %v1987_v18 = vmax.f32 %v5092_v55, 0.0  ;;  %v2252_v40 = vsub.f32 0.0, %v2124_v36 }
 0x275   :  { %3866 = vlog2.f32 %v2620_v47  ;;  %v2634_v49 = vadd.f32 1.0, %v3857_v9  ;;  %v2496_v33 = vmul.f32 1.442695, %v2259_v13  ;;  %v2125_v5 = vand.u32 2147483647, %v5118_v62 }
 0x276   :  { %v3859_v10 = vpop.eup %3858  ;;  %3125 = vst [vmem:[#allocation5 + $0x278] sm:$0xff] %v2997_v60  ;;  %3868 = vlog2.f32 %v2621_v29  ;;  %v2482_v52 = vmul.f32 1.442695, %v2252_v40  ;;  %v1980_v55 = vmax.f32 %v5081_v59, 0.0  ;;  %v1981_v58 = vmax.f32 %v5083_v61, 0.0  ;;  %v5150_v29 = vpop.f32.mrf.mxu3 }
 0x277   :  { %v3861_v46 = vpop.eup %3860  ;;  %v2847_v51 = vmul.f32 0.6931472, %v3859_v10  ;;  %3870 = vpow2.f32 %v2468_v12  ;;  %v2253_v20 = vsub.f32 0.0, %v2125_v5  ;;  %v2138_v35 = vand.u32 2147483647, %v5136_v1 }
 0x278   :  { %v3863_v42 = vpop.eup %3862  ;;  %3872 = vlog2.f32 %v2634_v49  ;;  %v2635_v8 = vadd.f32 1.0, %v3861_v46  ;;  %v2139_v28 = vand.u32 2147483647, %v5139_v0  ;;  %v1994_v61 = vmax.f32 %v5103_v4, 0.0 }
 0x279   :  { %v3865_v56 = vpop.eup %3864  ;;  %v3010_v3 = vadd.f32 %v2847_v51, %v1986_v41  ;;  %v2628_v34 = vadd.f32 1.0, %v3863_v42  ;;  %3874 = vpow2.f32 %v2494_v6  ;;  %v2484_v26 = vmul.f32 1.442695, %v2253_v20  ;;  %v5153_v41 = vpop.f32.mrf.mxu0 }
 0x27a   :  { %v2849_v7 = vmul.f32 0.6931472, %v3865_v56  ;;  %3876 = vlog2.f32 %v2635_v8  ;;  %v2266_v59 = vsub.f32 0.0, %v2138_v35  ;;  %v2267_v53 = vsub.f32 0.0, %v2139_v28  ;;  %v5156_v51 = vpop.f32.mrf.mxu1 }
 0x27b   :  { %v3867_v24 = vpop.eup %3866  ;;  %3138 = vst [vmem:[#allocation5 + $0x2e0] sm:$0xff] %v3010_v3  ;;  %3878 = vlog2.f32 %v2628_v34  ;;  %v1995_v47 = vmax.f32 %v5106_v48, 0.0  ;;  %v2132_v60 = vand.u32 2147483647, %v5131_v50  ;;  %v2133_v9 = vand.u32 2147483647, %v5133_v38 }
 0x27c   :  { %v3869_v27 = vpop.eup %3868  ;;  %v3011_v22 = vadd.f32 %v2849_v7, %v1987_v18  ;;  %v2835_v21 = vmul.f32 0.6931472, %v3867_v24  ;;  %3880 = vpow2.f32 %v2496_v33  ;;  %v2510_v30 = vmul.f32 1.442695, %v2266_v59 }
 0x27d   :  { %v3871_v57 = vpop.eup %3870  ;;  %v2837_v19 = vmul.f32 0.6931472, %v3869_v27  ;;  %3882 = vpow2.f32 %v2482_v52  ;;  %v2512_v23 = vmul.f32 1.442695, %v2267_v53  ;;  %v1988_v36 = vmax.f32 %v5098_v44, 0.0 }
 0x27e   :  { %v3873_v63 = vpop.eup %3872  ;;  %3139 = vst [vmem:[#allocation5 + $0x2e8] sm:$0xff] %v3011_v22  ;;  %v3004_v14 = vadd.f32 %v2835_v21, %v1980_v55  ;;  %v2629_v39 = vadd.f32 1.0, %v3871_v57  ;;  %3884 = vpow2.f32 %v2484_v26  ;;  %v2260_v48 = vsub.f32 0.0, %v2132_v60  ;;  %v5164_v57 = vpop.f32.mrf.mxu2 }
 0x27f   :  { %v3875_v17 = vpop.eup %3874  ;;  %v3005_v37 = vadd.f32 %v2837_v19, %v1981_v58  ;;  %v2863_v45 = vmul.f32 0.6931472, %v3873_v63  ;;  %v2261_v46 = vsub.f32 0.0, %v2133_v9  ;;  %v2146_v33 = vand.u32 2147483647, %v5153_v41  ;;  %v5167_v53 = vpop.f32.mrf.mxu3 }
 0x280   :  { %v3877_v25 = vpop.eup %3876  ;;  %3132 = vst [vmem:[#allocation5 + $0x2b0] sm:$0xff] %v3004_v14  ;;  %3886 = vlog2.f32 %v2629_v39  ;;  %v2642_v16 = vadd.f32 1.0, %v3875_v17  ;;  %v2498_v8 = vmul.f32 1.442695, %v2260_v48  ;;  %v1989_v44 = vmax.f32 %v5100_v2, 0.0 }
 0x281   :  { %v3879_v4 = vpop.eup %3878  ;;  %3133 = vst [vmem:[#allocation5 + $0x2b8] sm:$0xff] %v3005_v37  ;;  %v3018_v11 = vadd.f32 %v2863_v45, %v1994_v61  ;;  %v2865_v31 = vmul.f32 0.6931472, %v3877_v25  ;;  %3888 = vpow2.f32 %v2510_v30  ;;  %v2500_v56 = vmul.f32 1.442695, %v2261_v46 }
 0x282   :  { %v3881_v12 = vpop.eup %3880  ;;  %v2851_v10 = vmul.f32 0.6931472, %v3879_v4  ;;  %3890 = vlog2.f32 %v2642_v16  ;;  %v2002_v34 = vmax.f32 %v5120_v43, 0.0  ;;  %v2274_v52 = vsub.f32 0.0, %v2146_v33 }
 0x283   :  { %v3883_v49 = vpop.eup %3882  ;;  %3146 = vst [vmem:[#allocation5 + $0x320] sm:$0xff] %v3018_v11  ;;  %v3019_v6 = vadd.f32 %v2865_v31, %v1995_v47  ;;  %v2643_v13 = vadd.f32 1.0, %v3881_v12  ;;  %3892 = vpow2.f32 %v2512_v23  ;;  %v2147_v7 = vand.u32 2147483647, %v5156_v51 }
 0x284   :  { %v3885_v18 = vpop.eup %3884  ;;  %v3012_v40 = vadd.f32 %v2851_v10, %v1988_v36  ;;  %v2636_v42 = vadd.f32 1.0, %v3883_v49  ;;  %v2003_v24 = vmax.f32 %v5122_v15, 0.0  ;;  %v2140_v58 = vand.u32 2147483647, %v5146_v32 }
 0x285   :  { %3147 = vst [vmem:[#allocation5 + $0x328] sm:$0xff] %v3019_v6  ;;  %3894 = vlog2.f32 %v2643_v13  ;;  %v2637_v5 = vadd.f32 1.0, %v3885_v18  ;;  %v2526_v28 = vmul.f32 1.442695, %v2274_v52  ;;  %v2275_v27 = vsub.f32 0.0, %v2147_v7 }
 0x286   :  { %v3887_v3 = vpop.eup %3886  ;;  %3140 = vst [vmem:[#allocation5 + $0x2f0] sm:$0xff] %v3012_v40  ;;  %3896 = vlog2.f32 %v2636_v42  ;;  %v2268_v43 = vsub.f32 0.0, %v2140_v58  ;;  %v2141_v15 = vand.u32 2147483647, %v5150_v29  ;;  %v1996_v61 = vmax.f32 %v5115_v54, 0.0 }
 0x287   :  { %v3889_v55 = vpop.eup %3888  ;;  %v2853_v20 = vmul.f32 0.6931472, %v3887_v3  ;;  %3898 = vlog2.f32 %v2637_v5  ;;  %v2528_v59 = vmul.f32 1.442695, %v2275_v27  ;;  %v2148_v30 = vand.u32 2147483647, %v5164_v57 }
 0x288   :  { %v3891_v35 = vpop.eup %3890  ;;  %v2650_v2 = vadd.f32 1.0, %v3889_v55  ;;  %3900 = vpow2.f32 %v2498_v8  ;;  %v2514_v39 = vmul.f32 1.442695, %v2268_v43  ;;  %v2269_v45 = vsub.f32 0.0, %v2141_v15 }
 0x289   :  { %v3893_v22 = vpop.eup %3892  ;;  %v3013_v21 = vadd.f32 %v2853_v20, %v1989_v44  ;;  %v2879_v26 = vmul.f32 0.6931472, %v3891_v35  ;;  %3902 = vpow2.f32 %v2500_v56  ;;  %v1997_v47 = vmax.f32 %v5118_v62, 0.0 }
 0x28a   :  { %3904 = vlog2.f32 %v2650_v2  ;;  %v2651_v19 = vadd.f32 1.0, %v3893_v22  ;;  %v2149_v16 = vand.u32 2147483647, %v5167_v53  ;;  %v2516_v54 = vmul.f32 1.442695, %v2269_v45 }
 0x28b   :  { %v3895_v63 = vpop.eup %3894  ;;  %3141 = vst [vmem:[#allocation5 + $0x2f8] sm:$0xff] %v3013_v21  ;;  %v3026_v14 = vadd.f32 %v2879_v26, %v2002_v34  ;;  %3906 = vpow2.f32 %v2526_v28  ;;  %v2276_v36 = vsub.f32 0.0, %v2148_v30  ;;  %v2010_v62 = vmax.f32 %v5136_v1, 0.0 }
 0x28c   :  { %v3897_v17 = vpop.eup %3896  ;;  %v2881_v37 = vmul.f32 0.6931472, %v3895_v63  ;;  %3908 = vlog2.f32 %v2651_v19  ;;  %v2277_v10 = vsub.f32 0.0, %v2149_v16  ;;  %v2011_v5 = vmax.f32 %v5139_v0, 0.0 }
 0x28d   :  { %v3899_v23 = vpop.eup %3898  ;;  %3154 = vst [vmem:[#allocation5 + $0x360] sm:$0xff] %v3026_v14  ;;  %v2867_v25 = vmul.f32 0.6931472, %v3897_v17  ;;  %3910 = vpow2.f32 %v2528_v59  ;;  %v2530_v18 = vmul.f32 1.442695, %v2276_v36  ;;  %v2004_v58 = vmax.f32 %v5131_v50, 0.0 }
 0x28e   :  { %v3901_v60 = vpop.eup %3900  ;;  %v3027_v4 = vadd.f32 %v2881_v37, %v2003_v24  ;;  %v2869_v11 = vmul.f32 0.6931472, %v3899_v23  ;;  %3912 = vpow2.f32 %v2514_v39  ;;  %v2532_v8 = vmul.f32 1.442695, %v2277_v10 }
 0x28f   :  { %v3903_v31 = vpop.eup %3902  ;;  %v3020_v9 = vadd.f32 %v2867_v25, %v1996_v61  ;;  %v2644_v12 = vadd.f32 1.0, %v3901_v60  ;;  %3914 = vpow2.f32 %v2516_v54  ;;  %v2005_v2 = vmax.f32 %v5133_v38, 0.0 }
 0x290   :  { %v3905_v48 = vpop.eup %3904  ;;  %3155 = vst [vmem:[#allocation5 + $0x368] sm:$0xff] %v3027_v4  ;;  %v3021_v49 = vadd.f32 %v2869_v11, %v1997_v47  ;;  %v2645_v6 = vadd.f32 1.0, %v3903_v31  ;;  %v2018_v19 = vmax.f32 %v5153_v41, 0.0  ;;  %v2019_v61 = vmax.f32 %v5156_v51, 0.0 }
 0x291   :  { %v3907_v13 = vpop.eup %3906  ;;  %3148 = vst [vmem:[#allocation5 + $0x330] sm:$0xff] %v3020_v9  ;;  %v2895_v46 = vmul.f32 0.6931472, %v3905_v48  ;;  %3916 = vlog2.f32 %v2644_v12  ;;  %v2012_v39 = vmax.f32 %v5146_v32, 0.0  ;;  %v2013_v41 = vmax.f32 %v5150_v29, 0.0 }
 0x292   :  { %v3909_v40 = vpop.eup %3908  ;;  %3149 = vst [vmem:[#allocation5 + $0x338] sm:$0xff] %v3021_v49  ;;  %3918 = vlog2.f32 %v2645_v6  ;;  %v2658_v42 = vadd.f32 1.0, %v3907_v13  ;;  %v2020_v16 = vmax.f32 %v5164_v57, 0.0  ;;  %v2021_v4 = vmax.f32 %v5167_v53, 0.0 }
 0x293   :  { %v3911_v33 = vpop.eup %3910  ;;  %v3034_v44 = vadd.f32 %v2895_v46, %v2010_v62  ;;  %v2897_v56 = vmul.f32 0.6931472, %v3909_v40  ;;  %3920 = vpow2.f32 %v2530_v18 }
 0x294   :  { %v3913_v3 = vpop.eup %3912  ;;  %3922 = vlog2.f32 %v2658_v42  ;;  %v2659_v34 = vadd.f32 1.0, %v3911_v33 }
 0x295   :  { %3162 = vst [vmem:[#allocation5 + $0x3a0] sm:$0xff] %v3034_v44  ;;  %v3035_v52 = vadd.f32 %v2897_v56, %v2011_v5  ;;  %v2652_v1 = vadd.f32 1.0, %v3913_v3  ;;  %3924 = vpow2.f32 %v2532_v8  ;;  %v3915_v7 = vpop.eup %3914 }
 0x296   :  { %3926 = vlog2.f32 %v2659_v34  ;;  %v2653_v20 = vadd.f32 1.0, %v3915_v7 }
 0x297   :  { %v3917_v55 = vpop.eup %3916  ;;  %3163 = vst [vmem:[#allocation5 + $0x3a8] sm:$0xff] %v3035_v52  ;;  %3928 = vlog2.f32 %v2652_v1 }
 0x298   :  { %v3919_v24 = vpop.eup %3918  ;;  %v2883_v35 = vmul.f32 0.6931472, %v3917_v55  ;;  %3930 = vlog2.f32 %v2653_v20 }
 0x299   :  { %v3921_v0 = vpop.eup %3920  ;;  %v2885_v28 = vmul.f32 0.6931472, %v3919_v24 }
 0x29a   :  { %v3923_v27 = vpop.eup %3922  ;;  %v3028_v22 = vadd.f32 %v2883_v35, %v2004_v58  ;;  %v2660_v21 = vadd.f32 1.0, %v3921_v0 }
 0x29b   :  { %v3925_v26 = vpop.eup %3924  ;;  %v3029_v43 = vadd.f32 %v2885_v28, %v2005_v2  ;;  %v2911_v59 = vmul.f32 0.6931472, %v3923_v27 }
 0x29c   :  { %v3927_v15 = vpop.eup %3926  ;;  %3156 = vst [vmem:[#allocation5 + $0x370] sm:$0xff] %v3028_v22  ;;  %3932 = vlog2.f32 %v2660_v21  ;;  %v2661_v63 = vadd.f32 1.0, %v3925_v26 }
 0x29d   :  { %v3929_v14 = vpop.eup %3928  ;;  %3157 = vst [vmem:[#allocation5 + $0x378] sm:$0xff] %v3029_v43  ;;  %v3042_v50 = vadd.f32 %v2911_v59, %v2018_v19  ;;  %v2913_v38 = vmul.f32 0.6931472, %v3927_v15 }
 0x29e   :  { %v2899_v17 = vmul.f32 0.6931472, %v3929_v14  ;;  %3934 = vlog2.f32 %v2661_v63  ;;  %v3931_v37 = vpop.eup %3930 }
 0x29f   :  { %3170 = vst [vmem:[#allocation5 + $0x3e0] sm:$0xff] %v3042_v50  ;;  %v3043_v45 = vadd.f32 %v2913_v38, %v2019_v61  ;;  %v2901_v23 = vmul.f32 0.6931472, %v3931_v37 }
 0x2a0   :  { %v3036_v30 = vadd.f32 %v2899_v17, %v2012_v39 }
 0x2a1   :  { %3171 = vst [vmem:[#allocation5 + $0x3e8] sm:$0xff] %v3043_v45  ;;  %v3037_v47 = vadd.f32 %v2901_v23, %v2013_v41 }
 0x2a2   :  { %v3933_v25 = vpop.eup %3932  ;;  %3164 = vst [vmem:[#allocation5 + $0x3b0] sm:$0xff] %v3036_v30 }
 0x2a3   :  { %v2915_v60 = vmul.f32 0.6931472, %v3933_v25  ;;  %3165 = vst [vmem:[#allocation5 + $0x3b8] sm:$0xff] %v3037_v47 }
 0x2a4   :  { %v3935_v32 = vpop.eup %3934 }
 0x2a5   :  { %v3044_v51 = vadd.f32 %v2915_v60, %v2020_v16  ;;  %v2917_v29 = vmul.f32 0.6931472, %v3935_v32 }
 0x2a7   :  { %3172 = vst [vmem:[#allocation5 + $0x3f0] sm:$0xff] %v3044_v51  ;;  %v3045_v11 = vadd.f32 %v2917_v29, %v2021_v4 }
 0x2a9   :  { %3173 = vst [vmem:[#allocation5 + $0x3f8] sm:$0xff] %v3045_v11 }
 0x2aa   :  { %3186 = dma.vmem_to_hbm [thread:$0]  %s3179_s5, 16384, %s3181_s8, [#allocation4], %s3998_s9, %s3998_s9, %s3999_s10  }
 0x2ab   :  { %3991 = dma.done.wait [#allocation4], 16384  }
 0x2ac   :  { %3992 = vsyncadd [#allocation4], 4294950912 }
 0x2ad   :  { %3191 = vsyncpa [#allocation3], 1 }
 0x2ae   :  { %3192 = vsyncpa [#allocation4], 1 }

</bundles_post_ra>
